<compile_context>
chip_gen: v6e
topology: v6e:2x2x1
jax: 0.10.0
libtpu: 0.0.40
codegen_flags: <defaults>
</compile_context>

<pallas_src>
import jax
import jax.numpy as jnp
from jax.experimental import pallas as pl
from jax.experimental.pallas import tpu as pltpu

EPS = 1e-5


def resblock_kernel(x_ref, w1_ref, g1_ref, b1_ref, w2_ref, g2_ref, b2_ref,
                    o_ref, pad_ref, col_ref):
    """Single-program kernel; the whole (small) batch is resident in VMEM.

    x_ref  : (N, H, W, C)    unpadded input, NHWC, f32
    w*_ref : (9*C, C)        conv weights, rows ordered as (ky, kx, ci), bf16
    g*/b*  : (1, C)          BN gamma / beta, f32
    o_ref  : (N, H, W, C)    output, f32
    pad_ref: (N, H+2, W, C)  VMEM scratch: activation padded along H only, f32
    col_ref: (N*H*W, 9*C)    VMEM scratch: im2col matrix, bf16
    """
    N, H, W, C = x_ref.shape
    M = N * H * W
    inv_m = 1.0 / M

    # W-halo masks (built once, reused by both convs; hoisted out of the im2col loops).
    w_idx = jax.lax.broadcasted_iota(jnp.int32, (N, H, W, C), 2)
    mask_l = w_idx > 0          # valid when reading column w-1
    mask_r = w_idx < (W - 1)    # valid when reading column w+1

    def build_im2col():
        # Fill col_ref[:, (3*ky+kx)*C : +C] with the (ky,kx)-shifted window of pad_ref.
        # H shift: cheap static slice on a non-tiled dim.  W shift: XLU roll + VPU mask.
        for ky in range(3):
            slab = pad_ref[:, ky:ky + H, :, :]            # (N, H, W, C), aligned tiles
            for kx in range(3):
                if kx == 1:                               # read column w
                    v = slab
                elif kx == 0:                             # read column w-1
                    v = jnp.where(mask_l, pltpu.roll(slab, shift=1, axis=2), 0.0)
                else:                                     # kx == 2, read column w+1
                    v = jnp.where(mask_r, pltpu.roll(slab, shift=W - 1, axis=2), 0.0)
                o = 3 * ky + kx
                col_ref[:, o * C:(o + 1) * C] = (
                    v.reshape(M, C).astype(jnp.bfloat16))

    def conv_bn(w_ref, gamma, beta):
        # One large-K (K = 9*C) bf16 matmul on the MXU, f32 accumulation.
        y = jnp.dot(col_ref[...], w_ref[...],
                    preferred_element_type=jnp.float32)   # (M, C) f32
        # Training-mode BN, single pass: var = E[y^2] - mean^2, folded into scale/shift.
        s = jnp.sum(y, axis=0, keepdims=True)
        ss = jnp.sum(y * y, axis=0, keepdims=True)
        mean = s * inv_m
        var = ss * inv_m - mean * mean
        scale = gamma * jax.lax.rsqrt(var + EPS)          # EUP rsqrt
        shift = beta - mean * scale
        return y * scale + shift

    # ---- pad the input along H (zero only the halo rows; reused by conv2) ----
    zero_row = jnp.zeros((N, 1, W, C), jnp.float32)
    pad_ref[:, 0:1, :, :] = zero_row
    pad_ref[:, H + 1:H + 2, :, :] = zero_row
    pad_ref[:, 1:H + 1, :, :] = x_ref[...]

    # ---- conv1 -> bn1 -> relu ----
    build_im2col()
    y1 = jnp.maximum(conv_bn(w1_ref, g1_ref[...], b1_ref[...]), 0.0)

    # ---- conv2 -> bn2 -> +residual -> relu ----
    pad_ref[:, 1:H + 1, :, :] = y1.reshape(N, H, W, C)     # halo rows are still zero
    build_im2col()
    y2 = conv_bn(w2_ref, g2_ref[...], b2_ref[...])

    out = jnp.maximum(x_ref[...].reshape(M, C) + y2, 0.0)  # aligned residual load
    o_ref[...] = out.reshape(N, H, W, C)


def prepare_params(params):
    """One-time parameter preprocessing (hoisted out of the per-call hot path).

    Conv weights: OIHW -> (ky, kx, ci, co) -> (9*C, C), cast to bf16 for the MXU.
    BN params   : (C,) -> (1, C), f32.
    """
    c = params["g1"].shape[0]

    def wmat(w):
        return jnp.transpose(w, (2, 3, 1, 0)).reshape(9 * c, c).astype(jnp.bfloat16)

    return {
        "w1": wmat(params["w1"]),
        "w2": wmat(params["w2"]),
        "g1": params["g1"].reshape(1, c).astype(jnp.float32),
        "b1": params["b1"].reshape(1, c).astype(jnp.float32),
        "g2": params["g2"].reshape(1, c).astype(jnp.float32),
        "b2": params["b2"].reshape(1, c).astype(jnp.float32),
    }


@jax.jit
def resblock_forward(x_nchw, prep):
    """NCHW in / NCHW out; the hot path runs in a single Pallas kernel call."""
    x = jnp.transpose(x_nchw, (0, 2, 3, 1)).astype(jnp.float32)   # NCHW -> NHWC
    N, H, W, C = x.shape

    out_nhwc = pl.pallas_call(
        resblock_kernel,
        out_shape=jax.ShapeDtypeStruct((N, H, W, C), jnp.float32),
        grid=(1,),
        in_specs=[
            pl.BlockSpec((N, H, W, C), lambda i: (0, 0, 0, 0)),
            pl.BlockSpec((9 * C, C), lambda i: (0, 0)),
            pl.BlockSpec((1, C), lambda i: (0, 0)),
            pl.BlockSpec((1, C), lambda i: (0, 0)),
            pl.BlockSpec((9 * C, C), lambda i: (0, 0)),
            pl.BlockSpec((1, C), lambda i: (0, 0)),
            pl.BlockSpec((1, C), lambda i: (0, 0)),
        ],
        out_specs=pl.BlockSpec((N, H, W, C), lambda i: (0, 0, 0, 0)),
        scratch_shapes=[
            pltpu.VMEM((N, H + 2, W, C), jnp.float32),        # H-padded activation
            pltpu.VMEM((N * H * W, 9 * C), jnp.bfloat16),     # im2col matrix
        ],
        compiler_params=pltpu.CompilerParams(
            dimension_semantics=("arbitrary",),
            vmem_limit_bytes=32 * 1024 * 1024),
        # TODO(synk): for large shapes / v7x (64 MiB VMEM), tile over N (or H) with a two-pass
        # BN-stats accumulation and mark that grid axis "parallel" to use both TensorCores;
        # at this toy size (<1 MiB of VMEM) a single program is the right shape.
    )(x, prep["w1"], prep["g1"], prep["b1"], prep["w2"], prep["g2"], prep["b2"])

    return jnp.transpose(out_nhwc, (0, 3, 1, 2))                  # NHWC -> NCHW


def resblock_reference(x_nchw, params):
    """Pure-JAX f32 reference (same training-mode BN semantics) for correctness check."""
    def conv(x, w):
        return jax.lax.conv_general_dilated(
            x, w, window_strides=(1, 1), padding=((1, 1), (1, 1)),
            dimension_numbers=("NCHW", "OIHW", "NCHW"),
            precision=jax.lax.Precision.HIGHEST)

    def bn(y, g, b):
        mean = y.mean(axis=(0, 2, 3), keepdims=True)
        var = ((y - mean) ** 2).mean(axis=(0, 2, 3), keepdims=True)
        return (y - mean) / jnp.sqrt(var + EPS) * g.reshape(1, -1, 1, 1) \
            + b.reshape(1, -1, 1, 1)

    y = jax.nn.relu(bn(conv(x_nchw, params["w1"]), params["g1"], params["b1"]))
    y = bn(conv(y, params["w2"]), params["g2"], params["b2"])
    return jax.nn.relu(x_nchw + y)


if __name__ == "__main__":
    # Small, TPU-friendly shapes: batch=2, num_filters=128 (lane-aligned), spatial=8x8.
    N, C, H, W = 2, 128, 8, 8

    key = jax.random.PRNGKey(0)
    k_x, k_w1, k_w2, k_g1, k_b1, k_g2, k_b2 = jax.random.split(key, 7)

    x = jax.random.normal(k_x, (N, C, H, W), dtype=jnp.float32)

    # Deterministic synthetic parameters (Conv2d weight shape = (C_out, C_in, 3, 3)).
    params = {
        "w1": 0.05 * jax.random.normal(k_w1, (C, C, 3, 3), dtype=jnp.float32),
        "w2": 0.05 * jax.random.normal(k_w2, (C, C, 3, 3), dtype=jnp.float32),
        "g1": 1.0 + 0.1 * jax.random.normal(k_g1, (C,), dtype=jnp.float32),
        "b1": 0.1 * jax.random.normal(k_b1, (C,), dtype=jnp.float32),
        "g2": 1.0 + 0.1 * jax.random.normal(k_g2, (C,), dtype=jnp.float32),
        "b2": 0.1 * jax.random.normal(k_b2, (C,), dtype=jnp.float32),
    }

    prep = prepare_params(params)      # one-time weight reshape/cast (hoisted out of hot path)
    out = jax.block_until_ready(resblock_forward(x, prep))
    ref = jax.block_until_ready(resblock_reference(x, params))

    assert out.shape == (N, C, H, W), out.shape
    # Kernel feeds the MXU bf16 operands (f32 accumulation) across two chained convs, so the
    # comparison against the all-f32 reference carries ~1% mixed-precision noise on unit-scale
    # BN-normalized activations; tolerances are sized for that, not for an f32-exact match.
    max_err = float(jnp.max(jnp.abs(out - ref)))
    mean_err = float(jnp.mean(jnp.abs(out - ref)))
    assert max_err < 1e-1, f"max abs error {max_err}"
    assert mean_err < 1e-2, f"mean abs error {mean_err}"

    print("KERNEL_OK")
</pallas_src>

<mosaic_0001>
module attributes {stable_mosaic.version = 11 : i64} {
  func.func @resblock_kernel(%arg0: i32, %arg1: memref<2x8x8x128xf32, #tpu.memory_space<vmem>>, %arg2: memref<1152x128xbf16, #tpu.memory_space<vmem>>, %arg3: memref<1x128xf32, #tpu.memory_space<vmem>>, %arg4: memref<1x128xf32, #tpu.memory_space<vmem>>, %arg5: memref<1152x128xbf16, #tpu.memory_space<vmem>>, %arg6: memref<1x128xf32, #tpu.memory_space<vmem>>, %arg7: memref<1x128xf32, #tpu.memory_space<vmem>>, %arg8: memref<2x8x8x128xf32, #tpu.memory_space<vmem>>, %arg9: memref<2x10x8x128xf32, #tpu.memory_space<vmem>>, %arg10: memref<128x1152xbf16, #tpu.memory_space<vmem>>) attributes {dimension_semantics = [#tpu.dimension_semantics<arbitrary>], iteration_bounds = array<i64: 1>, scalar_prefetch = 0 : i64, scratch_operands = 2 : i64, tpu.core_type = #tpu.core_type<tc>, window_params = [{pipeline_mode = #tpu.pipeline_mode<synchronous>, transform_indices = @transform_0, window_bounds = array<i64: 2, 8, 8, 128>}, {pipeline_mode = #tpu.pipeline_mode<synchronous>, transform_indices = @transform_1, window_bounds = array<i64: 1152, 128>}, {pipeline_mode = #tpu.pipeline_mode<synchronous>, transform_indices = @transform_2, window_bounds = array<i64: 1, 128>}, {pipeline_mode = #tpu.pipeline_mode<synchronous>, transform_indices = @transform_3, window_bounds = array<i64: 1, 128>}, {pipeline_mode = #tpu.pipeline_mode<synchronous>, transform_indices = @transform_4, window_bounds = array<i64: 1152, 128>}, {pipeline_mode = #tpu.pipeline_mode<synchronous>, transform_indices = @transform_5, window_bounds = array<i64: 1, 128>}, {pipeline_mode = #tpu.pipeline_mode<synchronous>, transform_indices = @transform_6, window_bounds = array<i64: 1, 128>}, {pipeline_mode = #tpu.pipeline_mode<synchronous>, transform_indices = @transform_7, window_bounds = array<i64: 2, 8, 8, 128>}]} {
    %0 = tpu.iota {dimensions = array<i32: 2>} : vector<2x8x8x128xi32>
    %c0_i32 = arith.constant 0 : i32
    %1 = vector.broadcast %c0_i32 : i32 to vector<2x8x8x128xi32>
    %2 = arith.cmpi sgt, %0, %1 : vector<2x8x8x128xi32>
    %c7_i32 = arith.constant 7 : i32
    %3 = vector.broadcast %c7_i32 : i32 to vector<2x8x8x128xi32>
    %4 = arith.cmpi slt, %0, %3 : vector<2x8x8x128xi32>
    %cst = arith.constant 0.000000e+00 : f32
    %5 = vector.broadcast %cst : f32 to vector<2x1x8x128xf32>
    %c0 = arith.constant 0 : index
    %c0_0 = arith.constant 0 : index
    %c0_1 = arith.constant 0 : index
    %c0_2 = arith.constant 0 : index
    %6 = vector.load %arg9[%c0, %c0_0, %c0_1, %c0_2] : memref<2x10x8x128xf32, #tpu.memory_space<vmem>>, vector<2x1x8x128xf32>
    tpu.vector_store %arg9[%c0, %c0_0, %c0_1, %c0_2], %5 {strides = array<i32>} : memref<2x10x8x128xf32, #tpu.memory_space<vmem>>, vector<2x1x8x128xf32>,
    %c0_3 = arith.constant 0 : index
    %c9 = arith.constant 9 : index
    %c0_4 = arith.constant 0 : index
    %c0_5 = arith.constant 0 : index
    %7 = vector.load %arg9[%c0_3, %c9, %c0_4, %c0_5] : memref<2x10x8x128xf32, #tpu.memory_space<vmem>>, vector<2x1x8x128xf32>
    tpu.vector_store %arg9[%c0_3, %c9, %c0_4, %c0_5], %5 {strides = array<i32>} : memref<2x10x8x128xf32, #tpu.memory_space<vmem>>, vector<2x1x8x128xf32>,
    %c0_6 = arith.constant 0 : index
    %c0_7 = arith.constant 0 : index
    %c0_8 = arith.constant 0 : index
    %c0_9 = arith.constant 0 : index
    %8 = vector.load %arg1[%c0_6, %c0_7, %c0_8, %c0_9] : memref<2x8x8x128xf32, #tpu.memory_space<vmem>>, vector<2x8x8x128xf32>
    %c0_10 = arith.constant 0 : index
    %c1 = arith.constant 1 : index
    %c0_11 = arith.constant 0 : index
    %c0_12 = arith.constant 0 : index
    %9 = vector.load %arg9[%c0_10, %c1, %c0_11, %c0_12] : memref<2x10x8x128xf32, #tpu.memory_space<vmem>>, vector<2x8x8x128xf32>
    tpu.vector_store %arg9[%c0_10, %c1, %c0_11, %c0_12], %8 {strides = array<i32>} : memref<2x10x8x128xf32, #tpu.memory_space<vmem>>, vector<2x8x8x128xf32>,
    %c0_13 = arith.constant 0 : index
    %c0_14 = arith.constant 0 : index
    %c0_15 = arith.constant 0 : index
    %c0_16 = arith.constant 0 : index
    %10 = vector.load %arg9[%c0_13, %c0_14, %c0_15, %c0_16] : memref<2x10x8x128xf32, #tpu.memory_space<vmem>>, vector<2x8x8x128xf32>
    %c1_i32 = arith.constant 1 : i32
    %11 = tpu.dynamic_rotate %10 by %c1_i32 dim 2 : vector<2x8x8x128xf32>, i32 -> vector<2x8x8x128xf32>
    %cst_17 = arith.constant 0.000000e+00 : f32
    %12 = vector.broadcast %cst_17 : f32 to vector<2x8x8x128xf32>
    %13 = arith.select %2, %11, %12 : vector<2x8x8x128xi1>, vector<2x8x8x128xf32>
    %14 = vector.shape_cast %13 : vector<2x8x8x128xf32> to vector<128x128xf32>
    %15 = arith.truncf %14 : vector<128x128xf32> to vector<128x128xbf16>
    %c0_18 = arith.constant 0 : index
    %c0_19 = arith.constant 0 : index
    %16 = vector.load %arg10[%c0_18, %c0_19] : memref<128x1152xbf16, #tpu.memory_space<vmem>>, vector<128x128xbf16>
    tpu.vector_store %arg10[%c0_18, %c0_19], %15 {strides = array<i32>} : memref<128x1152xbf16, #tpu.memory_space<vmem>>, vector<128x128xbf16>,
    %17 = vector.shape_cast %10 : vector<2x8x8x128xf32> to vector<128x128xf32>
    %18 = arith.truncf %17 : vector<128x128xf32> to vector<128x128xbf16>
    %c0_20 = arith.constant 0 : index
    %c128 = arith.constant 128 : index
    %19 = vector.load %arg10[%c0_20, %c128] : memref<128x1152xbf16, #tpu.memory_space<vmem>>, vector<128x128xbf16>
    tpu.vector_store %arg10[%c0_20, %c128], %18 {strides = array<i32>} : memref<128x1152xbf16, #tpu.memory_space<vmem>>, vector<128x128xbf16>,
    %c7_i32_21 = arith.constant 7 : i32
    %20 = tpu.dynamic_rotate %10 by %c7_i32_21 dim 2 : vector<2x8x8x128xf32>, i32 -> vector<2x8x8x128xf32>
    %cst_22 = arith.constant 0.000000e+00 : f32
    %21 = vector.broadcast %cst_22 : f32 to vector<2x8x8x128xf32>
    %22 = arith.select %4, %20, %21 : vector<2x8x8x128xi1>, vector<2x8x8x128xf32>
    %23 = vector.shape_cast %22 : vector<2x8x8x128xf32> to vector<128x128xf32>
    %24 = arith.truncf %23 : vector<128x128xf32> to vector<128x128xbf16>
    %c0_23 = arith.constant 0 : index
    %c256 = arith.constant 256 : index
    %25 = vector.load %arg10[%c0_23, %c256] : memref<128x1152xbf16, #tpu.memory_space<vmem>>, vector<128x128xbf16>
    tpu.vector_store %arg10[%c0_23, %c256], %24 {strides = array<i32>} : memref<128x1152xbf16, #tpu.memory_space<vmem>>, vector<128x128xbf16>,
    %c0_24 = arith.constant 0 : index
    %c1_25 = arith.constant 1 : index
    %c0_26 = arith.constant 0 : index
    %c0_27 = arith.constant 0 : index
    %26 = vector.load %arg9[%c0_24, %c1_25, %c0_26, %c0_27] : memref<2x10x8x128xf32, #tpu.memory_space<vmem>>, vector<2x8x8x128xf32>
    %c1_i32_28 = arith.constant 1 : i32
    %27 = tpu.dynamic_rotate %26 by %c1_i32_28 dim 2 : vector<2x8x8x128xf32>, i32 -> vector<2x8x8x128xf32>
    %cst_29 = arith.constant 0.000000e+00 : f32
    %28 = vector.broadcast %cst_29 : f32 to vector<2x8x8x128xf32>
    %29 = arith.select %2, %27, %28 : vector<2x8x8x128xi1>, vector<2x8x8x128xf32>
    %30 = vector.shape_cast %29 : vector<2x8x8x128xf32> to vector<128x128xf32>
    %31 = arith.truncf %30 : vector<128x128xf32> to vector<128x128xbf16>
    %c0_30 = arith.constant 0 : index
    %c384 = arith.constant 384 : index
    %32 = vector.load %arg10[%c0_30, %c384] : memref<128x1152xbf16, #tpu.memory_space<vmem>>, vector<128x128xbf16>
    tpu.vector_store %arg10[%c0_30, %c384], %31 {strides = array<i32>} : memref<128x1152xbf16, #tpu.memory_space<vmem>>, vector<128x128xbf16>,
    %33 = vector.shape_cast %26 : vector<2x8x8x128xf32> to vector<128x128xf32>
    %34 = arith.truncf %33 : vector<128x128xf32> to vector<128x128xbf16>
    %c0_31 = arith.constant 0 : index
    %c512 = arith.constant 512 : index
    %35 = vector.load %arg10[%c0_31, %c512] : memref<128x1152xbf16, #tpu.memory_space<vmem>>, vector<128x128xbf16>
    tpu.vector_store %arg10[%c0_31, %c512], %34 {strides = array<i32>} : memref<128x1152xbf16, #tpu.memory_space<vmem>>, vector<128x128xbf16>,
    %c7_i32_32 = arith.constant 7 : i32
    %36 = tpu.dynamic_rotate %26 by %c7_i32_32 dim 2 : vector<2x8x8x128xf32>, i32 -> vector<2x8x8x128xf32>
    %cst_33 = arith.constant 0.000000e+00 : f32
    %37 = vector.broadcast %cst_33 : f32 to vector<2x8x8x128xf32>
    %38 = arith.select %4, %36, %37 : vector<2x8x8x128xi1>, vector<2x8x8x128xf32>
    %39 = vector.shape_cast %38 : vector<2x8x8x128xf32> to vector<128x128xf32>
    %40 = arith.truncf %39 : vector<128x128xf32> to vector<128x128xbf16>
    %c0_34 = arith.constant 0 : index
    %c640 = arith.constant 640 : index
    %41 = vector.load %arg10[%c0_34, %c640] : memref<128x1152xbf16, #tpu.memory_space<vmem>>, vector<128x128xbf16>
    tpu.vector_store %arg10[%c0_34, %c640], %40 {strides = array<i32>} : memref<128x1152xbf16, #tpu.memory_space<vmem>>, vector<128x128xbf16>,
    %c0_35 = arith.constant 0 : index
    %c2 = arith.constant 2 : index
    %c0_36 = arith.constant 0 : index
    %c0_37 = arith.constant 0 : index
    %42 = vector.load %arg9[%c0_35, %c2, %c0_36, %c0_37] : memref<2x10x8x128xf32, #tpu.memory_space<vmem>>, vector<2x8x8x128xf32>
    %c1_i32_38 = arith.constant 1 : i32
    %43 = tpu.dynamic_rotate %42 by %c1_i32_38 dim 2 : vector<2x8x8x128xf32>, i32 -> vector<2x8x8x128xf32>
    %cst_39 = arith.constant 0.000000e+00 : f32
    %44 = vector.broadcast %cst_39 : f32 to vector<2x8x8x128xf32>
    %45 = arith.select %2, %43, %44 : vector<2x8x8x128xi1>, vector<2x8x8x128xf32>
    %46 = vector.shape_cast %45 : vector<2x8x8x128xf32> to vector<128x128xf32>
    %47 = arith.truncf %46 : vector<128x128xf32> to vector<128x128xbf16>
    %c0_40 = arith.constant 0 : index
    %c768 = arith.constant 768 : index
    %48 = vector.load %arg10[%c0_40, %c768] : memref<128x1152xbf16, #tpu.memory_space<vmem>>, vector<128x128xbf16>
    tpu.vector_store %arg10[%c0_40, %c768], %47 {strides = array<i32>} : memref<128x1152xbf16, #tpu.memory_space<vmem>>, vector<128x128xbf16>,
    %49 = vector.shape_cast %42 : vector<2x8x8x128xf32> to vector<128x128xf32>
    %50 = arith.truncf %49 : vector<128x128xf32> to vector<128x128xbf16>
    %c0_41 = arith.constant 0 : index
    %c896 = arith.constant 896 : index
    %51 = vector.load %arg10[%c0_41, %c896] : memref<128x1152xbf16, #tpu.memory_space<vmem>>, vector<128x128xbf16>
    tpu.vector_store %arg10[%c0_41, %c896], %50 {strides = array<i32>} : memref<128x1152xbf16, #tpu.memory_space<vmem>>, vector<128x128xbf16>,
    %c7_i32_42 = arith.constant 7 : i32
    %52 = tpu.dynamic_rotate %42 by %c7_i32_42 dim 2 : vector<2x8x8x128xf32>, i32 -> vector<2x8x8x128xf32>
    %cst_43 = arith.constant 0.000000e+00 : f32
    %53 = vector.broadcast %cst_43 : f32 to vector<2x8x8x128xf32>
    %54 = arith.select %4, %52, %53 : vector<2x8x8x128xi1>, vector<2x8x8x128xf32>
    %55 = vector.shape_cast %54 : vector<2x8x8x128xf32> to vector<128x128xf32>
    %56 = arith.truncf %55 : vector<128x128xf32> to vector<128x128xbf16>
    %c0_44 = arith.constant 0 : index
    %c1024 = arith.constant 1024 : index
    %57 = vector.load %arg10[%c0_44, %c1024] : memref<128x1152xbf16, #tpu.memory_space<vmem>>, vector<128x128xbf16>
    tpu.vector_store %arg10[%c0_44, %c1024], %56 {strides = array<i32>} : memref<128x1152xbf16, #tpu.memory_space<vmem>>, vector<128x128xbf16>,
    %c0_45 = arith.constant 0 : index
    %c0_46 = arith.constant 0 : index
    %58 = vector.load %arg3[%c0_45, %c0_46] : memref<1x128xf32, #tpu.memory_space<vmem>>, vector<1x128xf32>
    %c0_47 = arith.constant 0 : index
    %c0_48 = arith.constant 0 : index
    %59 = vector.load %arg4[%c0_47, %c0_48] : memref<1x128xf32, #tpu.memory_space<vmem>>, vector<1x128xf32>
    %c0_49 = arith.constant 0 : index
    %c0_50 = arith.constant 0 : index
    %60 = vector.load %arg10[%c0_49, %c0_50] : memref<128x1152xbf16, #tpu.memory_space<vmem>>, vector<128x1152xbf16>
    %c0_51 = arith.constant 0 : index
    %c0_52 = arith.constant 0 : index
    %61 = vector.load %arg2[%c0_51, %c0_52] : memref<1152x128xbf16, #tpu.memory_space<vmem>>, vector<1152x128xbf16>
    %cst_53 = arith.constant dense<0.000000e+00> : vector<128x128xf32>
    %62 = tpu.matmul %60, %61, %cst_53 {dimension_numbers = #tpu.dot_dimension_numbers<[1], [0], [0], [1], [0, 0, 1, 1], [], []>} : vector<128x1152xbf16>, vector<1152x128xbf16>, vector<128x128xf32> -> vector<128x128xf32>
    %cst_54 = arith.constant dense<0.000000e+00> : vector<128xf32>
    %63 = vector.multi_reduction <add>, %62, %cst_54 [0] : vector<128x128xf32> to vector<128xf32>
    %64 = vector.shape_cast %63 : vector<128xf32> to vector<1x128xf32>
    %65 = arith.mulf %62, %62 : vector<128x128xf32>
    %cst_55 = arith.constant dense<0.000000e+00> : vector<128xf32>
    %66 = vector.multi_reduction <add>, %65, %cst_55 [0] : vector<128x128xf32> to vector<128xf32>
    %67 = vector.shape_cast %66 : vector<128xf32> to vector<1x128xf32>
    %cst_56 = arith.constant 7.812500e-03 : f32
    %68 = vector.broadcast %cst_56 : f32 to vector<1x128xf32>
    %69 = arith.mulf %64, %68 : vector<1x128xf32>
    %cst_57 = arith.constant 7.812500e-03 : f32
    %70 = vector.broadcast %cst_57 : f32 to vector<1x128xf32>
    %71 = arith.mulf %67, %70 : vector<1x128xf32>
    %72 = arith.mulf %69, %69 : vector<1x128xf32>
    %73 = arith.subf %71, %72 : vector<1x128xf32>
    %cst_58 = arith.constant 9.99999974E-6 : f32
    %74 = vector.broadcast %cst_58 : f32 to vector<1x128xf32>
    %75 = arith.addf %73, %74 : vector<1x128xf32>
    %76 = math.rsqrt %75 : vector<1x128xf32>
    %77 = arith.mulf %58, %76 : vector<1x128xf32>
    %78 = arith.mulf %69, %77 : vector<1x128xf32>
    %79 = arith.subf %59, %78 : vector<1x128xf32>
    %80 = vector.broadcast %77 : vector<1x128xf32> to vector<128x128xf32>
    %81 = arith.mulf %62, %80 : vector<128x128xf32>
    %82 = vector.broadcast %79 : vector<1x128xf32> to vector<128x128xf32>
    %83 = arith.addf %81, %82 : vector<128x128xf32>
    %cst_59 = arith.constant 0.000000e+00 : f32
    %84 = vector.broadcast %cst_59 : f32 to vector<128x128xf32>
    %85 = arith.maximumf %83, %84 : vector<128x128xf32>
    %86 = vector.shape_cast %85 : vector<128x128xf32> to vector<2x8x8x128xf32>
    %c0_60 = arith.constant 0 : index
    %c1_61 = arith.constant 1 : index
    %c0_62 = arith.constant 0 : index
    %c0_63 = arith.constant 0 : index
    %87 = vector.load %arg9[%c0_60, %c1_61, %c0_62, %c0_63] : memref<2x10x8x128xf32, #tpu.memory_space<vmem>>, vector<2x8x8x128xf32>
    tpu.vector_store %arg9[%c0_60, %c1_61, %c0_62, %c0_63], %86 {strides = array<i32>} : memref<2x10x8x128xf32, #tpu.memory_space<vmem>>, vector<2x8x8x128xf32>,
    %c0_64 = arith.constant 0 : index
    %c0_65 = arith.constant 0 : index
    %c0_66 = arith.constant 0 : index
    %c0_67 = arith.constant 0 : index
    %88 = vector.load %arg9[%c0_64, %c0_65, %c0_66, %c0_67] : memref<2x10x8x128xf32, #tpu.memory_space<vmem>>, vector<2x8x8x128xf32>
    %c1_i32_68 = arith.constant 1 : i32
    %89 = tpu.dynamic_rotate %88 by %c1_i32_68 dim 2 : vector<2x8x8x128xf32>, i32 -> vector<2x8x8x128xf32>
    %cst_69 = arith.constant 0.000000e+00 : f32
    %90 = vector.broadcast %cst_69 : f32 to vector<2x8x8x128xf32>
    %91 = arith.select %2, %89, %90 : vector<2x8x8x128xi1>, vector<2x8x8x128xf32>
    %92 = vector.shape_cast %91 : vector<2x8x8x128xf32> to vector<128x128xf32>
    %93 = arith.truncf %92 : vector<128x128xf32> to vector<128x128xbf16>
    %c0_70 = arith.constant 0 : index
    %c0_71 = arith.constant 0 : index
    %94 = vector.load %arg10[%c0_70, %c0_71] : memref<128x1152xbf16, #tpu.memory_space<vmem>>, vector<128x128xbf16>
    tpu.vector_store %arg10[%c0_70, %c0_71], %93 {strides = array<i32>} : memref<128x1152xbf16, #tpu.memory_space<vmem>>, vector<128x128xbf16>,
    %95 = vector.shape_cast %88 : vector<2x8x8x128xf32> to vector<128x128xf32>
    %96 = arith.truncf %95 : vector<128x128xf32> to vector<128x128xbf16>
    %c0_72 = arith.constant 0 : index
    %c128_73 = arith.constant 128 : index
    %97 = vector.load %arg10[%c0_72, %c128_73] : memref<128x1152xbf16, #tpu.memory_space<vmem>>, vector<128x128xbf16>
    tpu.vector_store %arg10[%c0_72, %c128_73], %96 {strides = array<i32>} : memref<128x1152xbf16, #tpu.memory_space<vmem>>, vector<128x128xbf16>,
    %c7_i32_74 = arith.constant 7 : i32
    %98 = tpu.dynamic_rotate %88 by %c7_i32_74 dim 2 : vector<2x8x8x128xf32>, i32 -> vector<2x8x8x128xf32>
    %cst_75 = arith.constant 0.000000e+00 : f32
    %99 = vector.broadcast %cst_75 : f32 to vector<2x8x8x128xf32>
    %100 = arith.select %4, %98, %99 : vector<2x8x8x128xi1>, vector<2x8x8x128xf32>
    %101 = vector.shape_cast %100 : vector<2x8x8x128xf32> to vector<128x128xf32>
    %102 = arith.truncf %101 : vector<128x128xf32> to vector<128x128xbf16>
    %c0_76 = arith.constant 0 : index
    %c256_77 = arith.constant 256 : index
    %103 = vector.load %arg10[%c0_76, %c256_77] : memref<128x1152xbf16, #tpu.memory_space<vmem>>, vector<128x128xbf16>
    tpu.vector_store %arg10[%c0_76, %c256_77], %102 {strides = array<i32>} : memref<128x1152xbf16, #tpu.memory_space<vmem>>, vector<128x128xbf16>,
    %c0_78 = arith.constant 0 : index
    %c1_79 = arith.constant 1 : index
    %c0_80 = arith.constant 0 : index
    %c0_81 = arith.constant 0 : index
    %104 = vector.load %arg9[%c0_78, %c1_79, %c0_80, %c0_81] : memref<2x10x8x128xf32, #tpu.memory_space<vmem>>, vector<2x8x8x128xf32>
    %c1_i32_82 = arith.constant 1 : i32
    %105 = tpu.dynamic_rotate %104 by %c1_i32_82 dim 2 : vector<2x8x8x128xf32>, i32 -> vector<2x8x8x128xf32>
    %cst_83 = arith.constant 0.000000e+00 : f32
    %106 = vector.broadcast %cst_83 : f32 to vector<2x8x8x128xf32>
    %107 = arith.select %2, %105, %106 : vector<2x8x8x128xi1>, vector<2x8x8x128xf32>
    %108 = vector.shape_cast %107 : vector<2x8x8x128xf32> to vector<128x128xf32>
    %109 = arith.truncf %108 : vector<128x128xf32> to vector<128x128xbf16>
    %c0_84 = arith.constant 0 : index
    %c384_85 = arith.constant 384 : index
    %110 = vector.load %arg10[%c0_84, %c384_85] : memref<128x1152xbf16, #tpu.memory_space<vmem>>, vector<128x128xbf16>
    tpu.vector_store %arg10[%c0_84, %c384_85], %109 {strides = array<i32>} : memref<128x1152xbf16, #tpu.memory_space<vmem>>, vector<128x128xbf16>,
    %111 = vector.shape_cast %104 : vector<2x8x8x128xf32> to vector<128x128xf32>
    %112 = arith.truncf %111 : vector<128x128xf32> to vector<128x128xbf16>
    %c0_86 = arith.constant 0 : index
    %c512_87 = arith.constant 512 : index
    %113 = vector.load %arg10[%c0_86, %c512_87] : memref<128x1152xbf16, #tpu.memory_space<vmem>>, vector<128x128xbf16>
    tpu.vector_store %arg10[%c0_86, %c512_87], %112 {strides = array<i32>} : memref<128x1152xbf16, #tpu.memory_space<vmem>>, vector<128x128xbf16>,
    %c7_i32_88 = arith.constant 7 : i32
    %114 = tpu.dynamic_rotate %104 by %c7_i32_88 dim 2 : vector<2x8x8x128xf32>, i32 -> vector<2x8x8x128xf32>
    %cst_89 = arith.constant 0.000000e+00 : f32
    %115 = vector.broadcast %cst_89 : f32 to vector<2x8x8x128xf32>
    %116 = arith.select %4, %114, %115 : vector<2x8x8x128xi1>, vector<2x8x8x128xf32>
    %117 = vector.shape_cast %116 : vector<2x8x8x128xf32> to vector<128x128xf32>
    %118 = arith.truncf %117 : vector<128x128xf32> to vector<128x128xbf16>
    %c0_90 = arith.constant 0 : index
    %c640_91 = arith.constant 640 : index
    %119 = vector.load %arg10[%c0_90, %c640_91] : memref<128x1152xbf16, #tpu.memory_space<vmem>>, vector<128x128xbf16>
    tpu.vector_store %arg10[%c0_90, %c640_91], %118 {strides = array<i32>} : memref<128x1152xbf16, #tpu.memory_space<vmem>>, vector<128x128xbf16>,
    %c0_92 = arith.constant 0 : index
    %c2_93 = arith.constant 2 : index
    %c0_94 = arith.constant 0 : index
    %c0_95 = arith.constant 0 : index
    %120 = vector.load %arg9[%c0_92, %c2_93, %c0_94, %c0_95] : memref<2x10x8x128xf32, #tpu.memory_space<vmem>>, vector<2x8x8x128xf32>
    %c1_i32_96 = arith.constant 1 : i32
    %121 = tpu.dynamic_rotate %120 by %c1_i32_96 dim 2 : vector<2x8x8x128xf32>, i32 -> vector<2x8x8x128xf32>
    %cst_97 = arith.constant 0.000000e+00 : f32
    %122 = vector.broadcast %cst_97 : f32 to vector<2x8x8x128xf32>
    %123 = arith.select %2, %121, %122 : vector<2x8x8x128xi1>, vector<2x8x8x128xf32>
    %124 = vector.shape_cast %123 : vector<2x8x8x128xf32> to vector<128x128xf32>
    %125 = arith.truncf %124 : vector<128x128xf32> to vector<128x128xbf16>
    %c0_98 = arith.constant 0 : index
    %c768_99 = arith.constant 768 : index
    %126 = vector.load %arg10[%c0_98, %c768_99] : memref<128x1152xbf16, #tpu.memory_space<vmem>>, vector<128x128xbf16>
    tpu.vector_store %arg10[%c0_98, %c768_99], %125 {strides = array<i32>} : memref<128x1152xbf16, #tpu.memory_space<vmem>>, vector<128x128xbf16>,
    %127 = vector.shape_cast %120 : vector<2x8x8x128xf32> to vector<128x128xf32>
    %128 = arith.truncf %127 : vector<128x128xf32> to vector<128x128xbf16>
    %c0_100 = arith.constant 0 : index
    %c896_101 = arith.constant 896 : index
    %129 = vector.load %arg10[%c0_100, %c896_101] : memref<128x1152xbf16, #tpu.memory_space<vmem>>, vector<128x128xbf16>
    tpu.vector_store %arg10[%c0_100, %c896_101], %128 {strides = array<i32>} : memref<128x1152xbf16, #tpu.memory_space<vmem>>, vector<128x128xbf16>,
    %c7_i32_102 = arith.constant 7 : i32
    %130 = tpu.dynamic_rotate %120 by %c7_i32_102 dim 2 : vector<2x8x8x128xf32>, i32 -> vector<2x8x8x128xf32>
    %cst_103 = arith.constant 0.000000e+00 : f32
    %131 = vector.broadcast %cst_103 : f32 to vector<2x8x8x128xf32>
    %132 = arith.select %4, %130, %131 : vector<2x8x8x128xi1>, vector<2x8x8x128xf32>
    %133 = vector.shape_cast %132 : vector<2x8x8x128xf32> to vector<128x128xf32>
    %134 = arith.truncf %133 : vector<128x128xf32> to vector<128x128xbf16>
    %c0_104 = arith.constant 0 : index
    %c1024_105 = arith.constant 1024 : index
    %135 = vector.load %arg10[%c0_104, %c1024_105] : memref<128x1152xbf16, #tpu.memory_space<vmem>>, vector<128x128xbf16>
    tpu.vector_store %arg10[%c0_104, %c1024_105], %134 {strides = array<i32>} : memref<128x1152xbf16, #tpu.memory_space<vmem>>, vector<128x128xbf16>,
    %c0_106 = arith.constant 0 : index
    %c0_107 = arith.constant 0 : index
    %136 = vector.load %arg6[%c0_106, %c0_107] : memref<1x128xf32, #tpu.memory_space<vmem>>, vector<1x128xf32>
    %c0_108 = arith.constant 0 : index
    %c0_109 = arith.constant 0 : index
    %137 = vector.load %arg7[%c0_108, %c0_109] : memref<1x128xf32, #tpu.memory_space<vmem>>, vector<1x128xf32>
    %c0_110 = arith.constant 0 : index
    %c0_111 = arith.constant 0 : index
    %138 = vector.load %arg10[%c0_110, %c0_111] : memref<128x1152xbf16, #tpu.memory_space<vmem>>, vector<128x1152xbf16>
    %c0_112 = arith.constant 0 : index
    %c0_113 = arith.constant 0 : index
    %139 = vector.load %arg5[%c0_112, %c0_113] : memref<1152x128xbf16, #tpu.memory_space<vmem>>, vector<1152x128xbf16>
    %cst_114 = arith.constant dense<0.000000e+00> : vector<128x128xf32>
    %140 = tpu.matmul %138, %139, %cst_114 {dimension_numbers = #tpu.dot_dimension_numbers<[1], [0], [0], [1], [0, 0, 1, 1], [], []>} : vector<128x1152xbf16>, vector<1152x128xbf16>, vector<128x128xf32> -> vector<128x128xf32>
    %cst_115 = arith.constant dense<0.000000e+00> : vector<128xf32>
    %141 = vector.multi_reduction <add>, %140, %cst_115 [0] : vector<128x128xf32> to vector<128xf32>
    %142 = vector.shape_cast %141 : vector<128xf32> to vector<1x128xf32>
    %143 = arith.mulf %140, %140 : vector<128x128xf32>
    %cst_116 = arith.constant dense<0.000000e+00> : vector<128xf32>
    %144 = vector.multi_reduction <add>, %143, %cst_116 [0] : vector<128x128xf32> to vector<128xf32>
    %145 = vector.shape_cast %144 : vector<128xf32> to vector<1x128xf32>
    %cst_117 = arith.constant 7.812500e-03 : f32
    %146 = vector.broadcast %cst_117 : f32 to vector<1x128xf32>
    %147 = arith.mulf %142, %146 : vector<1x128xf32>
    %cst_118 = arith.constant 7.812500e-03 : f32
    %148 = vector.broadcast %cst_118 : f32 to vector<1x128xf32>
    %149 = arith.mulf %145, %148 : vector<1x128xf32>
    %150 = arith.mulf %147, %147 : vector<1x128xf32>
    %151 = arith.subf %149, %150 : vector<1x128xf32>
    %cst_119 = arith.constant 9.99999974E-6 : f32
    %152 = vector.broadcast %cst_119 : f32 to vector<1x128xf32>
    %153 = arith.addf %151, %152 : vector<1x128xf32>
    %154 = math.rsqrt %153 : vector<1x128xf32>
    %155 = arith.mulf %136, %154 : vector<1x128xf32>
    %156 = arith.mulf %147, %155 : vector<1x128xf32>
    %157 = arith.subf %137, %156 : vector<1x128xf32>
    %158 = vector.broadcast %155 : vector<1x128xf32> to vector<128x128xf32>
    %159 = arith.mulf %140, %158 : vector<128x128xf32>
    %160 = vector.broadcast %157 : vector<1x128xf32> to vector<128x128xf32>
    %161 = arith.addf %159, %160 : vector<128x128xf32>
    %c0_120 = arith.constant 0 : index
    %c0_121 = arith.constant 0 : index
    %c0_122 = arith.constant 0 : index
    %c0_123 = arith.constant 0 : index
    %162 = vector.load %arg1[%c0_120, %c0_121, %c0_122, %c0_123] : memref<2x8x8x128xf32, #tpu.memory_space<vmem>>, vector<2x8x8x128xf32>
    %163 = vector.shape_cast %162 : vector<2x8x8x128xf32> to vector<128x128xf32>
    %164 = arith.addf %163, %161 : vector<128x128xf32>
    %cst_124 = arith.constant 0.000000e+00 : f32
    %165 = vector.broadcast %cst_124 : f32 to vector<128x128xf32>
    %166 = arith.maximumf %164, %165 : vector<128x128xf32>
    %167 = vector.shape_cast %166 : vector<128x128xf32> to vector<2x8x8x128xf32>
    %c0_125 = arith.constant 0 : index
    %c0_126 = arith.constant 0 : index
    %c0_127 = arith.constant 0 : index
    %c0_128 = arith.constant 0 : index
    %168 = vector.load %arg8[%c0_125, %c0_126, %c0_127, %c0_128] : memref<2x8x8x128xf32, #tpu.memory_space<vmem>>, vector<2x8x8x128xf32>
    tpu.vector_store %arg8[%c0_125, %c0_126, %c0_127, %c0_128], %167 {strides = array<i32>} : memref<2x8x8x128xf32, #tpu.memory_space<vmem>>, vector<2x8x8x128xf32>,
    return
  }
  func.func @transform_0(%arg0: i32) -> (i32, i32, i32, i32) {
    %c0_i32 = arith.constant 0 : i32
    %c0_i32_0 = arith.constant 0 : i32
    %c0_i32_1 = arith.constant 0 : i32
    %c0_i32_2 = arith.constant 0 : i32
    %c0_i32_3 = arith.constant 0 : i32
    return %c0_i32, %c0_i32_0, %c0_i32_1, %c0_i32_2 : i32, i32, i32, i32
  }
  func.func @transform_1(%arg0: i32) -> (i32, i32) {
    %c0_i32 = arith.constant 0 : i32
    %c0_i32_0 = arith.constant 0 : i32
    %c0_i32_1 = arith.constant 0 : i32
    return %c0_i32, %c0_i32_0 : i32, i32
  }
  func.func @transform_2(%arg0: i32) -> (i32, i32) {
    %c0_i32 = arith.constant 0 : i32
    %c0_i32_0 = arith.constant 0 : i32
    %c0_i32_1 = arith.constant 0 : i32
    return %c0_i32, %c0_i32_0 : i32, i32
  }
  func.func @transform_3(%arg0: i32) -> (i32, i32) {
    %c0_i32 = arith.constant 0 : i32
    %c0_i32_0 = arith.constant 0 : i32
    %c0_i32_1 = arith.constant 0 : i32
    return %c0_i32, %c0_i32_0 : i32, i32
  }
  func.func @transform_4(%arg0: i32) -> (i32, i32) {
    %c0_i32 = arith.constant 0 : i32
    %c0_i32_0 = arith.constant 0 : i32
    %c0_i32_1 = arith.constant 0 : i32
    return %c0_i32, %c0_i32_0 : i32, i32
  }
  func.func @transform_5(%arg0: i32) -> (i32, i32) {
    %c0_i32 = arith.constant 0 : i32
    %c0_i32_0 = arith.constant 0 : i32
    %c0_i32_1 = arith.constant 0 : i32
    return %c0_i32, %c0_i32_0 : i32, i32
  }
  func.func @transform_6(%arg0: i32) -> (i32, i32) {
    %c0_i32 = arith.constant 0 : i32
    %c0_i32_0 = arith.constant 0 : i32
    %c0_i32_1 = arith.constant 0 : i32
    return %c0_i32, %c0_i32_0 : i32, i32
  }
  func.func @transform_7(%arg0: i32) -> (i32, i32, i32, i32) {
    %c0_i32 = arith.constant 0 : i32
    %c0_i32_0 = arith.constant 0 : i32
    %c0_i32_1 = arith.constant 0 : i32
    %c0_i32_2 = arith.constant 0 : i32
    %c0_i32_3 = arith.constant 0 : i32
    return %c0_i32, %c0_i32_0, %c0_i32_1, %c0_i32_2 : i32, i32, i32, i32
  }
}

</mosaic_0001>

<bundles_post_ra>
// kernel: resblock_forward.1
= control target key start
LH: loop header
LB: loop body
LE: loop exit
PB: predicated region body
PF: predicated region fallthrough
CT: control target
= control target key end

     0   :  { %12 = vsyncpa [#allocation5], 0  ;;  %s8263_s0 = inlined_call_operand.hbm [shape: f32[2,8,8,128], index: 0, kind: input, shape index: {}]   ;;  %s8264_s1 = inlined_call_operand.hbm [shape: bf16[1152,128], index: 1, kind: input, shape index: {}]   ;;  %s8265_s2 = inlined_call_operand.vmem [shape: f32[1,128], index: 2, kind: input, shape index: {}]   ;;  %s8266_s3 = inlined_call_operand.vmem [shape: f32[1,128], index: 3, kind: input, shape index: {}]   ;;  %s8267_s4 = inlined_call_operand.hbm [shape: bf16[1152,128], index: 4, kind: input, shape index: {}]   ;;  %s8268_s5 = inlined_call_operand.vmem [shape: f32[1,128], index: 5, kind: input, shape index: {}]   ;;  %s8269_s6 = inlined_call_operand.vmem [shape: f32[1,128], index: 6, kind: input, shape index: {}]   ;;  %s8270_s7 = inlined_call_operand.hbm [shape: f32[2,8,8,128], index: 7, kind: output, shape index: {}]  }
   0x1   :  { %13 = vsyncpa [#allocation8], 0 }
   0x2   :  { %14 = vsyncpa [#allocation6], 0  ;;  %s7295_s24 = smov [#allocation7]  }
   0x3   :  { %s32_s25 = sshll.u32 %s7295_s24, 4  ;;  %s33_s25 = int_to_ptr.vmem [resolvable:$true] %s32_s25 }
   0x4   :  { %s7217_s26 = scalar_lea.vmem %s33_s25, 9216  ;;  %p7222_p1 = scmp.lt.s32.totalorder %s33_s25, %s33_s25 }
   0x5   :  { %p7218_p0 = scmp.ne.s32.totalorder %s33_s25, %s7217_s26  ;;  %p7223_p2 = scmp.lt.s32.totalorder %s7217_s26, %s7217_s26 }
   0x7   :  { %p7224_p3 = por %p7223_p2, %p7222_p1 }
   0x9   :  { %p7225_p4 = pnand %p7224_p3, %p7218_p0 }
   0xb   :  { %7228 = shalt.err (!%p7225_p4)
}
   0xc   :  { %s7296_s27 = smov 64   ;;  %s7297_s28 = smov 4  }
   0xd   :  { %38 = dma.hbm_to_vmem [thread:$0]  %s8264_s1, 9216, %s33_s25, [#allocation8], %s7296_s27, %s7296_s27, %s7297_s28  }
   0xe   :  { %s7298_s8 = smov [#allocation4]  }
   0xf   :  { %s20_s9 = sshll.u32 %s7298_s8, 4  ;;  %s21_s9 = int_to_ptr.vmem [resolvable:$true] %s20_s9 }
  0x10   :  { %s7237_s10 = scalar_lea.vmem %s21_s9, 2048  ;;  %p7242_p6 = scmp.lt.s32.totalorder %s21_s9, %s21_s9 }
  0x11   :  { %p7238_p5 = scmp.ne.s32.totalorder %s21_s9, %s7237_s10  ;;  %p7243_p7 = scmp.lt.s32.totalorder %s7237_s10, %s7237_s10 }
  0x13   :  { %p7244_p8 = por %p7243_p7, %p7242_p6 }
  0x15   :  { %p7245_p9 = pnand %p7244_p8, %p7238_p5 }
  0x17   :  { %7248 = shalt.err (!%p7245_p9)
}
  0x18   :  { %s7299_s11 = smov 128   ;;  %s7300_s12 = smov 8  }
  0x19   :  { %26 = dma.hbm_to_vmem [thread:$0]  %s8263_s0, 2048, %s21_s9, [#allocation5], %s7299_s11, %s7299_s11, %s7300_s12  }
  0x1a   :  { %s7301_s1 = smov [#allocation9]  }
  0x1b   :  { %s48_s15 = sshll.u32 %s7301_s1, 4  ;;  %s49_s15 = int_to_ptr.vmem [resolvable:$true] %s48_s15 }
  0x1c   :  { %s7257_s16 = scalar_lea.vmem %s49_s15, 9216  ;;  %p7262_p11 = scmp.lt.s32.totalorder %s49_s15, %s49_s15 }
  0x1d   :  { %p7258_p10 = scmp.ne.s32.totalorder %s49_s15, %s7257_s16  ;;  %p7263_p12 = scmp.lt.s32.totalorder %s7257_s16, %s7257_s16 }
  0x1f   :  { %p7264_p13 = por %p7263_p12, %p7262_p11 }
  0x21   :  { %p7265_p0 = pnand %p7264_p13, %p7258_p10 }
  0x23   :  { %7268 = shalt.err (!%p7265_p0)
}
  0x24   :  { %54 = dma.hbm_to_vmem [thread:$0]  %s8267_s4, 9216, %s49_s15, [#allocation8], %s7296_s27, %s7296_s27, %s7297_s28  }
  0x25   :  { %7289 = dma.done.wait [#allocation5], 2048  }
  0x26   :  { %7290 = vsyncadd [#allocation5], 4294965248 }
  0x27   :  { %7291 = dma.done.wait [#allocation8], 18432  }
  0x28   :  { %7292 = vsyncadd [#allocation8], 4294948864  ;;  %v69_v0 = vlaneseq  ;;  %v7302_v1 = vmov 0.0   ;;  %v7303_v3 = vmov 0.0|0.0   ;;  %v6872_v10 = vld [vmem:[#allocation7 + $0x78] sm:$0xff]   ;;  %v6876_v14 = vld [vmem:[#allocation7 + $0x70] sm:$0xff]  }
  0x29   :  { %v127_v2 = vrot.slane %v7302_v1, 7  ;;  %303 = vst [vmem:[#allocation3 + $0x4] sm:$0xf] %v7303_v3  ;;  %311 = vst [vmem:[#allocation3 + $0x124] sm:$0xf] %v7303_v3  ;;  %v319_v4 = vrot.slane %v7302_v1, 1  ;;  %6254 = vmatprep.subr.bf16.mxu0 %v6872_v10 }
  0x2a   :  { %951 = vst [vmem:[#allocation3 + $0x118] sm:$0xf] %v7303_v3  ;;  %959 = vst [vmem:[#allocation3 + $0x238] sm:$0xf] %v7303_v3  ;;  %v7361_v5 = vshrl.u32 %v69_v0, 7  ;;  %v6873_v11 = vld [vmem:[#allocation7 + $0xf8] sm:$0xff]  }
  0x2b   :  { %v6874_v12 = vld [vmem:[#allocation7 + $0x38] sm:$0xff]   ;;  %6318 = vmatprep.subr.bf16.mxu1 %v6873_v11  ;;  %v6877_v15 = vld [vmem:[#allocation7 + $0xf0] sm:$0xff]   ;;  %v6880_v18 = vld [vmem:[#allocation7 + $0x68] sm:$0xff]  }
  0x2c   :  { %8275 = vst [vmem:[#allocation14_spill] sm:$0xff] %v7361_v5  ;;  %vm71_vm0 = vcmp.gt.s32.totalorder %v7361_v5, 0  ;;  %vm72_vm1 = vcmp.lt.s32.totalorder %v7361_v5, 7  ;;  %v6875_v13 = vld [vmem:[#allocation7 + $0xb8] sm:$0xff]   ;;  %6255 = vmatpush3.bf16.msra.mxu0 %v6874_v12  ;;  %v6878_v16 = vld [vmem:[#allocation7 + $0x30] sm:$0xff]   ;;  %v6881_v19 = vld [vmem:[#allocation7 + $0xe8] sm:$0xff]  }
  0x2d   :  { %v143_v6 = vsel %vm71_vm0, %v127_v2, 0.0  ;;  %v335_v7 = vsel %vm72_vm1, %v319_v4, 0.0  ;;  %6319 = vmatpush3.bf16.msra.mxu1 %v6875_v13  ;;  %6256 = vmatprep.subr.bf16.mxu0 %v6876_v14  ;;  %v6879_v17 = vld [vmem:[#allocation7 + $0xb0] sm:$0xff]   ;;  %v6882_v20 = vld [vmem:[#allocation7 + $0x28] sm:$0xff]   ;;  %v6884_v22 = vld [vmem:[#allocation7 + $0x60] sm:$0xff]  }
  0x2e   :  { %v7369_v8 = vpack.c.bf16 %v143_v6, %v143_v6  ;;  %v7371_v9 = vpack.c.bf16 %v335_v7, %v335_v7  ;;  %6320 = vmatprep.subr.bf16.mxu1 %v6877_v15  ;;  %v6883_v21 = vld [vmem:[#allocation7 + $0xa8] sm:$0xff]   ;;  %v6885_v23 = vld [vmem:[#allocation7 + $0xe0] sm:$0xff]   ;;  %v6888_v26 = vld [vmem:[#allocation7 + $0x58] sm:$0xff]  }
  0x2f   :  { %v6886_v24 = vld [vmem:[#allocation7 + $0x20] sm:$0xff]   ;;  %v6889_v27 = vld [vmem:[#allocation7 + $0xd8] sm:$0xff]   ;;  %v6892_v30 = vld [vmem:[#allocation7 + $0x50] sm:$0xff]  }
  0x30   :  { %223 = vst [vmem:[#allocation3] sm:$0xf] %v7369_v8  ;;  %231 = vst [vmem:[#allocation3 + $0x120] sm:$0xf] %v7369_v8  ;;  %6257 = vmatpush3.bf16.msra.mxu0 %v6878_v16  ;;  %v6887_v25 = vld [vmem:[#allocation7 + $0xa0] sm:$0xff]   ;;  %v6890_v28 = vld [vmem:[#allocation7 + $0x18] sm:$0xff]  }
  0x31   :  { %871 = vst [vmem:[#allocation3 + $0x114] sm:$0xf] %v7369_v8  ;;  %879 = vst [vmem:[#allocation3 + $0x234] sm:$0xf] %v7369_v8  ;;  %6321 = vmatpush3.bf16.msra.mxu1 %v6879_v17  ;;  %6258 = vmatprep.subr.bf16.mxu0 %v6880_v18  ;;  %v6891_v29 = vld [vmem:[#allocation7 + $0x98] sm:$0xff]   ;;  %v6893_v31 = vld [vmem:[#allocation7 + $0xd0] sm:$0xff]  }
  0x32   :  { %415 = vst [vmem:[#allocation3 + $0x8] sm:$0xf] %v7371_v9  ;;  %423 = vst [vmem:[#allocation3 + $0x128] sm:$0xf] %v7371_v9  ;;  %6322 = vmatprep.subr.bf16.mxu1 %v6881_v19  ;;  %v6894_v32 = vld [vmem:[#allocation7 + $0x10] sm:$0xff]   ;;  %v6896_v34 = vld [vmem:[#allocation7 + $0x48] sm:$0xff]  }
  0x33   :  { %1063 = vst [vmem:[#allocation3 + $0x11c] sm:$0xf] %v7371_v9  ;;  %1071 = vst [vmem:[#allocation3 + $0x23c] sm:$0xf] %v7371_v9  ;;  %v6895_v33 = vld [vmem:[#allocation7 + $0x90] sm:$0xff]   ;;  %v6897_v35 = vld [vmem:[#allocation7 + $0xc8] sm:$0xff]  }
  0x34   :  { %6259 = vmatpush3.bf16.msra.mxu0 %v6882_v20  ;;  %v6898_v36 = vld [vmem:[#allocation7 + $0x8] sm:$0xff]   ;;  %v6900_v38 = vld [vmem:[#allocation7 + $0x40] sm:$0xff]   ;;  %v6908_v48 = vld [vmem:[#allocation7 + $0x178] sm:$0xff]   ;;  %2846 = vst [vmem:[#allocation3 + $0x120] sm:$0xf] %v7369_v8 }
  0x35   :  { %6323 = vmatpush3.bf16.msra.mxu1 %v6883_v21  ;;  %6260 = vmatprep.subr.bf16.mxu0 %v6884_v22  ;;  %v6899_v37 = vld [vmem:[#allocation7 + $0x88] sm:$0xff]   ;;  %v6901_v39 = vld [vmem:[#allocation7 + $0xc0] sm:$0xff]   ;;  %v80_v53 = vld [vmem:[#allocation4 + $0x10] sm:$0xff]  ;;  %3038 = vst [vmem:[#allocation3 + $0x128] sm:$0xf] %v7371_v9 }
  0x36   :  { %6324 = vmatprep.subr.bf16.mxu1 %v6885_v23  ;;  %v6902_v40 = vld [vmem:[#allocation7] sm:$0xff]   ;;  %v79_v43 = vld [vmem:[#allocation4 + $0x8] sm:$0xff]  ;;  %v81_v54 = vld [vmem:[#allocation4 + $0x18] sm:$0xff]  ;;  %v130_v58 = vrot.slane %v80_v53, 7  ;;  %v5985_v59 = vpack.c.bf16 %v80_v53, %v80_v53  ;;  %v322_v62 = vrot.slane %v80_v53, 1 }
  0x37   :  { %v6903_v41 = vld [vmem:[#allocation7 + $0x80] sm:$0xff]   ;;  %v129_v46 = vrot.slane %v79_v43, 7  ;;  %v5984_v49 = vpack.c.bf16 %v79_v43, %v79_v43  ;;  %v131_v60 = vrot.slane %v81_v54, 7  ;;  %v321_v61 = vrot.slane %v79_v43, 1  ;;  %v7389_v2 = vld [vmem:[#allocation4 + $0x28] sm:$0xff]  ;;  %v7400_v20 = vld [vmem:[#allocation4 + $0x30] sm:$0xff] }
  0x38   :  { %6261 = vmatpush3.bf16.msra.mxu0 %v6886_v24  ;;  %v78_v42 = vld [vmem:[#allocation4] sm:$0xff]  ;;  %v146_v63 = vsel %vm71_vm0, %v130_v58, 0.0  ;;  %v5986_v1 = vpack.c.bf16 %v81_v54, %v81_v54  ;;  %v323_v4 = vrot.slane %v81_v54, 1  ;;  %306 = vst [vmem:[#allocation3 + $0x70] sm:$0xf] %v5985_v59  ;;  %v338_v11 = vsel %vm72_vm1, %v322_v62, 0.0 }
  0x39   :  { %6325 = vmatpush3.bf16.msra.mxu1 %v6887_v25  ;;  %6262 = vmatprep.subr.bf16.mxu0 %v6888_v26  ;;  %v128_v44 = vrot.slane %v78_v42, 7  ;;  %v5983_v45 = vpack.c.bf16 %v78_v42, %v78_v42  ;;  %v320_v47 = vrot.slane %v78_v42, 1  ;;  %v145_v51 = vsel %vm71_vm0, %v129_v46, 0.0  ;;  %305 = vst [vmem:[#allocation3 + $0x4c] sm:$0xf] %v5984_v49  ;;  %v82_v0 = vld [vmem:[#allocation4 + $0x20] sm:$0xff] }
  0x3a   :  { %6326 = vmatprep.subr.bf16.mxu1 %v6889_v27  ;;  %v5968_v56 = vpack.c.bf16 %v145_v51, %v145_v51  ;;  %624 = vst [vmem:[#allocation3 + $0x34] sm:$0xf] %v5984_v49  ;;  %944 = vst [vmem:[#allocation3 + $0x1c] sm:$0xf] %v5984_v49  ;;  %v5969_v6 = vpack.c.bf16 %v146_v63, %v146_v63  ;;  %v147_v7 = vsel %vm71_vm0, %v131_v60, 0.0  ;;  %v337_v10 = vsel %vm72_vm1, %v321_v61, 0.0 }
  0x3b   :  { %v144_v50 = vsel %vm71_vm0, %v128_v44, 0.0  ;;  %304 = vst [vmem:[#allocation3 + $0x28] sm:$0xf] %v5983_v45  ;;  %623 = vst [vmem:[#allocation3 + $0x10] sm:$0xf] %v5983_v45  ;;  %v336_v52 = vsel %vm72_vm1, %v320_v47, 0.0  ;;  %v5970_v12 = vpack.c.bf16 %v147_v7, %v147_v7  ;;  %v6000_v13 = vpack.c.bf16 %v337_v10, %v337_v10 }
  0x3c   :  { %6263 = vmatpush3.bf16.msra.mxu0 %v6890_v28  ;;  %v5967_v55 = vpack.c.bf16 %v144_v50, %v144_v50  ;;  %v5999_v57 = vpack.c.bf16 %v336_v52, %v336_v52  ;;  %544 = vst [vmem:[#allocation3 + $0x30] sm:$0xf] %v5968_v56  ;;  %225 = vst [vmem:[#allocation3 + $0x48] sm:$0xf] %v5968_v56  ;;  %v6001_v14 = vpack.c.bf16 %v338_v11, %v338_v11  ;;  %v7402_v21 = vld [vmem:[#allocation3] sm:$0xff]  ;;  %v7409_v26 = vld [vmem:[#allocation4 + $0x38] sm:$0xff] }
  0x3d   :  { %6327 = vmatpush3.bf16.msra.mxu1 %v6891_v29  ;;  %6264 = vmatprep.subr.bf16.mxu0 %v6892_v30  ;;  %864 = vst [vmem:[#allocation3 + $0x18] sm:$0xf] %v5968_v56  ;;  %625 = vst [vmem:[#allocation3 + $0x58] sm:$0xf] %v5985_v59  ;;  %v132_v15 = vrot.slane %v82_v0, 7  ;;  %v5987_v16 = vpack.c.bf16 %v82_v0, %v82_v0  ;;  %v133_v17 = vrot.slane %v7389_v2, 7 }
  0x3e   :  { %6328 = vmatprep.subr.bf16.mxu1 %v6893_v31  ;;  %224 = vst [vmem:[#allocation3 + $0x24] sm:$0xf] %v5967_v55  ;;  %543 = vst [vmem:[#allocation3 + $0xc] sm:$0xf] %v5967_v55  ;;  %v324_v18 = vrot.slane %v82_v0, 1  ;;  %v339_v19 = vsel %vm72_vm1, %v323_v4, 0.0  ;;  %v5988_v25 = vpack.c.bf16 %v7389_v2, %v7389_v2  ;;  %v5989_v30 = vpack.c.bf16 %v7400_v20, %v7400_v20 }
  0x3f   :  { %416 = vst [vmem:[#allocation3 + $0x2c] sm:$0xf] %v5999_v57  ;;  %735 = vst [vmem:[#allocation3 + $0x14] sm:$0xf] %v5999_v57  ;;  %v148_v22 = vsel %vm71_vm0, %v132_v15, 0.0  ;;  %v6002_v23 = vpack.c.bf16 %v339_v19, %v339_v19  ;;  %v134_v24 = vrot.slane %v7400_v20, 7  ;;  %v6037_v50 = vpack.c.bf16 %v7409_v26, %v7409_v26 }
  0x40   :  { %6265 = vmatpush3.bf16.msra.mxu0 %v6894_v32  ;;  %945 = vst [vmem:[#allocation3 + $0x40] sm:$0xf] %v5985_v59  ;;  %307 = vst [vmem:[#allocation3 + $0x94] sm:$0xf] %v5986_v1  ;;  %v5971_v27 = vpack.c.bf16 %v148_v22, %v148_v22  ;;  %v149_v28 = vsel %vm71_vm0, %v133_v17, 0.0  ;;  %v340_v29 = vsel %vm72_vm1, %v324_v18, 0.0 }
  0x41   :  { %6329 = vmatpush3.bf16.msra.mxu1 %v6895_v33  ;;  %6266 = vmatprep.subr.bf16.mxu0 %v6896_v34  ;;  %626 = vst [vmem:[#allocation3 + $0x7c] sm:$0xf] %v5986_v1  ;;  %946 = vst [vmem:[#allocation3 + $0x64] sm:$0xf] %v5986_v1  ;;  %v7417_v31 = vld [vmem:[#allocation7 + $0x138] sm:$0xff]   ;;  %v5972_v32 = vpack.c.bf16 %v149_v28, %v149_v28  ;;  %v6003_v33 = vpack.c.bf16 %v340_v29, %v340_v29  ;;  %v150_v34 = vsel %vm71_vm0, %v134_v24, 0.0 }
  0x42   :  { %6330 = vmatprep.subr.bf16.mxu1 %v6897_v35  ;;  %226 = vst [vmem:[#allocation3 + $0x6c] sm:$0xf] %v5969_v6  ;;  %545 = vst [vmem:[#allocation3 + $0x54] sm:$0xf] %v5969_v6  ;;  %v325_v35 = vrot.slane %v7389_v2, 1  ;;  %v454_v42 = vrot.slane %v7409_v26, 7 }
  0x43   :  { %865 = vst [vmem:[#allocation3 + $0x3c] sm:$0xf] %v5969_v6  ;;  %417 = vst [vmem:[#allocation3 + $0x50] sm:$0xf] %v6000_v13  ;;  %v6915_v47 = vld [vmem:[#allocation7 + $0x170] sm:$0xff]   ;;  %v87_v56 = vld [vmem:[#allocation4 + $0x48] sm:$0xff] }
  0x44   :  { %6267 = vmatpush3.bf16.msra.mxu0 %v6898_v36  ;;  %418 = vst [vmem:[#allocation3 + $0x74] sm:$0xf] %v6001_v14  ;;  %546 = vst [vmem:[#allocation3 + $0x78] sm:$0xf] %v5970_v12  ;;  %v7422_v36 = vld [vmem:[#allocation4 + $0x40] sm:$0xff]  ;;  %v6916_v52 = vld [vmem:[#allocation7 + $0x130] sm:$0xff]   ;;  %v5992_v4 = vpack.c.bf16 %v87_v56, %v87_v56 }
  0x45   :  { %6331 = vmatpush3.bf16.msra.mxu1 %v6899_v37  ;;  %6268 = vmatprep.subr.bf16.mxu0 %v6900_v38  ;;  %227 = vst [vmem:[#allocation3 + $0x90] sm:$0xf] %v5970_v12  ;;  %736 = vst [vmem:[#allocation3 + $0x38] sm:$0xf] %v6000_v13  ;;  %v1079_v37 = vld [vmem:[#allocation3 + $0x24] sm:$0xff]  ;;  %v5991_v43 = vpack.c.bf16 %v7422_v36, %v7422_v36  ;;  %v136_v49 = vrot.slane %v7422_v36, 7 }
  0x46   :  { %6332 = vmatprep.subr.bf16.mxu1 %v6901_v39  ;;  %737 = vst [vmem:[#allocation3 + $0x5c] sm:$0xf] %v6001_v14  ;;  %866 = vst [vmem:[#allocation3 + $0x60] sm:$0xf] %v5970_v12  ;;  %v6904_v38 = vld [vmem:[#allocation3 + $0x4] ss:$36 sps:$4 sm:$0xff]   ;;  %v5534_v46 = vcombine.low %v7402_v21, %v1079_v37 }
  0x47   :  { %1056 = vst [vmem:[#allocation3 + $0x20] sm:$0xf] %v6000_v13  ;;  %1057 = vst [vmem:[#allocation3 + $0x44] sm:$0xf] %v6001_v14  ;;  %v1075_v39 = vld [vmem:[#allocation3 + $0x8] sm:$0xff]  ;;  %2130 = vmatprep.mubr.bf16.mxu0 %v6904_v38  ;;  %v470_v55 = vsel %vm71_vm0, %v454_v42, 0.0 }
  0x48   :  { %6269 = vmatpush3.bf16.msra.mxu0 %v6902_v40  ;;  %308 = vst [vmem:[#allocation3 + $0xb8] sm:$0xf] %v5987_v16  ;;  %627 = vst [vmem:[#allocation3 + $0xa0] sm:$0xf] %v5987_v16  ;;  %v5973_v40 = vpack.c.bf16 %v150_v34, %v150_v34  ;;  %v1080_v44 = vld [vmem:[#allocation3 + $0x2c] sm:$0xff]  ;;  %v6021_v61 = vpack.c.bf16 %v470_v55, %v470_v55  ;;  %v152_v62 = vsel %vm71_vm0, %v136_v49, 0.0 }
  0x49   :  { %6333 = vmatpush3.bf16.msra.mxu1 %v6903_v41  ;;  %6382 = vmatprep.subr.bf16.mxu0 %v6908_v48  ;;  %947 = vst [vmem:[#allocation3 + $0x88] sm:$0xf] %v5987_v16  ;;  %419 = vst [vmem:[#allocation3 + $0x98] sm:$0xf] %v6002_v23  ;;  %v326_v41 = vrot.slane %v7400_v20, 1  ;;  %v341_v48 = vsel %vm72_vm1, %v325_v35, 0.0  ;;  %v5536_v51 = vcombine.low %v1075_v39, %v1080_v44 }
  0x4a   :  { %738 = vst [vmem:[#allocation3 + $0x80] sm:$0xf] %v6002_v23  ;;  %1058 = vst [vmem:[#allocation3 + $0x68] sm:$0xf] %v6002_v23  ;;  %v6906_v45 = vld [vmem:[#allocation3 + $0xc] ss:$36 sps:$4 sm:$0xff]   ;;  %v6004_v54 = vpack.c.bf16 %v341_v48, %v341_v48  ;;  %v5975_v1 = vpack.c.bf16 %v152_v62, %v152_v62 }
  0x4b   :  { %309 = vst [vmem:[#allocation3 + $0xdc] sm:$0xf] %v5988_v25  ;;  %628 = vst [vmem:[#allocation3 + $0xc4] sm:$0xf] %v5988_v25  ;;  %v342_v53 = vsel %vm72_vm1, %v326_v41, 0.0  ;;  %2227 = vmatprep.mubr.bf16.mxu1 %v6906_v45  ;;  %2131 = vmatmul.mubr.bf16.vlgmr.msra.gmra.mxu0 %v5534_v46  ;;  %v1084_v57 = vld [vmem:[#allocation3 + $0x48] sm:$0xff] }
  0x4c   :  { %948 = vst [vmem:[#allocation3 + $0xac] sm:$0xf] %v5988_v25  ;;  %228 = vst [vmem:[#allocation3 + $0xb4] sm:$0xf] %v5971_v27  ;;  %v1089_v58 = vld [vmem:[#allocation3 + $0x6c] sm:$0xff]  ;;  %v6005_v60 = vpack.c.bf16 %v342_v53, %v342_v53  ;;  %v137_v63 = vrot.slane %v87_v56, 7  ;;  %2228 = vmatmul.mubr.bf16.vlgmr.msra.gmra.mxu1 %v5536_v51  ;;  %6383 = vmatpush3.bf16.msra.mxu0 %v7417_v31 }
  0x4d   :  { %547 = vst [vmem:[#allocation3 + $0x9c] sm:$0xf] %v5971_v27  ;;  %867 = vst [vmem:[#allocation3 + $0x84] sm:$0xf] %v5971_v27  ;;  %v6910_v59 = vld [vmem:[#allocation3 + $0x4c] ss:$36 sps:$4 sm:$0xff]   ;;  %6384 = vmatprep.subr.bf16.mxu0 %v6915_v47  ;;  %v5543_v13 = vcombine.low %v1084_v57, %v1089_v58 }
  0x4e   :  { %310 = vst [vmem:[#allocation3 + $0x100] sm:$0xf] %v5989_v30  ;;  %629 = vst [vmem:[#allocation3 + $0xe8] sm:$0xf] %v5989_v30  ;;  %v6912_v0 = vld [vmem:[#allocation3 + $0x54] ss:$36 sps:$4 sm:$0xff]   ;;  %2138 = vmatprep.mubr.bf16.mxu0 %v6910_v59 }
  0x4f   :  { %949 = vst [vmem:[#allocation3 + $0xd0] sm:$0xf] %v5989_v30  ;;  %2838 = vst [vmem:[#allocation3] sm:$0xf] %v7369_v8  ;;  %v328_v2 = vrot.slane %v7422_v36, 1  ;;  %v6922_v6 = vld [vmem:[#allocation7 + $0x168] sm:$0xff]   ;;  %2235 = vmatprep.mubr.bf16.mxu1 %v6912_v0 }
  0x50   :  { %2918 = vst [vmem:[#allocation3 + $0x4] sm:$0xf] %v7303_v3  ;;  %420 = vst [vmem:[#allocation3 + $0xbc] sm:$0xf] %v6003_v33  ;;  %v153_v7 = vsel %vm71_vm0, %v137_v63, 0.0  ;;  %v6936_v12 = vld [vmem:[#allocation7 + $0x1f8] sm:$0xff]   ;;  %6385 = vmatpush3.bf16.msra.mxu0 %v6916_v52 }
  0x51   :  { %548 = vst [vmem:[#allocation3 + $0xc0] sm:$0xf] %v5972_v32  ;;  %229 = vst [vmem:[#allocation3 + $0xd8] sm:$0xf] %v5972_v32  ;;  %v5976_v10 = vpack.c.bf16 %v153_v7, %v153_v7  ;;  %v344_v11 = vsel %vm72_vm1, %v328_v2, 0.0  ;;  %v329_v15 = vrot.slane %v87_v56, 1  ;;  %6446 = vmatprep.subr.bf16.mxu1 %v6936_v12  ;;  %6386 = vmatprep.subr.bf16.mxu0 %v6922_v6 }
  0x52   :  { %739 = vst [vmem:[#allocation3 + $0xa4] sm:$0xf] %v6003_v33  ;;  %868 = vst [vmem:[#allocation3 + $0xa8] sm:$0xf] %v5972_v32  ;;  %v6007_v14 = vpack.c.bf16 %v344_v11, %v344_v11  ;;  %v646_v16 = vrot.slane %v7409_v26, 1  ;;  %v6923_v20 = vld [vmem:[#allocation7 + $0x128] sm:$0xff]  }
  0x53   :  { %1059 = vst [vmem:[#allocation3 + $0x8c] sm:$0xf] %v6003_v33  ;;  %3030 = vst [vmem:[#allocation3 + $0x8] sm:$0xf] %v7371_v9  ;;  %v6914_v17 = vld [vmem:[#allocation3 + $0x50] ss:$36 sps:$4 sm:$0xff]   ;;  %2139 = vmatmul.mubr.bf16.gmra.mxu0 %v5543_v13 }
  0x54   :  { %230 = vst [vmem:[#allocation3 + $0xfc] sm:$0xf] %v5973_v40  ;;  %549 = vst [vmem:[#allocation3 + $0xe4] sm:$0xf] %v5973_v40  ;;  %v6917_v18 = vld [vmem:[#allocation3 + $0x94] ss:$36 sps:$4 sm:$0xff]   ;;  %2236 = vmatmul.mubr.bf16.gmra.mxu1 %v6914_v17  ;;  %6387 = vmatpush3.bf16.msra.mxu0 %v6923_v20 }
  0x55   :  { %869 = vst [vmem:[#allocation3 + $0xcc] sm:$0xf] %v5973_v40  ;;  %312 = vst [vmem:[#allocation3 + $0x148] sm:$0xf] %v5991_v43  ;;  %v345_v21 = vsel %vm72_vm1, %v329_v15, 0.0  ;;  %v662_v22 = vsel %vm72_vm1, %v646_v16, 0.0  ;;  %2146 = vmatprep.mubr.bf16.mxu0 %v6917_v18 }
  0x56   :  { %631 = vst [vmem:[#allocation3 + $0x130] sm:$0xf] %v5991_v43  ;;  %630 = vst [vmem:[#allocation3 + $0x10c] sm:$0xf] %v6037_v50  ;;  %v6929_v23 = vld [vmem:[#allocation7 + $0x160] sm:$0xff]   ;;  %v6008_v24 = vpack.c.bf16 %v345_v21, %v345_v21  ;;  %v6053_v25 = vpack.c.bf16 %v662_v22, %v662_v22  ;;  %v1094_v26 = vld [vmem:[#allocation3 + $0x90] sm:$0xff] }
  0x57   :  { %950 = vst [vmem:[#allocation3 + $0xf4] sm:$0xf] %v6037_v50  ;;  %421 = vst [vmem:[#allocation3 + $0xe0] sm:$0xf] %v6004_v54  ;;  %v1099_v27 = vld [vmem:[#allocation3 + $0xb4] sm:$0xff]  ;;  %v6930_v28 = vld [vmem:[#allocation7 + $0x120] sm:$0xff]   ;;  %6388 = vmatprep.subr.bf16.mxu0 %v6929_v23 }
  0x58   :  { %740 = vst [vmem:[#allocation3 + $0xc8] sm:$0xf] %v6004_v54  ;;  %1060 = vst [vmem:[#allocation3 + $0xb0] sm:$0xf] %v6004_v54  ;;  %v6919_v19 = vld [vmem:[#allocation3 + $0x9c] ss:$36 sps:$4 sm:$0xff]   ;;  %v5552_v34 = vcombine.low %v1094_v26, %v1099_v27  ;;  %6389 = vmatpush3.bf16.msra.mxu0 %v6930_v28 }
  0x59   :  { %422 = vst [vmem:[#allocation3 + $0x104] sm:$0xf] %v6005_v60  ;;  %550 = vst [vmem:[#allocation3 + $0x108] sm:$0xf] %v6021_v61  ;;  %2243 = vmatprep.mubr.bf16.mxu1 %v6919_v19  ;;  %v6935_v30 = vld [vmem:[#allocation7 + $0x158] sm:$0xff]   ;;  %v6939_v36 = vld [vmem:[#allocation7 + $0x1f0] sm:$0xff]  }
  0x5a   :  { %741 = vst [vmem:[#allocation3 + $0xec] sm:$0xf] %v6005_v60  ;;  %870 = vst [vmem:[#allocation3 + $0xf0] sm:$0xf] %v6021_v61  ;;  %v6921_v31 = vld [vmem:[#allocation3 + $0x98] ss:$36 sps:$4 sm:$0xff]   ;;  %6390 = vmatprep.subr.bf16.mxu0 %v6935_v30 }
  0x5b   :  { %1061 = vst [vmem:[#allocation3 + $0xd4] sm:$0xf] %v6005_v60  ;;  %232 = vst [vmem:[#allocation3 + $0x144] sm:$0xf] %v5975_v1  ;;  %v6924_v32 = vld [vmem:[#allocation3 + $0xdc] ss:$36 sps:$4 sm:$0xff]   ;;  %2147 = vmatmul.mubr.bf16.gmra.mxu0 %v5552_v34 }
  0x5c   :  { %551 = vst [vmem:[#allocation3 + $0x12c] sm:$0xf] %v5975_v1  ;;  %313 = vst [vmem:[#allocation3 + $0x16c] sm:$0xf] %v5992_v4  ;;  %v7454_v29 = vld [vmem:[#allocation3 + $0x124] ss:$36 sps:$4 sm:$0xff]   ;;  %2244 = vmatmul.mubr.bf16.gmra.mxu1 %v6921_v31  ;;  %2154 = vmatprep.mubr.bf16.mxu0 %v6924_v32 }
  0x5d   :  { %632 = vst [vmem:[#allocation3 + $0x154] sm:$0xf] %v5992_v4  ;;  %952 = vst [vmem:[#allocation3 + $0x13c] sm:$0xf] %v5992_v4  ;;  %v6938_v33 = vld [vmem:[#allocation7 + $0x1b8] sm:$0xff]   ;;  %v88_v37 = vld [vmem:[#allocation4 + $0x50] sm:$0xff] }
  0x5e   :  { %552 = vst [vmem:[#allocation3 + $0x150] sm:$0xf] %v5976_v10  ;;  %233 = vst [vmem:[#allocation3 + $0x168] sm:$0xf] %v5976_v10  ;;  %v6937_v39 = vld [vmem:[#allocation7 + $0x118] sm:$0xff]   ;;  %6447 = vmatpush3.bf16.msra.mxu1 %v6938_v33  ;;  %v138_v40 = vrot.slane %v88_v37, 7  ;;  %v5993_v41 = vpack.c.bf16 %v88_v37, %v88_v37 }
  0x5f   :  { %872 = vst [vmem:[#allocation3 + $0x138] sm:$0xf] %v5976_v10  ;;  %424 = vst [vmem:[#allocation3 + $0x14c] sm:$0xf] %v6007_v14  ;;  %v89_v42 = vld [vmem:[#allocation4 + $0x58] sm:$0xff]  ;;  %v330_v43 = vrot.slane %v88_v37, 1  ;;  %6448 = vmatprep.subr.bf16.mxu1 %v6939_v36  ;;  %6391 = vmatpush3.bf16.msra.mxu0 %v6937_v39 }
  0x60   :  { %743 = vst [vmem:[#allocation3 + $0x134] sm:$0xf] %v6007_v14  ;;  %425 = vst [vmem:[#allocation3 + $0x170] sm:$0xf] %v6008_v24  ;;  %v6926_v35 = vld [vmem:[#allocation3 + $0xe4] ss:$36 sps:$4 sm:$0xff]   ;;  %v5994_v46 = vpack.c.bf16 %v89_v42, %v89_v42 }
  0x61   :  { %744 = vst [vmem:[#allocation3 + $0x158] sm:$0xf] %v6008_v24  ;;  %1064 = vst [vmem:[#allocation3 + $0x140] sm:$0xf] %v6008_v24  ;;  %v139_v44 = vrot.slane %v89_v42, 7  ;;  %v6944_v45 = vld [vmem:[#allocation7 + $0x1b0] sm:$0xff]   ;;  %2251 = vmatprep.mubr.bf16.mxu1 %v6926_v35 }
  0x62   :  { %742 = vst [vmem:[#allocation3 + $0x110] sm:$0xf] %v6053_v25  ;;  %1062 = vst [vmem:[#allocation3 + $0xf8] sm:$0xf] %v6053_v25  ;;  %v1104_v47 = vld [vmem:[#allocation3 + $0xd8] sm:$0xff]  ;;  %v154_v49 = vsel %vm71_vm0, %v138_v40, 0.0  ;;  %6449 = vmatpush3.bf16.msra.mxu1 %v6944_v45 }
  0x63   :  { %2926 = vst [vmem:[#allocation3 + $0x124] sm:$0xf] %v7303_v3  ;;  %v1109_v48 = vld [vmem:[#allocation3 + $0xfc] sm:$0xff]  ;;  %314 = vst [vmem:[#allocation3 + $0x190] sm:$0xf] %v5993_v41  ;;  %v346_v50 = vsel %vm72_vm1, %v330_v43, 0.0  ;;  %v5977_v51 = vpack.c.bf16 %v154_v49, %v154_v49 }
  0x64   :  { %633 = vst [vmem:[#allocation3 + $0x178] sm:$0xf] %v5993_v41  ;;  %953 = vst [vmem:[#allocation3 + $0x160] sm:$0xf] %v5993_v41  ;;  %v155_v52 = vsel %vm71_vm0, %v139_v44, 0.0  ;;  %v6009_v53 = vpack.c.bf16 %v346_v50, %v346_v50  ;;  %v6946_v54 = vld [vmem:[#allocation7 + $0x150] sm:$0xff]   ;;  %v5561_v62 = vcombine.low %v1104_v47, %v1109_v48 }
  0x65   :  { %v7458_v38 = vld [vmem:[#allocation3 + $0x12c] ss:$36 sps:$4 sm:$0xff]   ;;  %315 = vst [vmem:[#allocation3 + $0x1b4] sm:$0xf] %v5994_v46  ;;  %634 = vst [vmem:[#allocation3 + $0x19c] sm:$0xf] %v5994_v46  ;;  %v5978_v55 = vpack.c.bf16 %v155_v52, %v155_v52  ;;  %6392 = vmatprep.subr.bf16.mxu0 %v6946_v54 }
  0x66   :  { %954 = vst [vmem:[#allocation3 + $0x184] sm:$0xf] %v5994_v46  ;;  %v6947_v56 = vld [vmem:[#allocation7 + $0x110] sm:$0xff]   ;;  %v331_v57 = vrot.slane %v89_v42, 1  ;;  %234 = vst [vmem:[#allocation3 + $0x18c] sm:$0xf] %v5977_v51  ;;  %2155 = vmatmul.mubr.bf16.gmra.mxu0 %v5561_v62 }
  0x67   :  { %553 = vst [vmem:[#allocation3 + $0x174] sm:$0xf] %v5977_v51  ;;  %873 = vst [vmem:[#allocation3 + $0x15c] sm:$0xf] %v5977_v51  ;;  %v6948_v58 = vld [vmem:[#allocation7 + $0x1e8] sm:$0xff]   ;;  %v6950_v63 = vld [vmem:[#allocation7 + $0x1e0] sm:$0xff]   ;;  %6393 = vmatpush3.bf16.msra.mxu0 %v6947_v56  ;;  %2162 = vmatprep.mubr.bf16.mxu0 %v7454_v29 }
  0x68   :  { %426 = vst [vmem:[#allocation3 + $0x194] sm:$0xf] %v6009_v53  ;;  %745 = vst [vmem:[#allocation3 + $0x17c] sm:$0xf] %v6009_v53  ;;  %v6928_v59 = vld [vmem:[#allocation3 + $0xe0] ss:$36 sps:$4 sm:$0xff]   ;;  %6450 = vmatprep.subr.bf16.mxu1 %v6948_v58 }
  0x69   :  { %1065 = vst [vmem:[#allocation3 + $0x164] sm:$0xf] %v6009_v53  ;;  %554 = vst [vmem:[#allocation3 + $0x198] sm:$0xf] %v5978_v55  ;;  %v6949_v60 = vld [vmem:[#allocation7 + $0x1a8] sm:$0xff]   ;;  %v347_v61 = vsel %vm72_vm1, %v331_v57, 0.0  ;;  %2252 = vmatmul.mubr.bf16.gmra.mxu1 %v6928_v59 }
  0x6a   :  { %235 = vst [vmem:[#allocation3 + $0x1b0] sm:$0xf] %v5978_v55  ;;  %874 = vst [vmem:[#allocation3 + $0x180] sm:$0xf] %v5978_v55  ;;  %v90_v0 = vld [vmem:[#allocation4 + $0x60] sm:$0xff]  ;;  %v91_v1 = vld [vmem:[#allocation4 + $0x68] sm:$0xff]  ;;  %v6010_v2 = vpack.c.bf16 %v347_v61, %v347_v61  ;;  %6451 = vmatpush3.bf16.msra.mxu1 %v6949_v60  ;;  %2259 = vmatprep.mubr.bf16.mxu1 %v7458_v38 }
  0x6b   :  { %v140_v4 = vrot.slane %v90_v0, 7  ;;  %v5995_v6 = vpack.c.bf16 %v90_v0, %v90_v0  ;;  %v141_v7 = vrot.slane %v91_v1, 7  ;;  %v332_v10 = vrot.slane %v90_v0, 1  ;;  %v6955_v11 = vld [vmem:[#allocation7 + $0x1a0] sm:$0xff]   ;;  %v6957_v16 = vld [vmem:[#allocation7 + $0x148] sm:$0xff]   ;;  %6452 = vmatprep.subr.bf16.mxu1 %v6950_v63  ;;  %v6959_v28 = vld [vmem:[#allocation7 + $0x1d8] sm:$0xff]  }
  0x6c   :  { %427 = vst [vmem:[#allocation3 + $0x1b8] sm:$0xf] %v6010_v2  ;;  %746 = vst [vmem:[#allocation3 + $0x1a0] sm:$0xf] %v6010_v2  ;;  %v5996_v12 = vpack.c.bf16 %v91_v1, %v91_v1  ;;  %v6958_v20 = vld [vmem:[#allocation7 + $0x108] sm:$0xff]   ;;  %v333_v21 = vrot.slane %v91_v1, 1  ;;  %6394 = vmatprep.subr.bf16.mxu0 %v6957_v16 }
  0x6d   :  { %1066 = vst [vmem:[#allocation3 + $0x188] sm:$0xf] %v6010_v2  ;;  %v156_v13 = vsel %vm71_vm0, %v140_v4, 0.0  ;;  %316 = vst [vmem:[#allocation3 + $0x1d8] sm:$0xf] %v5995_v6  ;;  %v157_v14 = vsel %vm71_vm0, %v141_v7, 0.0  ;;  %6395 = vmatpush3.bf16.msra.mxu0 %v6958_v20 }
  0x6e   :  { %635 = vst [vmem:[#allocation3 + $0x1c0] sm:$0xf] %v5995_v6  ;;  %955 = vst [vmem:[#allocation3 + $0x1a8] sm:$0xf] %v5995_v6  ;;  %v348_v15 = vsel %vm72_vm1, %v332_v10, 0.0  ;;  %v5979_v17 = vpack.c.bf16 %v156_v13, %v156_v13  ;;  %v5980_v18 = vpack.c.bf16 %v157_v14, %v157_v14  ;;  %v1114_v22 = vld [vmem:[#allocation3 + $0x120] sm:$0xff]  ;;  %6453 = vmatpush3.bf16.msra.mxu1 %v6955_v11 }
  0x6f   :  { %v6011_v19 = vpack.c.bf16 %v348_v15, %v348_v15  ;;  %317 = vst [vmem:[#allocation3 + $0x1fc] sm:$0xf] %v5996_v12  ;;  %636 = vst [vmem:[#allocation3 + $0x1e4] sm:$0xf] %v5996_v12  ;;  %v1119_v23 = vld [vmem:[#allocation3 + $0x144] sm:$0xff]  ;;  %v1120_v25 = vld [vmem:[#allocation3 + $0x14c] sm:$0xff]  ;;  %6454 = vmatprep.subr.bf16.mxu1 %v6959_v28 }
  0x70   :  { %956 = vst [vmem:[#allocation3 + $0x1cc] sm:$0xf] %v5996_v12  ;;  %v1115_v24 = vld [vmem:[#allocation3 + $0x128] sm:$0xff]  ;;  %236 = vst [vmem:[#allocation3 + $0x1d4] sm:$0xf] %v5979_v17  ;;  %v349_v26 = vsel %vm72_vm1, %v333_v21, 0.0  ;;  %v5570_v30 = vcombine.low %v1114_v22, %v1119_v23 }
  0x71   :  { %555 = vst [vmem:[#allocation3 + $0x1bc] sm:$0xf] %v5979_v17  ;;  %875 = vst [vmem:[#allocation3 + $0x1a4] sm:$0xf] %v5979_v17  ;;  %v6940_v27 = vld [vmem:[#allocation3 + $0x16c] ss:$36 sps:$4 sm:$0xff]   ;;  %v6012_v29 = vpack.c.bf16 %v349_v26, %v349_v26  ;;  %v5572_v33 = vcombine.low %v1115_v24, %v1120_v25 }
  0x72   :  { %428 = vst [vmem:[#allocation3 + $0x1dc] sm:$0xf] %v6011_v19  ;;  %556 = vst [vmem:[#allocation3 + $0x1e0] sm:$0xf] %v5980_v18  ;;  %v6942_v31 = vld [vmem:[#allocation3 + $0x174] ss:$36 sps:$4 sm:$0xff]   ;;  %2163 = vmatmul.mubr.bf16.gmra.mxu0 %v5570_v30 }
  0x73   :  { %237 = vst [vmem:[#allocation3 + $0x1f8] sm:$0xf] %v5980_v18  ;;  %747 = vst [vmem:[#allocation3 + $0x1c4] sm:$0xf] %v6011_v19  ;;  %v6960_v32 = vld [vmem:[#allocation7 + $0x198] sm:$0xff]   ;;  %v6961_v34 = vld [vmem:[#allocation7 + $0x1d0] sm:$0xff]   ;;  %2260 = vmatmul.mubr.bf16.gmra.mxu1 %v5572_v33  ;;  %2170 = vmatprep.mubr.bf16.mxu0 %v6940_v27 }
  0x74   :  { %876 = vst [vmem:[#allocation3 + $0x1c8] sm:$0xf] %v5980_v18  ;;  %1067 = vst [vmem:[#allocation3 + $0x1ac] sm:$0xf] %v6011_v19  ;;  %v92_v35 = vld [vmem:[#allocation4 + $0x70] sm:$0xff]  ;;  %v93_v36 = vld [vmem:[#allocation4 + $0x78] sm:$0xff]  ;;  %6455 = vmatpush3.bf16.msra.mxu1 %v6960_v32  ;;  %2267 = vmatprep.mubr.bf16.mxu1 %v6942_v31 }
  0x75   :  { %429 = vst [vmem:[#allocation3 + $0x200] sm:$0xf] %v6012_v29  ;;  %748 = vst [vmem:[#allocation3 + $0x1e8] sm:$0xf] %v6012_v29  ;;  %v142_v37 = vrot.slane %v92_v35, 7  ;;  %v5997_v38 = vpack.c.bf16 %v92_v35, %v92_v35  ;;  %v334_v39 = vrot.slane %v92_v35, 1  ;;  %6456 = vmatprep.subr.bf16.mxu1 %v6961_v34  ;;  %v6045_v43 = vpack.c.bf16 %v93_v36, %v93_v36 }
  0x76   :  { %1068 = vst [vmem:[#allocation3 + $0x1d0] sm:$0xf] %v6012_v29  ;;  %v462_v40 = vrot.slane %v93_v36, 7  ;;  %v6966_v41 = vld [vmem:[#allocation7 + $0x190] sm:$0xff]   ;;  %v6968_v42 = vld [vmem:[#allocation7 + $0x140] sm:$0xff]   ;;  %v654_v44 = vrot.slane %v93_v36, 1 }
  0x77   :  { %v1124_v45 = vld [vmem:[#allocation3 + $0x168] sm:$0xff]  ;;  %v158_v47 = vsel %vm71_vm0, %v142_v37, 0.0  ;;  %318 = vst [vmem:[#allocation3 + $0x220] sm:$0xf] %v5997_v38  ;;  %637 = vst [vmem:[#allocation3 + $0x208] sm:$0xf] %v5997_v38  ;;  %6396 = vmatprep.subr.bf16.mxu0 %v6968_v42 }
  0x78   :  { %v1129_v46 = vld [vmem:[#allocation3 + $0x18c] sm:$0xff]  ;;  %957 = vst [vmem:[#allocation3 + $0x1f0] sm:$0xf] %v5997_v38  ;;  %v350_v48 = vsel %vm72_vm1, %v334_v39, 0.0  ;;  %v5981_v49 = vpack.c.bf16 %v158_v47, %v158_v47  ;;  %v478_v51 = vsel %vm71_vm0, %v462_v40, 0.0  ;;  %6457 = vmatpush3.bf16.msra.mxu1 %v6966_v41  ;;  %v670_v55 = vsel %vm72_vm1, %v654_v44, 0.0 }
  0x79   :  { %v6013_v50 = vpack.c.bf16 %v350_v48, %v350_v48  ;;  %638 = vst [vmem:[#allocation3 + $0x22c] sm:$0xf] %v6045_v43  ;;  %958 = vst [vmem:[#allocation3 + $0x214] sm:$0xf] %v6045_v43  ;;  %v6945_v52 = vld [vmem:[#allocation3 + $0x170] ss:$36 sps:$4 sm:$0xff]   ;;  %v6029_v54 = vpack.c.bf16 %v478_v51, %v478_v51  ;;  %v5579_v56 = vcombine.low %v1124_v45, %v1129_v46 }
  0x7a   :  { %v6951_v53 = vld [vmem:[#allocation3 + $0x1b4] ss:$36 sps:$4 sm:$0xff]   ;;  %v6953_v57 = vld [vmem:[#allocation3 + $0x1bc] ss:$36 sps:$4 sm:$0xff]   ;;  %238 = vst [vmem:[#allocation3 + $0x21c] sm:$0xf] %v5981_v49  ;;  %v6061_v59 = vpack.c.bf16 %v670_v55, %v670_v55 }
  0x7b   :  { %557 = vst [vmem:[#allocation3 + $0x204] sm:$0xf] %v5981_v49  ;;  %877 = vst [vmem:[#allocation3 + $0x1ec] sm:$0xf] %v5981_v49  ;;  %v6969_v58 = vld [vmem:[#allocation7 + $0x100] sm:$0xff]   ;;  %v6970_v60 = vld [vmem:[#allocation7 + $0x1c8] sm:$0xff]   ;;  %2171 = vmatmul.mubr.bf16.gmra.mxu0 %v5579_v56  ;;  %2268 = vmatmul.mubr.bf16.gmra.mxu1 %v6945_v52 }
  0x7c   :  { %430 = vst [vmem:[#allocation3 + $0x224] sm:$0xf] %v6013_v50  ;;  %749 = vst [vmem:[#allocation3 + $0x20c] sm:$0xf] %v6013_v50  ;;  %6397 = vmatpush3.bf16.msra.mxu0 %v6969_v58  ;;  %v6971_v61 = vld [vmem:[#allocation7 + $0x188] sm:$0xff]   ;;  %6458 = vmatprep.subr.bf16.mxu1 %v6970_v60  ;;  %v6972_v62 = vld [vmem:[#allocation7 + $0x1c0] sm:$0xff]  }
  0x7d   :  { %1069 = vst [vmem:[#allocation3 + $0x1f4] sm:$0xf] %v6013_v50  ;;  %558 = vst [vmem:[#allocation3 + $0x228] sm:$0xf] %v6029_v54  ;;  %v1134_v63 = vld [vmem:[#allocation3 + $0x1b0] sm:$0xff]  ;;  %6459 = vmatpush3.bf16.msra.mxu1 %v6971_v61  ;;  %2178 = vmatprep.mubr.bf16.mxu0 %v6951_v53  ;;  %v6975_v1 = vld [vmem:[#allocation7 + $0x180] sm:$0xff]  }
  0x7e   :  { %878 = vst [vmem:[#allocation3 + $0x210] sm:$0xf] %v6029_v54  ;;  %750 = vst [vmem:[#allocation3 + $0x230] sm:$0xf] %v6061_v59  ;;  %v1139_v0 = vld [vmem:[#allocation3 + $0x1d4] sm:$0xff]  ;;  %2275 = vmatprep.mubr.bf16.mxu1 %v6953_v57  ;;  %6460 = vmatprep.subr.bf16.mxu1 %v6972_v62  ;;  %v6991_v23 = vld [vmem:[#allocation7 + $0x228] sm:$0xff]  }
  0x7f   :  { %1070 = vst [vmem:[#allocation3 + $0x218] sm:$0xf] %v6061_v59  ;;  %v6977_v2 = vld [vmem:[#allocation7 + $0x238] sm:$0xff]   ;;  %v5588_v4 = vcombine.low %v1134_v63, %v1139_v0  ;;  %3485 = vst [vmem:[#allocation3 + $0x114] sm:$0xf] %v7369_v8  ;;  %v6984_v21 = vld [vmem:[#allocation7 + $0x230] sm:$0xff]  }
  0x80   :  { %6798 = vmatprep.subr.bf16.mxu0 %v6977_v2  ;;  %v6956_v6 = vld [vmem:[#allocation3 + $0x1b8] ss:$36 sps:$4 sm:$0xff]   ;;  %v6976_v18 = vld [vmem:[#allocation3 + $0x10] ss:$36 sps:$4 sm:$0xff]   ;;  %v6985_v22 = vld [vmem:[#allocation3 + $0x64] ss:$36 sps:$4 sm:$0xff]  }
  0x81   :  { %6461 = vmatpush3.bf16.msra.mxu1 %v6975_v1  ;;  %v6962_v7 = vld [vmem:[#allocation3 + $0x1fc] ss:$36 sps:$4 sm:$0xff]   ;;  %v6973_v14 = vld [vmem:[#allocation3 + $0x14] ss:$36 sps:$4 sm:$0xff]   ;;  %v6988_v26 = vld [vmem:[#allocation3 + $0xa4] ss:$36 sps:$4 sm:$0xff]  }
  0x82   :  { %v1144_v11 = vld [vmem:[#allocation3 + $0x1f8] sm:$0xff]  ;;  %v6987_v25 = vld [vmem:[#allocation3 + $0x60] ss:$36 sps:$4 sm:$0xff]   ;;  %v6992_v27 = vld [vmem:[#allocation3 + $0xac] ss:$36 sps:$4 sm:$0xff]  }
  0x83   :  { %2179 = vmatmul.mubr.bf16.gmra.mxu0 %v5588_v4  ;;  %2276 = vmatmul.mubr.bf16.gmra.mxu1 %v6956_v6  ;;  %v1149_v12 = vld [vmem:[#allocation3 + $0x21c] sm:$0xff]  ;;  %v6999_v17 = vld [vmem:[#allocation3 + $0xf4] ss:$36 sps:$4 sm:$0xff]   ;;  %3493 = vst [vmem:[#allocation3 + $0x234] sm:$0xf] %v7369_v8  ;;  %v7018_v37 = vld [vmem:[#allocation7 + $0x208] sm:$0xff]  }
  0x84   :  { %v6964_v10 = vld [vmem:[#allocation3 + $0x204] ss:$36 sps:$4 sm:$0xff]   ;;  %2186 = vmatprep.mubr.bf16.mxu0 %v6962_v7  ;;  %v5597_v13 = vcombine.low %v1144_v11, %v1149_v12  ;;  %v6978_v16 = vld [vmem:[#allocation3 + $0x1c] ss:$36 sps:$4 sm:$0xff]   ;;  %3565 = vst [vmem:[#allocation3 + $0x118] sm:$0xf] %v7303_v3 }
  0x85   :  { %2283 = vmatprep.mubr.bf16.mxu1 %v6964_v10  ;;  %v6967_v15 = vld [vmem:[#allocation3 + $0x200] ss:$36 sps:$4 sm:$0xff]   ;;  %v6980_v19 = vld [vmem:[#allocation3 + $0x18] ss:$36 sps:$4 sm:$0xff]   ;;  %v6994_v32 = vld [vmem:[#allocation3 + $0xa8] ss:$36 sps:$4 sm:$0xff]  }
  0x86   :  { %v6981_v20 = vld [vmem:[#allocation3 + $0x5c] ss:$36 sps:$4 sm:$0xff]   ;;  %v7489_v28 = vld [vmem:[#allocation3 + $0x214] ss:$36 sps:$4 sm:$0xff]   ;;  %v6995_v34 = vld [vmem:[#allocation3 + $0xec] ss:$36 sps:$4 sm:$0xff]  }
  0x87   :  { %v6983_v24 = vld [vmem:[#allocation3 + $0x58] ss:$36 sps:$4 sm:$0xff]   ;;  %v6998_v29 = vld [vmem:[#allocation7 + $0x220] sm:$0xff]   ;;  %3573 = vst [vmem:[#allocation3 + $0x238] sm:$0xf] %v7303_v3  ;;  %v7011_v35 = vld [vmem:[#allocation7 + $0x210] sm:$0xff]  }
  0x88   :  { %v6990_v30 = vld [vmem:[#allocation3 + $0xa0] ss:$36 sps:$4 sm:$0xff]   ;;  %v7493_v31 = vld [vmem:[#allocation3 + $0xf8] ss:$36 sps:$4 sm:$0xff]   ;;  %v1107_v3 = vld [vmem:[#allocation3 + $0xf0] sm:$0xff] }
  0x89   :  { %v7004_v33 = vld [vmem:[#allocation7 + $0x218] sm:$0xff]   ;;  %3677 = vst [vmem:[#allocation3 + $0x11c] sm:$0xf] %v7371_v9  ;;  %v6997_v38 = vld [vmem:[#allocation3 + $0xe8] ss:$36 sps:$4 sm:$0xff]   ;;  %v7025_v42 = vld [vmem:[#allocation7 + $0x200] sm:$0xff]  }
  0x8a   :  { %v7496_v36 = vld [vmem:[#allocation3 + $0x218] ss:$36 sps:$4 sm:$0xff]   ;;  %v7012_v45 = vld [vmem:[#allocation3 + $0x184] ss:$36 sps:$4 sm:$0xff]   ;;  %v7019_v49 = vld [vmem:[#allocation3 + $0x1cc] ss:$36 sps:$4 sm:$0xff]  }
  0x8b   :  { %2187 = vmatmul.mubr.bf16.gmra.mxu0 %v5597_v13  ;;  %2284 = vmatmul.mubr.bf16.gmra.mxu1 %v6967_v15  ;;  %3685 = vst [vmem:[#allocation3 + $0x23c] sm:$0xf] %v7371_v9  ;;  %v1112_v8 = vld [vmem:[#allocation3 + $0x114] sm:$0xff]  ;;  %v7005_v40 = vld [vmem:[#allocation3 + $0x13c] ss:$36 sps:$4 sm:$0xff]  }
  0x8c   :  { %2324 = vmatprep.mubr.bf16.mxu0 %v6973_v14  ;;  %2421 = vmatprep.mubr.bf16.mxu1 %v6978_v16  ;;  %v7001_v39 = vld [vmem:[#allocation3 + $0x134] ss:$36 sps:$4 sm:$0xff]   ;;  %v5567_v41 = vcombine.low %v1107_v3, %v1112_v8  ;;  %v7008_v44 = vld [vmem:[#allocation3 + $0x17c] ss:$36 sps:$4 sm:$0xff]   ;;  %v7015_v48 = vld [vmem:[#allocation3 + $0x1c4] ss:$36 sps:$4 sm:$0xff]  }
  0x8d   :  { %v7003_v9 = vld [vmem:[#allocation3 + $0x130] ss:$36 sps:$4 sm:$0xff]   ;;  %v7007_v43 = vld [vmem:[#allocation3 + $0x138] ss:$36 sps:$4 sm:$0xff]   ;;  %v7014_v47 = vld [vmem:[#allocation3 + $0x180] ss:$36 sps:$4 sm:$0xff]  }
  0x8e   :  { %v7010_v46 = vld [vmem:[#allocation3 + $0x178] ss:$36 sps:$4 sm:$0xff]   ;;  %v7017_v50 = vld [vmem:[#allocation3 + $0x1c0] ss:$36 sps:$4 sm:$0xff]   ;;  %v7021_v51 = vld [vmem:[#allocation3 + $0x1c8] ss:$36 sps:$4 sm:$0xff]  }
  0x8f   :  { %v7022_v52 = vld [vmem:[#allocation3 + $0x20c] ss:$36 sps:$4 sm:$0xff]   ;;  %v1152_v54 = vld [vmem:[#allocation3 + $0x234] sm:$0xff]  ;;  %v7028_v56 = vld [vmem:[#allocation3 + $0x20] ss:$36 sps:$4 sm:$0xff]  }
  0x90   :  { %v1147_v53 = vld [vmem:[#allocation3 + $0x210] sm:$0xff]  ;;  %v7024_v55 = vld [vmem:[#allocation3 + $0x208] ss:$36 sps:$4 sm:$0xff]   ;;  %v7032_v60 = vld [vmem:[#allocation3 + $0x140] ss:$36 sps:$4 sm:$0xff]  }
  0x91   :  { %v5603_v57 = vcombine.low %v1147_v53, %v1152_v54  ;;  %v7029_v58 = vld [vmem:[#allocation3 + $0x68] ss:$36 sps:$4 sm:$0xff]   ;;  %v7030_v59 = vld [vmem:[#allocation3 + $0xb0] ss:$36 sps:$4 sm:$0xff]  }
  0x92   :  { %v7033_v61 = vld [vmem:[#allocation3 + $0x188] ss:$36 sps:$4 sm:$0xff]   ;;  %v7034_v62 = vld [vmem:[#allocation3 + $0x1d0] ss:$36 sps:$4 sm:$0xff]  }
  0x93   :  { %2325 = vmatmul.mubr.bf16.vlgmr.msra.gmra.mxu0 %v6976_v18  ;;  %2422 = vmatmul.mubr.bf16.vlgmr.msra.gmra.mxu1 %v6980_v19 }
  0x94   :  { %6799 = vmatpush3.bf16.msra.mxu0 %v6977_v2  ;;  %2332 = vmatprep.mubr.bf16.mxu0 %v6981_v20 }
  0x95   :  { %6800 = vmatprep.subr.bf16.mxu0 %v6984_v21  ;;  %2429 = vmatprep.mubr.bf16.mxu1 %v6985_v22 }
  0x98   :  { %6801 = vmatpush3.bf16.msra.mxu0 %v6984_v21 }
  0x99   :  { %6802 = vmatprep.subr.bf16.mxu0 %v6991_v23 }
  0x9b   :  { %2333 = vmatmul.mubr.bf16.gmra.mxu0 %v6983_v24  ;;  %2430 = vmatmul.mubr.bf16.gmra.mxu1 %v6987_v25 }
  0x9c   :  { %2340 = vmatprep.mubr.bf16.mxu0 %v6988_v26  ;;  %2437 = vmatprep.mubr.bf16.mxu1 %v6992_v27 }
  0x9d   :  { %6803 = vmatpush3.bf16.msra.mxu0 %v6991_v23 }
  0x9e   :  { %6804 = vmatprep.subr.bf16.mxu0 %v6998_v29 }
  0xa1   :  { %6805 = vmatpush3.bf16.msra.mxu0 %v6998_v29 }
  0xa2   :  { %6806 = vmatprep.subr.bf16.mxu0 %v7004_v33 }
  0xa3   :  { %2341 = vmatmul.mubr.bf16.gmra.mxu0 %v6990_v30  ;;  %2438 = vmatmul.mubr.bf16.gmra.mxu1 %v6994_v32 }
  0xa4   :  { %2348 = vmatprep.mubr.bf16.mxu0 %v6995_v34  ;;  %2445 = vmatprep.mubr.bf16.mxu1 %v6999_v17 }
  0xa5   :  { %6807 = vmatpush3.bf16.msra.mxu0 %v7004_v33 }
  0xa6   :  { %6808 = vmatprep.subr.bf16.mxu0 %v7011_v35 }
  0xa9   :  { %6809 = vmatpush3.bf16.msra.mxu0 %v7011_v35 }
  0xaa   :  { %6810 = vmatprep.subr.bf16.mxu0 %v7018_v37 }
  0xab   :  { %2349 = vmatmul.mubr.bf16.gmra.mxu0 %v6997_v38  ;;  %2446 = vmatmul.mubr.bf16.gmra.mxu1 %v5567_v41 }
  0xac   :  { %2356 = vmatprep.mubr.bf16.mxu0 %v7001_v39  ;;  %2453 = vmatprep.mubr.bf16.mxu1 %v7005_v40 }
  0xad   :  { %6811 = vmatpush3.bf16.msra.mxu0 %v7018_v37 }
  0xae   :  { %6812 = vmatprep.subr.bf16.mxu0 %v7025_v42 }
  0xb1   :  { %6813 = vmatpush3.bf16.msra.mxu0 %v7025_v42 }
  0xb3   :  { %2357 = vmatmul.mubr.bf16.gmra.mxu0 %v7003_v9  ;;  %2454 = vmatmul.mubr.bf16.gmra.mxu1 %v7007_v43 }
  0xb4   :  { %2364 = vmatprep.mubr.bf16.mxu0 %v7008_v44  ;;  %2461 = vmatprep.mubr.bf16.mxu1 %v7012_v45 }
  0xbb   :  { %2365 = vmatmul.mubr.bf16.gmra.mxu0 %v7010_v46  ;;  %2462 = vmatmul.mubr.bf16.gmra.mxu1 %v7014_v47 }
  0xbc   :  { %2372 = vmatprep.mubr.bf16.mxu0 %v7015_v48  ;;  %2469 = vmatprep.mubr.bf16.mxu1 %v7019_v49 }
  0xc3   :  { %2373 = vmatmul.mubr.bf16.gmra.mxu0 %v7017_v50  ;;  %2470 = vmatmul.mubr.bf16.gmra.mxu1 %v7021_v51 }
  0xc4   :  { %2380 = vmatprep.mubr.bf16.mxu0 %v7022_v52  ;;  %2477 = vmatprep.mubr.bf16.mxu1 %v7489_v28 }
  0xcb   :  { %2381 = vmatmul.mubr.bf16.gmra.mxu0 %v7024_v55  ;;  %2478 = vmatmul.mubr.bf16.gmra.mxu1 %v5603_v57 }
  0xcc   :  { %6814 = vmatprep.mubr.bf16.mxu0 %v7028_v56 }
  0xd3   :  { %6815 = vmatmul.mubr.bf16.vlgmr.msra.gmra.mxu0 %v7029_v58 }
  0xd4   :  { %6818 = vmatprep.mubr.bf16.mxu0 %v7030_v59 }
  0xdb   :  { %6819 = vmatmul.mubr.bf16.gmra.mxu0 %v7493_v31 }
  0xdc   :  { %6822 = vmatprep.mubr.bf16.mxu0 %v7032_v60 }
  0xe3   :  { %6823 = vmatmul.mubr.bf16.gmra.mxu0 %v7033_v61 }
  0xe4   :  { %6826 = vmatprep.mubr.bf16.mxu0 %v7034_v62 }
  0xeb   :  { %6827 = vmatmul.mubr.bf16.gmra.mxu0 %v7496_v36 }
 0x10b   :  { %v6270_v63 = vpop.f32.mrf.mxu0 }
 0x10c   :  { %v6334_v0 = vpop.f32.mrf.mxu1 }
 0x10d   :  { %v6271_v1 = vpop.f32.mrf.mxu0 }
 0x10e   :  { %v6272_v2 = vadd.f32 %v6271_v1, %v6270_v63  ;;  %v6335_v4 = vpop.f32.mrf.mxu1 }
 0x10f   :  { %v6336_v6 = vadd.f32 %v6335_v4, %v6334_v0  ;;  %v6273_v7 = vpop.f32.mrf.mxu0 }
 0x110   :  { %v6337_v10 = vpop.f32.mrf.mxu1 }
 0x111   :  { %v7502_v11 = vadd.f32 %v6336_v6, %v6272_v2  ;;  %v6274_v12 = vpop.f32.mrf.mxu0 }
 0x112   :  { %v6275_v13 = vadd.f32 %v6274_v12, %v6273_v7  ;;  %v6338_v14 = vpop.f32.mrf.mxu1 }
 0x113   :  { %v6339_v15 = vadd.f32 %v6338_v14, %v6337_v10  ;;  %v6276_v16 = vpop.f32.mrf.mxu0 }
 0x114   :  { %v6340_v17 = vpop.f32.mrf.mxu1 }
 0x115   :  { %v7504_v18 = vadd.f32 %v6339_v15, %v6275_v13  ;;  %v6277_v19 = vpop.f32.mrf.mxu0 }
 0x116   :  { %v6278_v20 = vadd.f32 %v6277_v19, %v6276_v16  ;;  %v6341_v21 = vpop.f32.mrf.mxu1 }
 0x117   :  { %v6342_v22 = vadd.f32 %v6341_v21, %v6340_v17  ;;  %v6279_v23 = vpop.f32.mrf.mxu0 }
 0x118   :  { %v6343_v24 = vpop.f32.mrf.mxu1 }
 0x119   :  { %v7506_v25 = vadd.f32 %v6342_v22, %v6278_v20  ;;  %v6280_v26 = vpop.f32.mrf.mxu0 }
 0x11a   :  { %v6281_v27 = vadd.f32 %v6280_v26, %v6279_v23  ;;  %v6344_v28 = vpop.f32.mrf.mxu1 }
 0x11b   :  { %v6345_v29 = vadd.f32 %v6344_v28, %v6343_v24  ;;  %v6282_v30 = vpop.f32.mrf.mxu0 }
 0x11c   :  { %v6346_v31 = vpop.f32.mrf.mxu1 }
 0x11d   :  { %v7508_v32 = vadd.f32 %v6345_v29, %v6281_v27  ;;  %v6283_v33 = vpop.f32.mrf.mxu0 }
 0x11e   :  { %v6284_v34 = vadd.f32 %v6283_v33, %v6282_v30  ;;  %v6347_v35 = vpop.f32.mrf.mxu1 }
 0x11f   :  { %v6348_v36 = vadd.f32 %v6347_v35, %v6346_v31  ;;  %v6285_v3 = vpop.f32.mrf.mxu0 }
 0x120   :  { %v6349_v8 = vpop.f32.mrf.mxu1 }
 0x121   :  { %v7510_v37 = vadd.f32 %v6348_v36, %v6284_v34  ;;  %v6286_v38 = vpop.f32.mrf.mxu0 }
 0x122   :  { %v6287_v39 = vadd.f32 %v6286_v38, %v6285_v3  ;;  %v6350_v40 = vpop.f32.mrf.mxu1 }
 0x123   :  { %v6351_v41 = vadd.f32 %v6350_v40, %v6349_v8 }
 0x125   :  { %v7512_v43 = vadd.f32 %v6351_v41, %v6287_v39 }
 0x126   :  { %v6288_v42 = vpop.f32.mrf.mxu0 }
 0x128   :  { %v6289_v44 = vpop.f32.mrf.mxu0 }
 0x129   :  { %v6352_v9 = vpop.f32.mrf.mxu1  ;;  %v6290_v45 = vadd.f32 %v6289_v44, %v6288_v42 }
 0x12a   :  { %v6291_v48 = vpop.f32.mrf.mxu0 }
 0x12b   :  { %v6353_v46 = vpop.f32.mrf.mxu1 }
 0x12c   :  { %v6354_v47 = vadd.f32 %v6353_v46, %v6352_v9  ;;  %v6292_v51 = vpop.f32.mrf.mxu0 }
 0x12d   :  { %v6355_v49 = vpop.f32.mrf.mxu1  ;;  %v6293_v52 = vadd.f32 %v6292_v51, %v6291_v48 }
 0x12e   :  { %v7514_v50 = vadd.f32 %v6354_v47, %v6290_v45 }
 0x12f   :  { %v6356_v53 = vpop.f32.mrf.mxu1 }
 0x130   :  { %v6357_v54 = vadd.f32 %v6356_v53, %v6355_v49 }
 0x132   :  { %v6294_v55 = vpop.f32.mrf.mxu0  ;;  %v7516_v57 = vadd.f32 %v6357_v54, %v6293_v52 }
 0x133   :  { %v6358_v56 = vpop.f32.mrf.mxu1 }
 0x134   :  { %v6295_v58 = vpop.f32.mrf.mxu0 }
 0x135   :  { %v6296_v59 = vadd.f32 %v6295_v58, %v6294_v55  ;;  %v6359_v60 = vpop.f32.mrf.mxu1 }
 0x136   :  { %v6360_v61 = vadd.f32 %v6359_v60, %v6358_v56  ;;  %v6297_v62 = vpop.f32.mrf.mxu0  ;;  %v7045_v60 = vld [vmem:[#allocation9 + $0xf8] sm:$0xff]  }
 0x137   :  { %v6361_v63 = vpop.f32.mrf.mxu1  ;;  %6590 = vmatprep.subr.bf16.mxu0 %v7045_v60  ;;  %v7052_v60 = vld [vmem:[#allocation9 + $0x10] sm:$0xff]  }
 0x138   :  { %v7518_v0 = vadd.f32 %v6360_v61, %v6296_v59  ;;  %v6298_v1 = vpop.f32.mrf.mxu0  ;;  %v7036_v59 = vld [vmem:[#allocation9 + $0x78] sm:$0xff]  }
 0x139   :  { %v6299_v2 = vadd.f32 %v6298_v1, %v6297_v62  ;;  %v6362_v4 = vpop.f32.mrf.mxu1  ;;  %v7037_v62 = vld [vmem:[#allocation9 + $0x38] sm:$0xff]   ;;  %6526 = vmatprep.subr.bf16.mxu1 %v7036_v59 }
 0x13a   :  { %v6363_v6 = vadd.f32 %v6362_v4, %v6361_v63  ;;  %v7047_v63 = vld [vmem:[#allocation9 + $0xb8] sm:$0xff]   ;;  %6527 = vmatpush3.bf16.msra.mxu1 %v7037_v62  ;;  %v7061_v62 = vld [vmem:[#allocation9 + $0x90] sm:$0xff]  }
 0x13b   :  { %v6300_v7 = vpop.f32.mrf.mxu0  ;;  %v6364_v10 = vpop.f32.mrf.mxu1  ;;  %6591 = vmatpush3.bf16.msra.mxu0 %v7047_v63 }
 0x13c   :  { %v7520_v12 = vadd.f32 %v6363_v6, %v6299_v2 }
 0x13d   :  { %v6301_v13 = vpop.f32.mrf.mxu0  ;;  %v6365_v15 = vpop.f32.mrf.mxu1 }
 0x13e   :  { %8276 = vst [vmem:[#allocation15_spill] sm:$0xff] %v7520_v12  ;;  %v6302_v14 = vadd.f32 %v6301_v13, %v6300_v7  ;;  %v6366_v16 = vadd.f32 %v6365_v15, %v6364_v10  ;;  %v7038_v7 = vld [vmem:[#allocation9 + $0x70] sm:$0xff]  }
 0x13f   :  { %v6303_v17 = vpop.f32.mrf.mxu0  ;;  %v6367_v19 = vpop.f32.mrf.mxu1  ;;  %v7048_v10 = vld [vmem:[#allocation9 + $0xf0] sm:$0xff]   ;;  %6528 = vmatprep.subr.bf16.mxu1 %v7038_v7 }
 0x140   :  { %v7522_v20 = vadd.f32 %v6366_v16, %v6302_v14  ;;  %v7039_v14 = vld [vmem:[#allocation9 + $0x30] sm:$0xff]   ;;  %6592 = vmatprep.subr.bf16.mxu0 %v7048_v10  ;;  %v7056_v10 = vld [vmem:[#allocation9 + $0x48] sm:$0xff]  }
 0x141   :  { %v6304_v21 = vpop.f32.mrf.mxu0  ;;  %v6368_v23 = vpop.f32.mrf.mxu1  ;;  %v7049_v15 = vld [vmem:[#allocation9 + $0xb0] sm:$0xff]   ;;  %6529 = vmatpush3.bf16.msra.mxu1 %v7039_v14  ;;  %v7058_v14 = vld [vmem:[#allocation9 + $0x8] sm:$0xff]  }
 0x142   :  { %8277 = vst [vmem:[#allocation16_spill] sm:$0xff] %v7522_v20  ;;  %v6305_v22 = vadd.f32 %v6304_v21, %v6303_v17  ;;  %v6369_v24 = vadd.f32 %v6368_v23, %v6367_v19  ;;  %6593 = vmatpush3.bf16.msra.mxu0 %v7049_v15  ;;  %v7040_v19 = vld [vmem:[#allocation9 + $0x68] sm:$0xff]  }
 0x143   :  { %v6306_v26 = vpop.f32.mrf.mxu0  ;;  %v6370_v27 = vpop.f32.mrf.mxu1  ;;  %v7051_v21 = vld [vmem:[#allocation9 + $0xe8] sm:$0xff]   ;;  %6530 = vmatprep.subr.bf16.mxu1 %v7040_v19  ;;  %v7062_v19 = vld [vmem:[#allocation9 + $0x40] sm:$0xff]  }
 0x144   :  { %v7524_v28 = vadd.f32 %v6369_v24, %v6305_v22  ;;  %v7041_v23 = vld [vmem:[#allocation9 + $0x28] sm:$0xff]   ;;  %6594 = vmatprep.subr.bf16.mxu0 %v7051_v21 }
 0x145   :  { %v6307_v29 = vpop.f32.mrf.mxu0  ;;  %v6371_v31 = vpop.f32.mrf.mxu1  ;;  %v7053_v24 = vld [vmem:[#allocation9 + $0xa8] sm:$0xff]   ;;  %6531 = vmatpush3.bf16.msra.mxu1 %v7041_v23 }
 0x146   :  { %8278 = vst [vmem:[#allocation17_spill] sm:$0xff] %v7524_v28  ;;  %v6308_v30 = vadd.f32 %v6307_v29, %v6306_v26  ;;  %v6372_v33 = vadd.f32 %v6371_v31, %v6370_v27  ;;  %6595 = vmatpush3.bf16.msra.mxu0 %v7053_v24  ;;  %v7054_v31 = vld [vmem:[#allocation9 + $0xe0] sm:$0xff]   ;;  %v7063_v21 = vld [vmem:[#allocation9 + $0xc8] sm:$0xff]  }
 0x147   :  { %v6309_v34 = vpop.f32.mrf.mxu0  ;;  %v6373_v35 = vpop.f32.mrf.mxu1  ;;  %6596 = vmatprep.subr.bf16.mxu0 %v7054_v31  ;;  %v7065_v23 = vld [vmem:[#allocation9 + $0x88] sm:$0xff]  }
 0x148   :  { %v7526_v36 = vadd.f32 %v6372_v33, %v6308_v30  ;;  %v7042_v30 = vld [vmem:[#allocation9 + $0x60] sm:$0xff]  }
 0x149   :  { %v6310_v3 = vpop.f32.mrf.mxu0  ;;  %v6374_v38 = vpop.f32.mrf.mxu1  ;;  %6532 = vmatprep.subr.bf16.mxu1 %v7042_v30  ;;  %v7066_v30 = vld [vmem:[#allocation9 + $0xc0] sm:$0xff]  }
 0x14a   :  { %8279 = vst [vmem:[#allocation18_spill] sm:$0xff] %v7526_v36  ;;  %v6311_v8 = vadd.f32 %v6310_v3, %v6309_v34  ;;  %v6375_v39 = vadd.f32 %v6374_v38, %v6373_v35  ;;  %v7043_v34 = vld [vmem:[#allocation9 + $0x20] sm:$0xff]  }
 0x14b   :  { %v6312_v40 = vpop.f32.mrf.mxu0  ;;  %v6376_v41 = vpop.f32.mrf.mxu1  ;;  %v7055_v35 = vld [vmem:[#allocation9 + $0xa0] sm:$0xff]   ;;  %6533 = vmatpush3.bf16.msra.mxu1 %v7043_v34 }
 0x14c   :  { %v7528_v42 = vadd.f32 %v6375_v39, %v6311_v8  ;;  %6597 = vmatpush3.bf16.msra.mxu0 %v7055_v35  ;;  %v7044_v39 = vld [vmem:[#allocation9 + $0x58] sm:$0xff]   ;;  %v7064_v35 = vld [vmem:[#allocation9] sm:$0xff]  }
 0x14d   :  { %v6313_v9 = vpop.f32.mrf.mxu0  ;;  %v6377_v45 = vpop.f32.mrf.mxu1  ;;  %6534 = vmatprep.subr.bf16.mxu1 %v7044_v39  ;;  %v7067_v39 = vld [vmem:[#allocation9 + $0x80] sm:$0xff]  }
 0x14e   :  { %8280 = vst [vmem:[#allocation19_spill] sm:$0xff] %v7528_v42  ;;  %v6314_v44 = vadd.f32 %v6313_v9, %v6312_v40  ;;  %v6378_v46 = vadd.f32 %v6377_v45, %v6376_v41  ;;  %v7057_v40 = vld [vmem:[#allocation9 + $0xd8] sm:$0xff]  }
 0x14f   :  { %v7530_v47 = vpop.f32.mrf.mxu0  ;;  %v7532_v48 = vpop.f32.mrf.mxu1  ;;  %v7046_v9 = vld [vmem:[#allocation9 + $0x18] sm:$0xff]   ;;  %6598 = vmatprep.subr.bf16.mxu0 %v7057_v40 }
 0x150   :  { %v7534_v49 = vadd.f32 %v6378_v46, %v6314_v44  ;;  %v7059_v44 = vld [vmem:[#allocation9 + $0x98] sm:$0xff]   ;;  %6535 = vmatpush3.bf16.msra.mxu1 %v7046_v9 }
 0x151   :  { %v7536_v51 = vpop.f32.mrf.mxu0  ;;  %v7538_v52 = vpop.f32.mrf.mxu1  ;;  %6599 = vmatpush3.bf16.msra.mxu0 %v7059_v44 }
 0x152   :  { %8281 = vst [vmem:[#allocation20_spill] sm:$0xff] %v7534_v49 }
 0x153   :  { %v6398_v53 = vpop.f32.mrf.mxu0  ;;  %v7540_v54 = vpop.f32.mrf.mxu1 }
 0x155   :  { %v6399_v55 = vpop.f32.mrf.mxu0  ;;  %v7542_v58 = vpop.f32.mrf.mxu1 }
 0x156   :  { %v6400_v56 = vadd.f32 %v6399_v55, %v6398_v53  ;;  %v7050_v55 = vld [vmem:[#allocation9 + $0x50] sm:$0xff]  }
 0x157   :  { %v7544_v61 = vpop.f32.mrf.mxu0  ;;  %v7549_v2 = vpop.f32.mrf.mxu1  ;;  %6536 = vmatprep.subr.bf16.mxu1 %v7050_v55 }
 0x158   :  { %v7547_v1 = vadd.f32 %v6400_v56, %v7502_v11  ;;  %v7060_v56 = vld [vmem:[#allocation9 + $0xd0] sm:$0xff]   ;;  %6537 = vmatpush3.bf16.msra.mxu1 %v7052_v60 }
 0x159   :  { %v7551_v4 = vpop.f32.mrf.mxu0  ;;  %v7553_v6 = vpop.f32.mrf.mxu1  ;;  %6600 = vmatprep.subr.bf16.mxu0 %v7060_v56  ;;  %6538 = vmatprep.subr.bf16.mxu1 %v7056_v10 }
 0x15a   :  { %6601 = vmatpush3.bf16.msra.mxu0 %v7061_v62 }
 0x15b   :  { %v7555_v13 = vpop.f32.mrf.mxu0  ;;  %v7557_v16 = vpop.f32.mrf.mxu1  ;;  %6602 = vmatprep.subr.bf16.mxu0 %v7063_v21 }
 0x15c   :  { %6539 = vmatpush3.bf16.msra.mxu1 %v7058_v14  ;;  %v7074_v14 = vld [vmem:[#allocation9 + $0x178] sm:$0xff]  }
 0x15d   :  { %v7559_v11 = vpop.f32.mrf.mxu0  ;;  %v7561_v17 = vpop.f32.mrf.mxu1  ;;  %6540 = vmatprep.subr.bf16.mxu1 %v7062_v19 }
 0x15e   :  { %6603 = vmatpush3.bf16.msra.mxu0 %v7065_v23 }
 0x15f   :  { %v7563_v22 = vpop.f32.mrf.mxu0  ;;  %v7565_v26 = vpop.f32.mrf.mxu1  ;;  %6604 = vmatprep.subr.bf16.mxu0 %v7066_v30 }
 0x160   :  { %6541 = vmatpush3.bf16.msra.mxu1 %v7064_v35 }
 0x161   :  { %v7567_v27 = vpop.f32.mrf.mxu0  ;;  %v7569_v29 = vpop.f32.mrf.mxu1  ;;  %6654 = vmatprep.subr.bf16.mxu1 %v7074_v14 }
 0x162   :  { %6605 = vmatpush3.bf16.msra.mxu0 %v7067_v39 }
 0x163   :  { %v7571_v33 = vpop.f32.mrf.mxu0  ;;  %v7573_v3 = vpop.f32.mrf.mxu1 }
 0x165   :  { %v7575_v8 = vpop.f32.mrf.mxu0  ;;  %v7577_v38 = vpop.f32.mrf.mxu1 }
 0x167   :  { %v7579_v41 = vpop.f32.mrf.mxu0  ;;  %v7581_v45 = vpop.f32.mrf.mxu1 }
 0x169   :  { %v7583_v46 = vpop.f32.mrf.mxu0  ;;  %v7585_v53 = vpop.f32.mrf.mxu1 }
 0x16b   :  { %v7587_v59 = vpop.f32.mrf.mxu0  ;;  %v7589_v63 = vpop.f32.mrf.mxu1 }
 0x16d   :  { %v7591_v7 = vpop.f32.mrf.mxu0  ;;  %v7593_v15 = vpop.f32.mrf.mxu1 }
 0x16f   :  { %v6419_v24 = vpop.f32.mrf.mxu0  ;;  %v7595_v31 = vpop.f32.mrf.mxu1 }
 0x171   :  { %v6420_v34 = vpop.f32.mrf.mxu0  ;;  %v7597_v40 = vpop.f32.mrf.mxu1 }
 0x173   :  { %v6422_v9 = vpop.f32.mrf.mxu0  ;;  %v7599_v44 = vpop.f32.mrf.mxu1 }
 0x175   :  { %v6423_v55 = vpop.f32.mrf.mxu0  ;;  %v7601_v56 = vpop.f32.mrf.mxu1 }
 0x177   :  { %v7603_v60 = vpop.f32.mrf.mxu0  ;;  %v7605_v62 = vpop.f32.mrf.mxu1 }
 0x178   :  { %8282 = vst [vmem:[#allocation21_spill] sm:$0xff] %v7605_v62 }
 0x179   :  { %v7607_v10 = vpop.f32.mrf.mxu0  ;;  %v7609_v21 = vpop.f32.mrf.mxu1 }
 0x17a   :  { %8283 = vst [vmem:[#allocation22_spill] sm:$0xff] %v7609_v21 }
 0x17b   :  { %v7611_v23 = vpop.f32.mrf.mxu0  ;;  %v7615_v30 = vpop.f32.mrf.mxu1 }
 0x17c   :  { %8284 = vst [vmem:[#allocation23_spill] sm:$0xff] %v7615_v30 }
 0x17d   :  { %v7613_v19 = vpop.f32.mrf.mxu0  ;;  %v7621_v5 = vpop.f32.mrf.mxu1 }
 0x17e   :  { %8285 = vst [vmem:[#allocation24_spill] sm:$0xff] %v7621_v5  ;;  %v6403_v5 = vadd.f32 %v7551_v4, %v7544_v61  ;;  %v6467_v61 = vadd.f32 %v7553_v6, %v7549_v2 }
 0x17f   :  { %v7617_v35 = vpop.f32.mrf.mxu0  ;;  %v7627_v36 = vpop.f32.mrf.mxu1 }
 0x180   :  { %8286 = vst [vmem:[#allocation25_spill] sm:$0xff] %v7627_v36  ;;  %v6406_v36 = vadd.f32 %v7559_v11, %v7555_v13  ;;  %v6470_v13 = vadd.f32 %v7561_v17, %v7557_v16 }
 0x181   :  { %v7619_v39 = vpop.f32.mrf.mxu0  ;;  %v7633_v14 = vpop.f32.mrf.mxu1 }
 0x182   :  { %8289 = vst [vmem:[#allocation28_spill] sm:$0xff] %v7633_v14  ;;  %v2335_v4 = vadd.f32 %v6406_v36, %v7506_v25  ;;  %v6418_v36 = vadd.f32 %v7591_v7, %v7587_v59  ;;  %v6485_v7 = vadd.f32 %v7597_v40, %v7595_v31 }
 0x183   :  { %v7623_v49 = vpop.f32.mrf.mxu0  ;;  %v7639_v62 = vpop.f32.mrf.mxu1 }
 0x184   :  { %8292 = vst [vmem:[#allocation31_spill] sm:$0xff] %v7639_v62  ;;  %v2330_v62 = vadd.f32 %v6403_v5, %v7504_v18  ;;  %v6415_v5 = vadd.f32 %v7583_v46, %v7579_v41  ;;  %v2432_v2 = vadd.f32 %v6470_v13, %v2335_v4  ;;  %v2351_v41 = vadd.f32 %v6418_v36, %v7514_v50  ;;  %v8297_v36 = vld [vmem:[#allocation16_spill] sm:$0xff] }
 0x185   :  { %v7625_v42 = vpop.f32.mrf.mxu0  ;;  %v6482_v46 = vadd.f32 %v7593_v15, %v7589_v63  ;;  %v6317_v63 = vadd.f32 %v7536_v51, %v7530_v47  ;;  %v6427_v47 = vadd.f32 %v7607_v10, %v7603_v60  ;;  %v6433_v4 = vadd.f32 %v7619_v39, %v7617_v35  ;;  %v8296_v35 = vld [vmem:[#allocation22_spill] sm:$0xff] }
 0x186   :  { %v6436_v13 = vadd.f32 %v7625_v42, %v7623_v49  ;;  %v8298_v49 = vld [vmem:[#allocation23_spill] sm:$0xff] }
 0x187   :  { %v7629_v28 = vpop.f32.mrf.mxu0 }
 0x188   :  { %8287 = vst [vmem:[#allocation26_spill] sm:$0xff] %v7629_v28  ;;  %v6409_v28 = vadd.f32 %v7567_v27, %v7563_v22  ;;  %v6473_v22 = vadd.f32 %v7569_v29, %v7565_v26  ;;  %v7103_v29 = vld [vmem:[#allocation9 + $0x1f8] sm:$0xff]  }
 0x189   :  { %v7631_v20 = vpop.f32.mrf.mxu0  ;;  %6718 = vmatprep.subr.bf16.mxu0 %v7103_v29 }
 0x18a   :  { %8288 = vst [vmem:[#allocation27_spill] sm:$0xff] %v7631_v20  ;;  %v6412_v20 = vadd.f32 %v7575_v8, %v7571_v33  ;;  %v2338_v11 = vadd.f32 %v6409_v28, %v7508_v32  ;;  %v6421_v32 = vadd.f32 %v6420_v34, %v6419_v24  ;;  %v2346_v33 = vadd.f32 %v6415_v5, %v7512_v43 }
 0x18b   :  { %v7635_v21 = vpop.f32.mrf.mxu0  ;;  %v6488_v24 = vadd.f32 %v7601_v56, %v7599_v44 }
 0x18c   :  { %8290 = vst [vmem:[#allocation29_spill] sm:$0xff] %v7635_v21  ;;  %v7655_v21 = vpop.f32.mrf.mxu1  ;;  %v2435_v16 = vadd.f32 %v6473_v22, %v2338_v11  ;;  %v2354_v59 = vadd.f32 %v6421_v32, %v7516_v57  ;;  %v6381_v57 = vadd.f32 %v7538_v52, %v7532_v48  ;;  %v2448_v48 = vadd.f32 %v6482_v46, %v2351_v41  ;;  %v8299_v32 = vld [vmem:[#allocation24_spill] sm:$0xff]  ;;  %v8303_v46 = vld [vmem:[#allocation18_spill] sm:$0xff] }
 0x18d   :  { %v7637_v30 = vpop.f32.mrf.mxu0 }
 0x18e   :  { %8291 = vst [vmem:[#allocation30_spill] sm:$0xff] %v7637_v30  ;;  %v6464_v30 = vadd.f32 %v7542_v58, %v7540_v54  ;;  %v2343_v54 = vadd.f32 %v6412_v20, %v7510_v37  ;;  %v6476_v58 = vadd.f32 %v7577_v38, %v7573_v3  ;;  %v7671_v18 = vpop.f32.mrf.mxu1  ;;  %v2427_v37 = vadd.f32 %v6467_v61, %v2330_v62 }
 0x18f   :  { %v7641_v12 = vpop.f32.mrf.mxu0  ;;  %v6424_v20 = vadd.f32 %v6423_v55, %v6422_v9  ;;  %v6479_v3 = vadd.f32 %v7585_v53, %v7581_v45  ;;  %v2451_v61 = vadd.f32 %v6485_v7, %v2354_v59  ;;  %v2375_v59 = vadd.f32 %v6436_v13, %v8303_v46  ;;  %v8304_v7 = vld [vmem:[#allocation31_spill] sm:$0xff] }
 0x190   :  { %8293 = vst [vmem:[#allocation32_spill] sm:$0xff] %v7641_v12  ;;  %v2424_v25 = vadd.f32 %v6464_v30, %v7547_v1  ;;  %v2440_v26 = vadd.f32 %v6476_v58, %v2343_v54  ;;  %v7681_v1 = vpop.f32.mrf.mxu1 }
 0x191   :  { %v7651_v14 = vpop.f32.mrf.mxu0  ;;  %v2359_v15 = vadd.f32 %v6424_v20, %v7518_v0  ;;  %v6430_v0 = vadd.f32 %v7613_v19, %v7611_v23  ;;  %v2443_v52 = vadd.f32 %v6479_v3, %v2346_v33  ;;  %v8301_v33 = vld [vmem:[#allocation25_spill] sm:$0xff]  ;;  %v8302_v3 = vld [vmem:[#allocation28_spill] sm:$0xff] }
 0x192   :  { %v7708_v34 = vpop.f32.mrf.mxu1  ;;  %v6497_v41 = vadd.f32 %v8302_v3, %v8301_v33 }
 0x193   :  { %v6816_v12 = vpop.f32.mrf.mxu0  ;;  %v2456_v23 = vadd.f32 %v6488_v24, %v2359_v15  ;;  %v2367_v42 = vadd.f32 %v6430_v0, %v8297_v36  ;;  %v8307_v0 = vld [vmem:[#allocation29_spill] sm:$0xff] }
 0x194   :  { %v7683_v8 = vadd.f32 %v6816_v12, %v2432_v2  ;;  %v6505_v19 = vpop.f32.mrf.mxu1 }
 0x195   :  { %v2520_v27 = vpop.f32.mrf.mxu0 }
 0x196   :  { %v7676_v6 = vadd.f32 %v2520_v27, %v2424_v25  ;;  %v2606_v40 = vmul.f32 %v7683_v8, %v7683_v8  ;;  %v8294_v27 = vld [vmem:[#allocation15_spill] sm:$0xff]  ;;  %v8295_v25 = vld [vmem:[#allocation21_spill] sm:$0xff] }
 0x197   :  { %v6817_v28 = vpop.f32.mrf.mxu0  ;;  %v2362_v5 = vadd.f32 %v6427_v47, %v8294_v27  ;;  %v6491_v39 = vadd.f32 %v8296_v35, %v8295_v25  ;;  %v8310_v35 = vld [vmem:[#allocation19_spill] sm:$0xff] }
 0x198   :  { %v2604_v45 = vmul.f32 %v7676_v6, %v7676_v6  ;;  %v7695_v53 = vadd.f32 %v6817_v28, %v2435_v16  ;;  %v6494_v28 = vadd.f32 %v8299_v32, %v8298_v49 }
 0x199   :  { %v2523_v17 = vpop.f32.mrf.mxu0 }
 0x19a   :  { %v7685_v38 = vadd.f32 %v2523_v17, %v2427_v37  ;;  %v2607_v44 = vmul.f32 %v7695_v53, %v7695_v53 }
 0x19b   :  { %v6820_v43 = vpop.f32.mrf.mxu0 }
 0x19c   :  { %v2583_v12 = vadd.f32 %v7685_v38, %v7676_v6  ;;  %v2605_v50 = vmul.f32 %v7685_v38, %v7685_v38  ;;  %v7726_v60 = vadd.f32 %v6820_v43, %v2448_v48  ;;  %v6500_v43 = vadd.f32 %v7655_v21, %v8304_v7  ;;  %v8308_v48 = vld [vmem:[#allocation30_spill] sm:$0xff] }
 0x19d   :  { %v2536_v31 = vpop.f32.mrf.mxu0 }
 0x19e   :  { %v2584_v9 = vadd.f32 %v2583_v12, %v7683_v8  ;;  %v2620_v55 = vadd.f32 %v2605_v50, %v2604_v45  ;;  %v7713_v62 = vadd.f32 %v2536_v31, %v2440_v26  ;;  %v8300_v26 = vld [vmem:[#allocation17_spill] sm:$0xff]  ;;  %v6507_v12 = vpop.f32.mrf.mxu1  ;;  %v2610_v50 = vmul.f32 %v7726_v60, %v7726_v60 }
 0x19f   :  { %v6821_v51 = vpop.f32.mrf.mxu0  ;;  %v2370_v29 = vadd.f32 %v6433_v4, %v8300_v26  ;;  %v8309_v4 = vld [vmem:[#allocation32_spill] sm:$0xff] }
 0x1a0   :  { %v2621_v56 = vadd.f32 %v2620_v55, %v2606_v40  ;;  %v2585_v30 = vadd.f32 %v2584_v9, %v7695_v53  ;;  %v2608_v22 = vmul.f32 %v7713_v62, %v7713_v62  ;;  %v7739_v20 = vadd.f32 %v6821_v51, %v2451_v61  ;;  %v8305_v9 = vld [vmem:[#allocation26_spill] sm:$0xff]  ;;  %v8306_v55 = vld [vmem:[#allocation27_spill] sm:$0xff] }
 0x1a1   :  { %v2539_v10 = vpop.f32.mrf.mxu0  ;;  %v2289_v40 = vadd.f32 %v6381_v57, %v6317_v63  ;;  %v6439_v47 = vadd.f32 %v8306_v55, %v8305_v9  ;;  %v6442_v51 = vadd.f32 %v8308_v48, %v8307_v0  ;;  %v2459_v61 = vadd.f32 %v6491_v39, %v2362_v5 }
 0x1a2   :  { %v2586_v11 = vadd.f32 %v2585_v30, %v7713_v62  ;;  %v2622_v54 = vadd.f32 %v2621_v56, %v2607_v44  ;;  %v7731_v58 = vadd.f32 %v2539_v10, %v2443_v52  ;;  %v2464_v52 = vadd.f32 %v6494_v28, %v2367_v42 }
 0x1a3   :  { %v6824_v2 = vpop.f32.mrf.mxu0  ;;  %v2611_v21 = vmul.f32 %v7739_v20, %v7739_v20  ;;  %v6445_v13 = vadd.f32 %v7651_v14, %v8309_v4  ;;  %v2467_v63 = vadd.f32 %v6497_v41, %v2370_v29  ;;  %v2378_v36 = vadd.f32 %v6439_v47, %v8310_v35  ;;  %v8311_v14 = vld [vmem:[#allocation20_spill] sm:$0xff] }
 0x1a4   :  { %v2623_v37 = vadd.f32 %v2622_v54, %v2608_v22  ;;  %v2587_v16 = vadd.f32 %v2586_v11, %v7731_v58  ;;  %v2609_v17 = vmul.f32 %v7731_v58, %v7731_v58  ;;  %v7764_v10 = vadd.f32 %v6824_v2, %v2464_v52  ;;  %v6508_v11 = vpop.f32.mrf.mxu1 }
 0x1a5   :  { %v2552_v45 = vpop.f32.mrf.mxu0  ;;  %v6503_v5 = vadd.f32 %v7681_v1, %v7671_v18  ;;  %v2383_v39 = vadd.f32 %v6442_v51, %v8311_v14  ;;  %v6506_v42 = vadd.f32 %v6505_v19, %v7708_v34 }
 0x1a6   :  { %v2588_v15 = vadd.f32 %v2587_v16, %v7726_v60  ;;  %v2624_v24 = vadd.f32 %v2623_v37, %v2609_v17  ;;  %v7753_v31 = vadd.f32 %v2552_v45, %v2456_v23  ;;  %v2472_v23 = vadd.f32 %v6500_v43, %v2375_v59 }
 0x1a7   :  { %v6825_v44 = vpop.f32.mrf.mxu0  ;;  %v2386_v16 = vadd.f32 %v6445_v13, %v2289_v40  ;;  %v6509_v17 = vadd.f32 %v6508_v11, %v6507_v12  ;;  %v2614_v29 = vmul.f32 %v7764_v10, %v7764_v10  ;;  %v2480_v34 = vadd.f32 %v6506_v42, %v2383_v39 }
 0x1a8   :  { %v2625_v56 = vadd.f32 %v2624_v24, %v2610_v50  ;;  %v2589_v30 = vadd.f32 %v2588_v15, %v7739_v20  ;;  %v2612_v54 = vmul.f32 %v7753_v31, %v7753_v31  ;;  %v7776_v28 = vadd.f32 %v6825_v44, %v2467_v63 }
 0x1a9   :  { %v2555_v57 = vpop.f32.mrf.mxu0  ;;  %v2475_v59 = vadd.f32 %v6503_v5, %v2378_v36  ;;  %v2483_v43 = vadd.f32 %v6509_v17, %v2386_v16  ;;  %v1073_v17 = vld [vmem:[%s8266_s3] sm:$0x1] }
 0x1aa   :  { %v2590_v22 = vadd.f32 %v2589_v30, %v7753_v31  ;;  %v2626_v27 = vadd.f32 %v2625_v56, %v2611_v21  ;;  %v7769_v25 = vadd.f32 %v2555_v57, %v2459_v61  ;;  %v2615_v3 = vmul.f32 %v7776_v28, %v7776_v28 }
 0x1ab   :  { %v6828_v49 = vpop.f32.mrf.mxu0 }
 0x1ac   :  { %v2627_v32 = vadd.f32 %v2626_v27, %v2612_v54  ;;  %v2591_v2 = vadd.f32 %v2590_v22, %v7769_v25  ;;  %v2613_v37 = vmul.f32 %v7769_v25, %v7769_v25  ;;  %v7789_v7 = vadd.f32 %v6828_v49, %v2480_v34  ;;  %v1072_v49 = vld [vmem:[%s8265_s2] sm:$0x1] }
 0x1ad   :  { %v2568_v26 = vpop.f32.mrf.mxu0 }
 0x1ae   :  { %v2592_v18 = vadd.f32 %v2591_v2, %v7764_v10  ;;  %v2628_v1 = vadd.f32 %v2627_v32, %v2613_v37  ;;  %v7784_v33 = vadd.f32 %v2568_v26, %v2472_v23  ;;  %v2618_v0 = vmul.f32 %v7789_v7, %v7789_v7  ;;  %v8312_v32 = vld [vmem:[#allocation14_spill] sm:$0xff] }
 0x1af   :  { %v6829_v19 = vpop.f32.mrf.mxu0  ;;  %v7806_v2 = vsub.s32 0, %v8312_v32 }
 0x1b0   :  { %v2629_v41 = vadd.f32 %v2628_v1, %v2614_v29  ;;  %v2593_v46 = vadd.f32 %v2592_v18, %v7776_v28  ;;  %v2616_v50 = vmul.f32 %v7784_v33, %v7784_v33  ;;  %v7794_v9 = vadd.f32 %v6829_v19, %v2483_v43 }
 0x1b1   :  { %v2571_v45 = vpop.f32.mrf.mxu0  ;;  %8313 = vst [vmem:[#allocation15_spill] sm:$0xff] %v7806_v2 }
 0x1b2   :  { %v2594_v12 = vadd.f32 %v2593_v46, %v7784_v33  ;;  %v2630_v15 = vadd.f32 %v2629_v41, %v2615_v3  ;;  %v2572_v24 = vadd.f32 %v2571_v45, %v2475_v59  ;;  %v2619_v52 = vmul.f32 %v7794_v9, %v7794_v9 }
 0x1b4   :  { %v2631_v40 = vadd.f32 %v2630_v15, %v2616_v50  ;;  %v2595_v55 = vadd.f32 %v2594_v12, %v2572_v24  ;;  %v2617_v47 = vmul.f32 %v2572_v24, %v2572_v24 }
 0x1b6   :  { %v2596_v48 = vadd.f32 %v2595_v55, %v7789_v7  ;;  %v2632_v51 = vadd.f32 %v2631_v40, %v2617_v47 }
 0x1b8   :  { %v2597_v44 = vadd.f32 %v2596_v48, %v7794_v9  ;;  %v2633_v21 = vadd.f32 %v2632_v51, %v2618_v0 }
 0x1ba   :  { %v2598_v56 = vrot.slane %v2597_v44, 4  ;;  %v2634_v30 = vadd.f32 %v2633_v21, %v2619_v52 }
 0x1bc   :  { %v2599_v61 = vadd.f32 %v2598_v56, %v2597_v44  ;;  %v2635_v4 = vrot.slane %v2634_v30, 4 }
 0x1be   :  { %v2600_v13 = vrot.slane %v2599_v61, 2  ;;  %v2636_v63 = vadd.f32 %v2635_v4, %v2634_v30 }
 0x1c0   :  { %v2601_v57 = vadd.f32 %v2600_v13, %v2599_v61  ;;  %v2637_v23 = vrot.slane %v2636_v63, 2 }
 0x1c2   :  { %v2602_v11 = vrot.slane %v2601_v57, 1  ;;  %v2638_v22 = vadd.f32 %v2637_v23, %v2636_v63 }
 0x1c4   :  { %v2603_v54 = vadd.f32 %v2602_v11, %v2601_v57  ;;  %v2639_v27 = vrot.slane %v2638_v22, 1 }
 0x1c6   :  { %v2640_v35 = vadd.f32 %v2639_v27, %v2638_v22  ;;  %v2641_v36 = vmul.f32 0.0078125, %v2603_v54 }
 0x1c8   :  { %v2642_v5 = vmul.f32 0.0078125, %v2640_v35  ;;  %v2643_v14 = vmul.f32 %v2641_v36, %v2641_v36 }
 0x1ca   :  { %v2644_v39 = vsub.f32 %v2642_v5, %v2643_v14 }
 0x1cc   :  { %v2645_v42 = vadd.f32 1e-05, %v2644_v39 }
 0x1ce   :  { %7205 = vrsqrt.f32 %v2645_v42 }
 0x1db   :  { %v7206_v37 = vpop.eup %7205 }
 0x1dc   :  { %v2647_v16 = vmul.f32 %v7206_v37, %v1072_v49 }
 0x1de   :  { %v2648_v26 = vmul.f32 %v2647_v16, %v2641_v36  ;;  %v7812_v29 = vrot.slane %v2647_v16, %v7806_v2 }
 0x1e0   :  { %v2649_v18 = vsub.f32 %v1073_v17, %v2648_v26  ;;  %v2669_v1 = vmul.f32 %v7812_v29, %v2572_v24  ;;  %v2656_v34 = vmul.f32 %v7812_v29, %v7676_v6  ;;  %v2657_v19 = vmul.f32 %v7812_v29, %v7685_v38 }
 0x1e1   :  { %v2658_v3 = vmul.f32 %v7812_v29, %v7683_v8  ;;  %v2659_v41 = vmul.f32 %v7812_v29, %v7695_v53  ;;  %v2660_v46 = vmul.f32 %v7812_v29, %v7713_v62  ;;  %v2661_v59 = vmul.f32 %v7812_v29, %v7731_v58 }
 0x1e2   :  { %v7828_v43 = vrot.slane %v2649_v18, %v7806_v2  ;;  %v2662_v6 = vmul.f32 %v7812_v29, %v7726_v60  ;;  %v7834_v38 = vmul.f32 %v7812_v29, %v7739_v20  ;;  %v7838_v8 = vmul.f32 %v7812_v29, %v7753_v31 }
 0x1e3   :  { %v7842_v53 = vmul.f32 %v7812_v29, %v7769_v25  ;;  %v7846_v62 = vmul.f32 %v7812_v29, %v7764_v10  ;;  %v7850_v58 = vmul.f32 %v7812_v29, %v7776_v28  ;;  %v7854_v60 = vmul.f32 %v7812_v29, %v7784_v33 }
 0x1e4   :  { %v2691_v20 = vadd.f32 %v7828_v43, %v2669_v1  ;;  %v2678_v31 = vadd.f32 %v7828_v43, %v2656_v34  ;;  %v2679_v45 = vadd.f32 %v7828_v43, %v2657_v19  ;;  %v2680_v25 = vadd.f32 %v7828_v43, %v2658_v3 }
 0x1e5   :  { %v2681_v12 = vadd.f32 %v7828_v43, %v2659_v41  ;;  %v2682_v10 = vadd.f32 %v7828_v43, %v2660_v46  ;;  %v2683_v50 = vadd.f32 %v7828_v43, %v2661_v59  ;;  %v2684_v28 = vadd.f32 %v7828_v43, %v2662_v6 }
 0x1e6   :  { %v2707_v15 = vmax.f32 %v2691_v20, 0.0  ;;  %v2694_v24 = vmax.f32 %v2678_v31, 0.0  ;;  %v7864_v33 = vmax.f32 %v2679_v45, 0.0  ;;  %v7866_v40 = vmax.f32 %v2680_v25, 0.0 }
 0x1e7   :  { %v7868_v55 = vmax.f32 %v2681_v12, 0.0  ;;  %v7870_v47 = vmax.f32 %v2682_v10, 0.0  ;;  %v7872_v0 = vmax.f32 %v2683_v50, 0.0  ;;  %v7874_v48 = vmax.f32 %v2684_v28, 0.0 }
 0x1e8   :  { %v2756_v51 = vrot.slane %v2707_v15, 7  ;;  %v6140_v52 = vpack.c.bf16 %v2707_v15, %v2707_v15  ;;  %v2948_v44 = vrot.slane %v2707_v15, 1  ;;  %v2743_v21 = vrot.slane %v2694_v24, 7  ;;  %v7079_v15 = vld [vmem:[#allocation9 + $0x138] sm:$0xff]  }
 0x1e9   :  { %v6127_v56 = vpack.c.bf16 %v2694_v24, %v2694_v24  ;;  %v2744_v30 = vrot.slane %v7864_v33, 7  ;;  %v2935_v61 = vrot.slane %v2694_v24, 1  ;;  %v2745_v4 = vrot.slane %v7866_v40, 7 }
 0x1ea   :  { %v2772_v13 = vsel %vm71_vm0, %v2756_v51, 0.0  ;;  %2932 = vst [vmem:[#allocation3 + $0x1fc] sm:$0xf] %v6140_v52  ;;  %v2964_v63 = vsel %vm72_vm1, %v2948_v44, 0.0  ;;  %3251 = vst [vmem:[#allocation3 + $0x1e4] sm:$0xf] %v6140_v52  ;;  %v6128_v23 = vpack.c.bf16 %v7864_v33, %v7864_v33  ;;  %v6129_v14 = vpack.c.bf16 %v7866_v40, %v7866_v40 }
 0x1eb   :  { %3570 = vst [vmem:[#allocation3 + $0x1cc] sm:$0xf] %v6140_v52  ;;  %v2759_v57 = vsel %vm71_vm0, %v2743_v21, 0.0  ;;  %v6124_v11 = vpack.c.bf16 %v2772_v13, %v2772_v13  ;;  %v6156_v22 = vpack.c.bf16 %v2964_v63, %v2964_v63  ;;  %2919 = vst [vmem:[#allocation3 + $0x28] sm:$0xf] %v6127_v56  ;;  %v2760_v27 = vsel %vm71_vm0, %v2744_v30, 0.0 }
 0x1ec   :  { %v6111_v54 = vpack.c.bf16 %v2759_v57, %v2759_v57  ;;  %3238 = vst [vmem:[#allocation3 + $0x10] sm:$0xf] %v6127_v56  ;;  %v6112_v35 = vpack.c.bf16 %v2760_v27, %v2760_v27  ;;  %v2951_v36 = vsel %vm72_vm1, %v2935_v61, 0.0  ;;  %v2761_v5 = vsel %vm71_vm0, %v2745_v4, 0.0  ;;  %2920 = vst [vmem:[#allocation3 + $0x4c] sm:$0xf] %v6128_v23 }
 0x1ed   :  { %3239 = vst [vmem:[#allocation3 + $0x34] sm:$0xf] %v6128_v23  ;;  %3558 = vst [vmem:[#allocation3 + $0x1c] sm:$0xf] %v6128_v23  ;;  %v6143_v39 = vpack.c.bf16 %v2951_v36, %v2951_v36  ;;  %v6113_v42 = vpack.c.bf16 %v2761_v5, %v2761_v5  ;;  %v2746_v49 = vrot.slane %v7868_v55, 7  ;;  %v2936_v37 = vrot.slane %v7864_v33, 1 }
 0x1ee   :  { %2852 = vst [vmem:[#allocation3 + $0x1f8] sm:$0xf] %v6124_v11  ;;  %3044 = vst [vmem:[#allocation3 + $0x200] sm:$0xf] %v6156_v22  ;;  %v2937_v16 = vrot.slane %v7866_v40, 1  ;;  %v2747_v17 = vrot.slane %v7870_v47, 7  ;;  %v6130_v26 = vpack.c.bf16 %v7868_v55, %v7868_v55  ;;  %v6131_v18 = vpack.c.bf16 %v7870_v47, %v7870_v47 }
 0x1ef   :  { %3171 = vst [vmem:[#allocation3 + $0x1e0] sm:$0xf] %v6124_v11  ;;  %3363 = vst [vmem:[#allocation3 + $0x1e8] sm:$0xf] %v6156_v22  ;;  %v2762_v1 = vsel %vm71_vm0, %v2746_v49, 0.0  ;;  %v2952_v34 = vsel %vm72_vm1, %v2936_v37, 0.0  ;;  %v6132_v28 = vpack.c.bf16 %v7872_v0, %v7872_v0  ;;  %v6133_v40 = vpack.c.bf16 %v7874_v48, %v7874_v48 }
 0x1f0   :  { %3490 = vst [vmem:[#allocation3 + $0x1c8] sm:$0xf] %v6124_v11  ;;  %3682 = vst [vmem:[#allocation3 + $0x1d0] sm:$0xf] %v6156_v22  ;;  %v2748_v19 = vrot.slane %v7872_v0, 7  ;;  %v2938_v3 = vrot.slane %v7868_v55, 1  ;;  %v6114_v41 = vpack.c.bf16 %v2762_v1, %v2762_v1  ;;  %v6144_v59 = vpack.c.bf16 %v2952_v34, %v2952_v34 }
 0x1f1   :  { %2839 = vst [vmem:[#allocation3 + $0x24] sm:$0xf] %v6111_v54  ;;  %3158 = vst [vmem:[#allocation3 + $0xc] sm:$0xf] %v6111_v54  ;;  %v2953_v46 = vsel %vm72_vm1, %v2937_v16, 0.0  ;;  %v2763_v6 = vsel %vm71_vm0, %v2747_v17, 0.0  ;;  %v2685_v55 = vadd.f32 %v7828_v43, %v7834_v38  ;;  %v2686_v21 = vadd.f32 %v7828_v43, %v7838_v8 }
 0x1f2   :  { %3159 = vst [vmem:[#allocation3 + $0x30] sm:$0xf] %v6112_v35  ;;  %2840 = vst [vmem:[#allocation3 + $0x48] sm:$0xf] %v6112_v35  ;;  %v6145_v20 = vpack.c.bf16 %v2953_v46, %v2953_v46  ;;  %v6115_v31 = vpack.c.bf16 %v2763_v6, %v2763_v6  ;;  %v2764_v45 = vsel %vm71_vm0, %v2748_v19, 0.0  ;;  %v2939_v25 = vrot.slane %v7870_v47, 1 }
 0x1f3   :  { %3478 = vst [vmem:[#allocation3 + $0x18] sm:$0xf] %v6112_v35  ;;  %2921 = vst [vmem:[#allocation3 + $0x70] sm:$0xf] %v6129_v14  ;;  %v6116_v12 = vpack.c.bf16 %v2764_v45, %v2764_v45  ;;  %v2954_v10 = vsel %vm72_vm1, %v2938_v3, 0.0  ;;  %v2749_v50 = vrot.slane %v7874_v48, 7  ;;  %v2687_v56 = vadd.f32 %v7828_v43, %v7842_v53 }
 0x1f4   :  { %3240 = vst [vmem:[#allocation3 + $0x58] sm:$0xf] %v6129_v14  ;;  %3559 = vst [vmem:[#allocation3 + $0x40] sm:$0xf] %v6129_v14  ;;  %v2955_v24 = vsel %vm72_vm1, %v2939_v25, 0.0  ;;  %v6146_v33 = vpack.c.bf16 %v2954_v10, %v2954_v10  ;;  %v7081_v30 = vld [vmem:[#allocation9 + $0x170] sm:$0xff]   ;;  %v2688_v11 = vadd.f32 %v7828_v43, %v7846_v62  ;;  %v2689_v22 = vadd.f32 %v7828_v43, %v7850_v58 }
 0x1f5   :  { %3031 = vst [vmem:[#allocation3 + $0x2c] sm:$0xf] %v6143_v39  ;;  %3350 = vst [vmem:[#allocation3 + $0x14] sm:$0xf] %v6143_v39  ;;  %v7070_v51 = vld [vmem:[#allocation3 + $0x4] ss:$36 sps:$4 sm:$0xff]   ;;  %v6147_v52 = vpack.c.bf16 %v2955_v24, %v2955_v24  ;;  %v2670_v39 = vmul.f32 %v7812_v29, %v7789_v7  ;;  %v2671_v19 = vmul.f32 %v7812_v29, %v7794_v9 }
 0x1f6   :  { %2841 = vst [vmem:[#allocation3 + $0x6c] sm:$0xf] %v6113_v42  ;;  %3160 = vst [vmem:[#allocation3 + $0x54] sm:$0xf] %v6113_v42  ;;  %v2765_v44 = vsel %vm71_vm0, %v2749_v50, 0.0  ;;  %v7932_v61 = vmax.f32 %v2685_v55, 0.0  ;;  %4744 = vmatprep.mubr.bf16.mxu1 %v7070_v51 }
 0x1f7   :  { %3479 = vst [vmem:[#allocation3 + $0x3c] sm:$0xf] %v6113_v42  ;;  %2922 = vst [vmem:[#allocation3 + $0x94] sm:$0xf] %v6130_v26  ;;  %v6117_v38 = vpack.c.bf16 %v2765_v44, %v2765_v44  ;;  %v2940_v4 = vrot.slane %v7872_v0, 1  ;;  %v2941_v13 = vrot.slane %v7874_v48, 1  ;;  %v7942_v0 = vadd.f32 %v7828_v43, %v7854_v60 }
 0x1f8   :  { %2923 = vst [vmem:[#allocation3 + $0xb8] sm:$0xf] %v6131_v18  ;;  %3241 = vst [vmem:[#allocation3 + $0x7c] sm:$0xf] %v6130_v26  ;;  %v7068_v47 = vld [vmem:[#allocation3] ss:$36 sps:$4 sm:$0xff]   ;;  %v7958_v34 = vadd.f32 %v7828_v43, %v2670_v39  ;;  %v7972_v50 = vadd.f32 %v7828_v43, %v2671_v19 }
 0x1f9   :  { %3242 = vst [vmem:[#allocation3 + $0xa0] sm:$0xf] %v6131_v18  ;;  %3560 = vst [vmem:[#allocation3 + $0x64] sm:$0xf] %v6130_v26  ;;  %v7109_v63 = vld [vmem:[#allocation9 + $0x1b8] sm:$0xff]   ;;  %v7086_v53 = vld [vmem:[#allocation9 + $0x130] sm:$0xff]   ;;  %4745 = vmatmul.mubr.bf16.vlgmr.msra.gmra.mxu1 %v7068_v47 }
 0x1fa   :  { %3561 = vst [vmem:[#allocation3 + $0x88] sm:$0xf] %v6131_v18  ;;  %3032 = vst [vmem:[#allocation3 + $0x50] sm:$0xf] %v6144_v59  ;;  %v7073_v57 = vld [vmem:[#allocation3 + $0xc] ss:$36 sps:$4 sm:$0xff]   ;;  %6655 = vmatpush3.bf16.msra.mxu1 %v7079_v15 }
 0x1fb   :  { %3161 = vst [vmem:[#allocation3 + $0x78] sm:$0xf] %v6114_v41  ;;  %2842 = vst [vmem:[#allocation3 + $0x90] sm:$0xf] %v6114_v41  ;;  %v2702_v23 = vmax.f32 %v2686_v21, 0.0  ;;  %v7088_v54 = vld [vmem:[#allocation9 + $0x168] sm:$0xff]   ;;  %4841 = vmatprep.mubr.bf16.mxu0 %v7073_v57  ;;  %6656 = vmatprep.subr.bf16.mxu1 %v7081_v30 }
 0x1fc   :  { %3351 = vst [vmem:[#allocation3 + $0x38] sm:$0xf] %v6144_v59  ;;  %3480 = vst [vmem:[#allocation3 + $0x60] sm:$0xf] %v6114_v41  ;;  %v7071_v8 = vld [vmem:[#allocation3 + $0x8] ss:$36 sps:$4 sm:$0xff]  }
 0x1fd   :  { %3670 = vst [vmem:[#allocation3 + $0x20] sm:$0xf] %v6144_v59  ;;  %3033 = vst [vmem:[#allocation3 + $0x74] sm:$0xf] %v6145_v20  ;;  %v7075_v48 = vld [vmem:[#allocation3 + $0x4c] ss:$36 sps:$4 sm:$0xff]   ;;  %4842 = vmatmul.mubr.bf16.vlgmr.msra.gmra.mxu0 %v7071_v8  ;;  %v6135_v37 = vpack.c.bf16 %v2702_v23, %v2702_v23 }
 0x1fe   :  { %3352 = vst [vmem:[#allocation3 + $0x5c] sm:$0xf] %v6145_v20  ;;  %3671 = vst [vmem:[#allocation3 + $0x44] sm:$0xf] %v6145_v20  ;;  %v2956_v27 = vsel %vm72_vm1, %v2940_v4, 0.0  ;;  %v2957_v35 = vsel %vm72_vm1, %v2941_v13, 0.0  ;;  %4752 = vmatprep.mubr.bf16.mxu1 %v7075_v48  ;;  %6719 = vmatpush3.bf16.msra.mxu0 %v7109_v63 }
 0x1ff   :  { %2843 = vst [vmem:[#allocation3 + $0xb4] sm:$0xf] %v6115_v31  ;;  %3162 = vst [vmem:[#allocation3 + $0x9c] sm:$0xf] %v6115_v31  ;;  %v3069_v62 = vrot.slane %v7932_v61, 7  ;;  %v7110_v36 = vld [vmem:[#allocation9 + $0x1f0] sm:$0xff]   ;;  %v6148_v58 = vpack.c.bf16 %v2956_v27, %v2956_v27  ;;  %v6149_v60 = vpack.c.bf16 %v2957_v35, %v2957_v35  ;;  %6657 = vmatpush3.bf16.msra.mxu1 %v7086_v53 }
 0x200   :  { %3481 = vst [vmem:[#allocation3 + $0x84] sm:$0xf] %v6115_v31  ;;  %3163 = vst [vmem:[#allocation3 + $0xc0] sm:$0xf] %v6116_v12  ;;  %v2751_v5 = vrot.slane %v2702_v23, 7  ;;  %v7111_v14 = vld [vmem:[#allocation9 + $0x1b0] sm:$0xff]   ;;  %6720 = vmatprep.subr.bf16.mxu0 %v7110_v36  ;;  %6658 = vmatprep.subr.bf16.mxu1 %v7088_v54 }
 0x201   :  { %2844 = vst [vmem:[#allocation3 + $0xd8] sm:$0xf] %v6116_v12  ;;  %3482 = vst [vmem:[#allocation3 + $0xa8] sm:$0xf] %v6116_v12  ;;  %v3698_v42 = vld [vmem:[#allocation3 + $0x48] sm:$0xff]  ;;  %v3085_v49 = vsel %vm71_vm0, %v3069_v62, 0.0 }
 0x202   :  { %2924 = vst [vmem:[#allocation3 + $0xdc] sm:$0xf] %v6132_v28  ;;  %3243 = vst [vmem:[#allocation3 + $0xc4] sm:$0xf] %v6132_v28  ;;  %v7953_v16 = vmax.f32 %v2687_v56, 0.0  ;;  %v2943_v17 = vrot.slane %v2702_v23, 1  ;;  %v6165_v1 = vpack.c.bf16 %v3085_v49, %v3085_v49  ;;  %6721 = vmatpush3.bf16.msra.mxu0 %v7111_v14 }
 0x203   :  { %3562 = vst [vmem:[#allocation3 + $0xac] sm:$0xf] %v6132_v28  ;;  %3034 = vst [vmem:[#allocation3 + $0x98] sm:$0xf] %v6146_v33  ;;  %v3703_v26 = vld [vmem:[#allocation3 + $0x6c] sm:$0xff]  ;;  %v2767_v7 = vsel %vm71_vm0, %v2751_v5, 0.0  ;;  %v6181_v28 = vpack.c.bf16 %v7932_v61, %v7932_v61 }
 0x204   :  { %3353 = vst [vmem:[#allocation3 + $0x80] sm:$0xf] %v6146_v33  ;;  %3672 = vst [vmem:[#allocation3 + $0x68] sm:$0xf] %v6146_v33  ;;  %v7077_v18 = vld [vmem:[#allocation3 + $0x54] ss:$36 sps:$4 sm:$0xff]   ;;  %v6119_v3 = vpack.c.bf16 %v2767_v7, %v2767_v7  ;;  %v6136_v59 = vpack.c.bf16 %v7953_v16, %v7953_v16  ;;  %v5831_v45 = vcombine.low %v3698_v42, %v3703_v26 }
 0x205   :  { %2925 = vst [vmem:[#allocation3 + $0x100] sm:$0xf] %v6133_v40  ;;  %3244 = vst [vmem:[#allocation3 + $0xe8] sm:$0xf] %v6133_v40  ;;  %v2752_v41 = vrot.slane %v7953_v16, 7  ;;  %v2959_v46 = vsel %vm72_vm1, %v2943_v17, 0.0  ;;  %4849 = vmatprep.mubr.bf16.mxu0 %v7077_v18 }
 0x206   :  { %3563 = vst [vmem:[#allocation3 + $0xd0] sm:$0xf] %v6133_v40  ;;  %3035 = vst [vmem:[#allocation3 + $0xbc] sm:$0xf] %v6147_v52  ;;  %v7114_v6 = vld [vmem:[#allocation9 + $0x1e8] sm:$0xff]   ;;  %v6151_v31 = vpack.c.bf16 %v2959_v46, %v2959_v46  ;;  %v2704_v9 = vmax.f32 %v2688_v11, 0.0  ;;  %4753 = vmatmul.mubr.bf16.gmra.mxu1 %v5831_v45 }
 0x207   :  { %3354 = vst [vmem:[#allocation3 + $0xa4] sm:$0xf] %v6147_v52  ;;  %3673 = vst [vmem:[#allocation3 + $0x8c] sm:$0xf] %v6147_v52  ;;  %v7093_v20 = vld [vmem:[#allocation9 + $0x128] sm:$0xff]   ;;  %v7967_v29 = vmax.f32 %v2689_v22, 0.0  ;;  %6722 = vmatprep.subr.bf16.mxu0 %v7114_v6 }
 0x208   :  { %2845 = vst [vmem:[#allocation3 + $0xfc] sm:$0xf] %v6117_v38  ;;  %3164 = vst [vmem:[#allocation3 + $0xe4] sm:$0xf] %v6117_v38  ;;  %v7095_v25 = vld [vmem:[#allocation9 + $0x160] sm:$0xff]   ;;  %v2768_v12 = vsel %vm71_vm0, %v2752_v41, 0.0  ;;  %v6137_v55 = vpack.c.bf16 %v2704_v9, %v2704_v9  ;;  %6659 = vmatpush3.bf16.msra.mxu1 %v7093_v20 }
 0x209   :  { %3483 = vst [vmem:[#allocation3 + $0xcc] sm:$0xf] %v6117_v38  ;;  %3036 = vst [vmem:[#allocation3 + $0xe0] sm:$0xf] %v6148_v58  ;;  %v7120_v10 = vld [vmem:[#allocation9 + $0x1a8] sm:$0xff]   ;;  %v6120_v24 = vpack.c.bf16 %v2768_v12, %v2768_v12  ;;  %v7100_v33 = vld [vmem:[#allocation9 + $0x120] sm:$0xff]   ;;  %v6138_v13 = vpack.c.bf16 %v7967_v29, %v7967_v29  ;;  %6660 = vmatprep.subr.bf16.mxu1 %v7095_v25 }
 0x20a   :  { %3037 = vst [vmem:[#allocation3 + $0x104] sm:$0xf] %v6149_v60  ;;  %3355 = vst [vmem:[#allocation3 + $0xc8] sm:$0xf] %v6148_v58  ;;  %v7082_v15 = vld [vmem:[#allocation3 + $0x94] ss:$36 sps:$4 sm:$0xff]   ;;  %6723 = vmatpush3.bf16.msra.mxu0 %v7120_v10 }
 0x20b   :  { %3356 = vst [vmem:[#allocation3 + $0xec] sm:$0xf] %v6149_v60  ;;  %3674 = vst [vmem:[#allocation3 + $0xb0] sm:$0xf] %v6148_v58  ;;  %v2753_v40 = vrot.slane %v2704_v9, 7  ;;  %v2754_v47 = vrot.slane %v7967_v29, 7  ;;  %4760 = vmatprep.mubr.bf16.mxu1 %v7082_v15 }
 0x20c   :  { %3675 = vst [vmem:[#allocation3 + $0xd4] sm:$0xf] %v6149_v60  ;;  %2927 = vst [vmem:[#allocation3 + $0x148] sm:$0xf] %v6135_v37  ;;  %v7121_v51 = vld [vmem:[#allocation9 + $0x1e0] sm:$0xff]   ;;  %v7102_v44 = vld [vmem:[#allocation9 + $0x158] sm:$0xff]   ;;  %6661 = vmatpush3.bf16.msra.mxu1 %v7100_v33 }
 0x20d   :  { %3246 = vst [vmem:[#allocation3 + $0x130] sm:$0xf] %v6135_v37  ;;  %3165 = vst [vmem:[#allocation3 + $0x108] sm:$0xf] %v6165_v1  ;;  %v7080_v52 = vld [vmem:[#allocation3 + $0x50] ss:$36 sps:$4 sm:$0xff]   ;;  %6724 = vmatprep.subr.bf16.mxu0 %v7121_v51  ;;  %6662 = vmatprep.subr.bf16.mxu1 %v7102_v44 }
 0x20e   :  { %3484 = vst [vmem:[#allocation3 + $0xf0] sm:$0xf] %v6165_v1  ;;  %2847 = vst [vmem:[#allocation3 + $0x144] sm:$0xf] %v6119_v3  ;;  %v2944_v43 = vrot.slane %v7953_v16, 1  ;;  %v2945_v21 = vrot.slane %v2704_v9, 1  ;;  %4850 = vmatmul.mubr.bf16.gmra.mxu0 %v7080_v52 }
 0x20f   :  { %3166 = vst [vmem:[#allocation3 + $0x12c] sm:$0xf] %v6119_v3  ;;  %2928 = vst [vmem:[#allocation3 + $0x16c] sm:$0xf] %v6136_v59  ;;  %v2706_v56 = vmax.f32 %v7942_v0, 0.0  ;;  %v2769_v38 = vsel %vm71_vm0, %v2753_v40, 0.0 }
 0x210   :  { %3247 = vst [vmem:[#allocation3 + $0x154] sm:$0xf] %v6136_v59  ;;  %3566 = vst [vmem:[#allocation3 + $0x13c] sm:$0xf] %v6136_v59  ;;  %v7084_v30 = vld [vmem:[#allocation3 + $0x9c] ss:$36 sps:$4 sm:$0xff]   ;;  %v6121_v8 = vpack.c.bf16 %v2769_v38, %v2769_v38 }
 0x211   :  { %3039 = vst [vmem:[#allocation3 + $0x14c] sm:$0xf] %v6151_v31  ;;  %3358 = vst [vmem:[#allocation3 + $0x134] sm:$0xf] %v6151_v31  ;;  %v2770_v4 = vsel %vm71_vm0, %v2754_v47, 0.0  ;;  %v2946_v63 = vrot.slane %v7967_v29, 1  ;;  %4857 = vmatprep.mubr.bf16.mxu0 %v7084_v30  ;;  %v6139_v35 = vpack.c.bf16 %v2706_v56, %v2706_v56 }
 0x212   :  { %3245 = vst [vmem:[#allocation3 + $0x10c] sm:$0xf] %v6181_v28  ;;  %3564 = vst [vmem:[#allocation3 + $0xf4] sm:$0xf] %v6181_v28  ;;  %v6122_v57 = vpack.c.bf16 %v2770_v4, %v2770_v4  ;;  %v2960_v53 = vsel %vm72_vm1, %v2944_v43, 0.0  ;;  %v2961_v23 = vsel %vm72_vm1, %v2945_v21, 0.0 }
 0x213   :  { %3167 = vst [vmem:[#allocation3 + $0x150] sm:$0xf] %v6120_v24  ;;  %2848 = vst [vmem:[#allocation3 + $0x168] sm:$0xf] %v6120_v24  ;;  %v7122_v11 = vld [vmem:[#allocation9 + $0x1a0] sm:$0xff]   ;;  %v3708_v22 = vld [vmem:[#allocation3 + $0x90] sm:$0xff]  ;;  %v6152_v48 = vpack.c.bf16 %v2960_v53, %v2960_v53  ;;  %v6153_v54 = vpack.c.bf16 %v2961_v23, %v2961_v23 }
 0x214   :  { %3486 = vst [vmem:[#allocation3 + $0x138] sm:$0xf] %v6120_v24  ;;  %2929 = vst [vmem:[#allocation3 + $0x190] sm:$0xf] %v6137_v55  ;;  %v3713_v0 = vld [vmem:[#allocation3 + $0xb4] sm:$0xff]  ;;  %v2755_v27 = vrot.slane %v2706_v56, 7  ;;  %6725 = vmatpush3.bf16.msra.mxu0 %v7122_v11 }
 0x215   :  { %3248 = vst [vmem:[#allocation3 + $0x178] sm:$0xf] %v6137_v55  ;;  %3567 = vst [vmem:[#allocation3 + $0x160] sm:$0xf] %v6137_v55  ;;  %v2947_v62 = vrot.slane %v2706_v56, 1  ;;  %v7125_v36 = vld [vmem:[#allocation9 + $0x1d8] sm:$0xff]   ;;  %v5840_v14 = vcombine.low %v3708_v22, %v3713_v0 }
 0x216   :  { %2930 = vst [vmem:[#allocation3 + $0x1b4] sm:$0xf] %v6138_v13  ;;  %3249 = vst [vmem:[#allocation3 + $0x19c] sm:$0xf] %v6138_v13  ;;  %v7108_v58 = vld [vmem:[#allocation9 + $0x118] sm:$0xff]   ;;  %v2771_v60 = vsel %vm71_vm0, %v2755_v27, 0.0  ;;  %6726 = vmatprep.subr.bf16.mxu0 %v7125_v36 }
 0x217   :  { %3568 = vst [vmem:[#allocation3 + $0x184] sm:$0xf] %v6138_v13  ;;  %2849 = vst [vmem:[#allocation3 + $0x18c] sm:$0xf] %v6121_v8  ;;  %v2962_v5 = vsel %vm72_vm1, %v2946_v63, 0.0  ;;  %v7113_v39 = vld [vmem:[#allocation9 + $0x150] sm:$0xff]   ;;  %v6123_v42 = vpack.c.bf16 %v2771_v60, %v2771_v60  ;;  %4761 = vmatmul.mubr.bf16.gmra.mxu1 %v5840_v14 }
 0x218   :  { %3168 = vst [vmem:[#allocation3 + $0x174] sm:$0xf] %v6121_v8  ;;  %3487 = vst [vmem:[#allocation3 + $0x15c] sm:$0xf] %v6121_v8  ;;  %v2963_v49 = vsel %vm72_vm1, %v2947_v62, 0.0  ;;  %v6154_v37 = vpack.c.bf16 %v2962_v5, %v2962_v5  ;;  %v7131_v16 = vld [vmem:[#allocation9 + $0x198] sm:$0xff]   ;;  %6663 = vmatpush3.bf16.msra.mxu1 %v7108_v58 }
 0x219   :  { %3169 = vst [vmem:[#allocation3 + $0x198] sm:$0xf] %v6122_v57  ;;  %2850 = vst [vmem:[#allocation3 + $0x1b0] sm:$0xf] %v6122_v57  ;;  %v7089_v17 = vld [vmem:[#allocation3 + $0xdc] ss:$36 sps:$4 sm:$0xff]   ;;  %v6155_v26 = vpack.c.bf16 %v2963_v49, %v2963_v49  ;;  %6664 = vmatprep.subr.bf16.mxu1 %v7113_v39  ;;  %6727 = vmatpush3.bf16.msra.mxu0 %v7131_v16 }
 0x21a   :  { %3488 = vst [vmem:[#allocation3 + $0x180] sm:$0xf] %v6122_v57  ;;  %3040 = vst [vmem:[#allocation3 + $0x170] sm:$0xf] %v6152_v48  ;;  %v2708_v18 = vmax.f32 %v7958_v34, 0.0  ;;  %v7998_v1 = vmax.f32 %v7972_v50, 0.0  ;;  %4768 = vmatprep.mubr.bf16.mxu1 %v7089_v17 }
 0x21b   :  { %3041 = vst [vmem:[#allocation3 + $0x194] sm:$0xf] %v6153_v54  ;;  %3359 = vst [vmem:[#allocation3 + $0x158] sm:$0xf] %v6152_v48  ;;  %v3261_v7 = vrot.slane %v7932_v61, 1  ;;  %v7132_v3 = vld [vmem:[#allocation9 + $0x1d0] sm:$0xff]  }
 0x21c   :  { %3360 = vst [vmem:[#allocation3 + $0x17c] sm:$0xf] %v6153_v54  ;;  %3678 = vst [vmem:[#allocation3 + $0x140] sm:$0xf] %v6152_v48  ;;  %v7087_v19 = vld [vmem:[#allocation3 + $0x98] ss:$36 sps:$4 sm:$0xff]   ;;  %v6141_v59 = vpack.c.bf16 %v2708_v18, %v2708_v18  ;;  %v6189_v9 = vpack.c.bf16 %v7998_v1, %v7998_v1  ;;  %6728 = vmatprep.subr.bf16.mxu0 %v7132_v3 }
 0x21d   :  { %3679 = vst [vmem:[#allocation3 + $0x164] sm:$0xf] %v6153_v54  ;;  %2931 = vst [vmem:[#allocation3 + $0x1d8] sm:$0xf] %v6139_v35  ;;  %v7091_v41 = vld [vmem:[#allocation3 + $0xe4] ss:$36 sps:$4 sm:$0xff]   ;;  %4858 = vmatmul.mubr.bf16.gmra.mxu0 %v7087_v19 }
 0x21e   :  { %3250 = vst [vmem:[#allocation3 + $0x1c0] sm:$0xf] %v6139_v35  ;;  %3569 = vst [vmem:[#allocation3 + $0x1a8] sm:$0xf] %v6139_v35  ;;  %v7119_v34 = vld [vmem:[#allocation9 + $0x110] sm:$0xff]   ;;  %v2757_v46 = vrot.slane %v2708_v18, 7  ;;  %4865 = vmatprep.mubr.bf16.mxu0 %v7091_v41 }
 0x21f   :  { %2851 = vst [vmem:[#allocation3 + $0x1d4] sm:$0xf] %v6123_v42  ;;  %3170 = vst [vmem:[#allocation3 + $0x1bc] sm:$0xf] %v6123_v42  ;;  %v2949_v61 = vrot.slane %v2708_v18, 1  ;;  %v3077_v6 = vrot.slane %v7998_v1, 7  ;;  %6665 = vmatpush3.bf16.msra.mxu1 %v7119_v34 }
 0x220   :  { %3489 = vst [vmem:[#allocation3 + $0x1a4] sm:$0xf] %v6123_v42  ;;  %3042 = vst [vmem:[#allocation3 + $0x1b8] sm:$0xf] %v6154_v37  ;;  %v7124_v20 = vld [vmem:[#allocation9 + $0x148] sm:$0xff]   ;;  %v3277_v31 = vsel %vm72_vm1, %v3261_v7, 0.0 }
 0x221   :  { %3361 = vst [vmem:[#allocation3 + $0x1a0] sm:$0xf] %v6154_v37  ;;  %3680 = vst [vmem:[#allocation3 + $0x188] sm:$0xf] %v6154_v37  ;;  %v3718_v29 = vld [vmem:[#allocation3 + $0xd8] sm:$0xff]  ;;  %v2773_v25 = vsel %vm71_vm0, %v2757_v46, 0.0  ;;  %v6197_v50 = vpack.c.bf16 %v3277_v31, %v3277_v31  ;;  %6666 = vmatprep.subr.bf16.mxu1 %v7124_v20 }
 0x222   :  { %3043 = vst [vmem:[#allocation3 + $0x1dc] sm:$0xf] %v6155_v26  ;;  %3362 = vst [vmem:[#allocation3 + $0x1c4] sm:$0xf] %v6155_v26  ;;  %v3723_v45 = vld [vmem:[#allocation3 + $0xfc] sm:$0xff]  ;;  %v2965_v12 = vsel %vm72_vm1, %v2949_v61, 0.0  ;;  %v6125_v28 = vpack.c.bf16 %v2773_v25, %v2773_v25 }
 0x223   :  { %3681 = vst [vmem:[#allocation3 + $0x1ac] sm:$0xf] %v6155_v26  ;;  %2933 = vst [vmem:[#allocation3 + $0x220] sm:$0xf] %v6141_v59  ;;  %v7133_v10 = vld [vmem:[#allocation9 + $0x190] sm:$0xff]   ;;  %v6157_v15 = vpack.c.bf16 %v2965_v12, %v2965_v12  ;;  %v3093_v24 = vsel %vm71_vm0, %v3077_v6, 0.0  ;;  %v5849_v51 = vcombine.low %v3718_v29, %v3723_v45 }
 0x224   :  { %3252 = vst [vmem:[#allocation3 + $0x208] sm:$0xf] %v6141_v59  ;;  %3571 = vst [vmem:[#allocation3 + $0x1f0] sm:$0xf] %v6141_v59  ;;  %v7136_v33 = vld [vmem:[#allocation9 + $0x1c8] sm:$0xff]   ;;  %v6173_v40 = vpack.c.bf16 %v3093_v24, %v3093_v24  ;;  %v3269_v47 = vrot.slane %v7998_v1, 1  ;;  %6729 = vmatpush3.bf16.msra.mxu0 %v7133_v10 }
 0x225   :  { %3253 = vst [vmem:[#allocation3 + $0x22c] sm:$0xf] %v6189_v9  ;;  %3572 = vst [vmem:[#allocation3 + $0x214] sm:$0xf] %v6189_v9  ;;  %v7130_v55 = vld [vmem:[#allocation9 + $0x108] sm:$0xff]   ;;  %v7135_v52 = vld [vmem:[#allocation9 + $0x140] sm:$0xff]   ;;  %4769 = vmatmul.mubr.bf16.gmra.mxu1 %v5849_v51  ;;  %6730 = vmatprep.subr.bf16.mxu0 %v7136_v33 }
 0x226   :  { %3357 = vst [vmem:[#allocation3 + $0x110] sm:$0xf] %v6197_v50  ;;  %3676 = vst [vmem:[#allocation3 + $0xf8] sm:$0xf] %v6197_v50  ;;  %v7096_v44 = vld [vmem:[#allocation3 + $0x124] ss:$36 sps:$4 sm:$0xff]   ;;  %6667 = vmatpush3.bf16.msra.mxu1 %v7130_v55 }
 0x227   :  { %2853 = vst [vmem:[#allocation3 + $0x21c] sm:$0xf] %v6125_v28  ;;  %3172 = vst [vmem:[#allocation3 + $0x204] sm:$0xf] %v6125_v28  ;;  %v7141_v43 = vld [vmem:[#allocation9 + $0x188] sm:$0xff]   ;;  %v3285_v21 = vsel %vm72_vm1, %v3269_v47, 0.0  ;;  %4776 = vmatprep.mubr.bf16.mxu1 %v7096_v44  ;;  %6668 = vmatprep.subr.bf16.mxu1 %v7135_v52 }
 0x228   :  { %3491 = vst [vmem:[#allocation3 + $0x1ec] sm:$0xf] %v6125_v28  ;;  %3045 = vst [vmem:[#allocation3 + $0x224] sm:$0xf] %v6157_v15  ;;  %v7094_v56 = vld [vmem:[#allocation3 + $0xe0] ss:$36 sps:$4 sm:$0xff]   ;;  %v6205_v38 = vpack.c.bf16 %v3285_v21, %v3285_v21  ;;  %6731 = vmatpush3.bf16.msra.mxu0 %v7141_v43 }
 0x229   :  { %3364 = vst [vmem:[#allocation3 + $0x20c] sm:$0xf] %v6157_v15  ;;  %3683 = vst [vmem:[#allocation3 + $0x1f4] sm:$0xf] %v6157_v15  ;;  %v7145_v30 = vld [vmem:[#allocation9 + $0x1c0] sm:$0xff]   ;;  %4866 = vmatmul.mubr.bf16.gmra.mxu0 %v7094_v56  ;;  %v7147_v57 = vld [vmem:[#allocation9 + $0x238] sm:$0xff]  }
 0x22a   :  { %3173 = vst [vmem:[#allocation3 + $0x228] sm:$0xf] %v6173_v40  ;;  %3492 = vst [vmem:[#allocation3 + $0x210] sm:$0xf] %v6173_v40  ;;  %v3728_v4 = vld [vmem:[#allocation3 + $0x120] sm:$0xff]  ;;  %6732 = vmatprep.subr.bf16.mxu0 %v7145_v30  ;;  %v3738_v0 = vld [vmem:[#allocation3 + $0x168] sm:$0xff] }
 0x22b   :  { %v7098_v13 = vld [vmem:[#allocation3 + $0x12c] ss:$36 sps:$4 sm:$0xff]   ;;  %v7137_v63 = vld [vmem:[#allocation9 + $0x100] sm:$0xff]   ;;  %3365 = vst [vmem:[#allocation3 + $0x230] sm:$0xf] %v6205_v38  ;;  %v3753_v58 = vld [vmem:[#allocation3 + $0x1d4] sm:$0xff] }
 0x22c   :  { %v7146_v8 = vld [vmem:[#allocation9 + $0x180] sm:$0xff]   ;;  %3684 = vst [vmem:[#allocation3 + $0x218] sm:$0xf] %v6205_v38  ;;  %4873 = vmatprep.mubr.bf16.mxu0 %v7098_v13  ;;  %6669 = vmatpush3.bf16.msra.mxu1 %v7137_v63  ;;  %v7104_v23 = vld [vmem:[#allocation3 + $0x16c] ss:$36 sps:$4 sm:$0xff]   ;;  %v3758_v42 = vld [vmem:[#allocation3 + $0x1f8] sm:$0xff] }
 0x22d   :  { %v3733_v53 = vld [vmem:[#allocation3 + $0x144] sm:$0xff]  ;;  %6830 = vmatprep.subr.bf16.mxu1 %v7147_v57  ;;  %6733 = vmatpush3.bf16.msra.mxu0 %v7146_v8  ;;  %v7106_v22 = vld [vmem:[#allocation3 + $0x174] ss:$36 sps:$4 sm:$0xff]   ;;  %v3743_v48 = vld [vmem:[#allocation3 + $0x18c] sm:$0xff] }
 0x22e   :  { %v5858_v32 = vcombine.low %v3728_v4, %v3733_v53  ;;  %v7101_v11 = vld [vmem:[#allocation3 + $0x128] ss:$36 sps:$4 sm:$0xff]   ;;  %v5867_v54 = vcombine.low %v3738_v0, %v3743_v48  ;;  %v7115_v27 = vld [vmem:[#allocation3 + $0x1b4] ss:$36 sps:$4 sm:$0xff]   ;;  %v7117_v62 = vld [vmem:[#allocation3 + $0x1bc] ss:$36 sps:$4 sm:$0xff]  }
 0x22f   :  { %v7112_v35 = vld [vmem:[#allocation3 + $0x170] ss:$36 sps:$4 sm:$0xff]   ;;  %v7126_v5 = vld [vmem:[#allocation3 + $0x1fc] ss:$36 sps:$4 sm:$0xff]   ;;  %v7152_v3 = vld [vmem:[#allocation3 + $0x64] ss:$36 sps:$4 sm:$0xff]  }
 0x230   :  { %4777 = vmatmul.mubr.bf16.gmra.mxu1 %v5858_v32  ;;  %v3748_v36 = vld [vmem:[#allocation3 + $0x1b0] sm:$0xff]  ;;  %v7123_v14 = vld [vmem:[#allocation3 + $0x1b8] ss:$36 sps:$4 sm:$0xff]   ;;  %v7134_v17 = vld [vmem:[#allocation3 + $0x200] ss:$36 sps:$4 sm:$0xff]  }
 0x231   :  { %4784 = vmatprep.mubr.bf16.mxu1 %v7104_v23  ;;  %4874 = vmatmul.mubr.bf16.gmra.mxu0 %v7101_v11  ;;  %v5876_v60 = vcombine.low %v3748_v36, %v3753_v58  ;;  %v7128_v39 = vld [vmem:[#allocation3 + $0x204] ss:$36 sps:$4 sm:$0xff]   ;;  %v3763_v49 = vld [vmem:[#allocation3 + $0x21c] sm:$0xff]  ;;  %v7140_v16 = vld [vmem:[#allocation3 + $0x14] ss:$36 sps:$4 sm:$0xff]  }
 0x232   :  { %4881 = vmatprep.mubr.bf16.mxu0 %v7106_v22  ;;  %v5885_v37 = vcombine.low %v3758_v42, %v3763_v49  ;;  %v7144_v26 = vld [vmem:[#allocation3 + $0x1c] ss:$36 sps:$4 sm:$0xff]   ;;  %v7138_v18 = vld [vmem:[#allocation3 + $0x10] ss:$36 sps:$4 sm:$0xff]   ;;  %v7161_v41 = vld [vmem:[#allocation9 + $0x228] sm:$0xff]  }
 0x233   :  { %v7154_v1 = vld [vmem:[#allocation9 + $0x230] sm:$0xff]   ;;  %v7148_v7 = vld [vmem:[#allocation3 + $0x5c] ss:$36 sps:$4 sm:$0xff]   ;;  %v7155_v59 = vld [vmem:[#allocation3 + $0xa4] ss:$36 sps:$4 sm:$0xff]  }
 0x234   :  { %v7142_v19 = vld [vmem:[#allocation3 + $0x18] ss:$36 sps:$4 sm:$0xff]   ;;  %v7168_v46 = vld [vmem:[#allocation9 + $0x220] sm:$0xff]   ;;  %v7159_v6 = vld [vmem:[#allocation3 + $0xac] ss:$36 sps:$4 sm:$0xff]  }
 0x235   :  { %v7153_v34 = vld [vmem:[#allocation3 + $0x58] ss:$36 sps:$4 sm:$0xff]   ;;  %v7150_v61 = vld [vmem:[#allocation3 + $0x60] ss:$36 sps:$4 sm:$0xff]   ;;  %v7182_v9 = vld [vmem:[#allocation9 + $0x210] sm:$0xff]  }
 0x236   :  { %v7175_v20 = vld [vmem:[#allocation9 + $0x218] sm:$0xff]   ;;  %v7160_v31 = vld [vmem:[#allocation3 + $0xa0] ss:$36 sps:$4 sm:$0xff]   ;;  %v7162_v29 = vld [vmem:[#allocation3 + $0xec] ss:$36 sps:$4 sm:$0xff]  }
 0x237   :  { %v7157_v45 = vld [vmem:[#allocation3 + $0xa8] ss:$36 sps:$4 sm:$0xff]   ;;  %v7166_v25 = vld [vmem:[#allocation3 + $0xf4] ss:$36 sps:$4 sm:$0xff]   ;;  %v7196_v50 = vld [vmem:[#allocation9 + $0x200] sm:$0xff]  }
 0x238   :  { %4785 = vmatmul.mubr.bf16.gmra.mxu1 %v5867_v54  ;;  %v7189_v12 = vld [vmem:[#allocation9 + $0x208] sm:$0xff]   ;;  %v7171_v28 = vld [vmem:[#allocation3 + $0x134] ss:$36 sps:$4 sm:$0xff]   ;;  %v7174_v24 = vld [vmem:[#allocation3 + $0x13c] ss:$36 sps:$4 sm:$0xff]  }
 0x239   :  { %4792 = vmatprep.mubr.bf16.mxu1 %v7115_v27  ;;  %4882 = vmatmul.mubr.bf16.gmra.mxu0 %v7112_v35  ;;  %v7167_v10 = vld [vmem:[#allocation3 + $0xe8] ss:$36 sps:$4 sm:$0xff]   ;;  %v7164_v15 = vld [vmem:[#allocation3 + $0xf0] ss:$36 sps:$4 sm:$0xff]   ;;  %v7178_v40 = vld [vmem:[#allocation3 + $0x17c] ss:$36 sps:$4 sm:$0xff]  }
 0x23a   :  { %4889 = vmatprep.mubr.bf16.mxu0 %v7117_v62  ;;  %v7169_v33 = vld [vmem:[#allocation3 + $0x130] ss:$36 sps:$4 sm:$0xff]   ;;  %v7172_v55 = vld [vmem:[#allocation3 + $0x138] ss:$36 sps:$4 sm:$0xff]   ;;  %v7181_v47 = vld [vmem:[#allocation3 + $0x184] ss:$36 sps:$4 sm:$0xff]  }
 0x23b   :  { %v7176_v51 = vld [vmem:[#allocation3 + $0x178] ss:$36 sps:$4 sm:$0xff]   ;;  %v7185_v52 = vld [vmem:[#allocation3 + $0x1c4] ss:$36 sps:$4 sm:$0xff]   ;;  %v7188_v43 = vld [vmem:[#allocation3 + $0x1cc] ss:$36 sps:$4 sm:$0xff]  }
 0x23c   :  { %v7179_v44 = vld [vmem:[#allocation3 + $0x180] ss:$36 sps:$4 sm:$0xff]   ;;  %v7192_v56 = vld [vmem:[#allocation3 + $0x20c] ss:$36 sps:$4 sm:$0xff]   ;;  %v7195_v38 = vld [vmem:[#allocation3 + $0x214] ss:$36 sps:$4 sm:$0xff]  }
 0x23d   :  { %v7183_v21 = vld [vmem:[#allocation3 + $0x1c0] ss:$36 sps:$4 sm:$0xff]   ;;  %v7186_v30 = vld [vmem:[#allocation3 + $0x1c8] ss:$36 sps:$4 sm:$0xff]   ;;  %v7193_v63 = vld [vmem:[#allocation3 + $0x210] ss:$36 sps:$4 sm:$0xff]  }
 0x23e   :  { %v7190_v4 = vld [vmem:[#allocation3 + $0x208] ss:$36 sps:$4 sm:$0xff]   ;;  %v7197_v13 = vld [vmem:[#allocation3 + $0x20] ss:$36 sps:$4 sm:$0xff]   ;;  %v7200_v53 = vld [vmem:[#allocation3 + $0xf8] ss:$36 sps:$4 sm:$0xff]  }
 0x23f   :  { %v7198_v8 = vld [vmem:[#allocation3 + $0x68] ss:$36 sps:$4 sm:$0xff]   ;;  %v7201_v32 = vld [vmem:[#allocation3 + $0x140] ss:$36 sps:$4 sm:$0xff]   ;;  %v7203_v11 = vld [vmem:[#allocation3 + $0x1d0] ss:$36 sps:$4 sm:$0xff]  }
 0x240   :  { %4793 = vmatmul.mubr.bf16.gmra.mxu1 %v5876_v60  ;;  %v7202_v23 = vld [vmem:[#allocation3 + $0x188] ss:$36 sps:$4 sm:$0xff]   ;;  %v7204_v22 = vld [vmem:[#allocation3 + $0x218] ss:$36 sps:$4 sm:$0xff]  }
 0x241   :  { %4800 = vmatprep.mubr.bf16.mxu1 %v7126_v5  ;;  %4890 = vmatmul.mubr.bf16.gmra.mxu0 %v7123_v14 }
 0x242   :  { %4897 = vmatprep.mubr.bf16.mxu0 %v7128_v39 }
 0x248   :  { %4801 = vmatmul.mubr.bf16.gmra.mxu1 %v5885_v37 }
 0x249   :  { %4938 = vmatprep.mubr.bf16.mxu1 %v7140_v16  ;;  %4898 = vmatmul.mubr.bf16.gmra.mxu0 %v7134_v17 }
 0x24a   :  { %5035 = vmatprep.mubr.bf16.mxu0 %v7144_v26 }
 0x250   :  { %4939 = vmatmul.mubr.bf16.vlgmr.msra.gmra.mxu1 %v7138_v18 }
 0x251   :  { %4946 = vmatprep.mubr.bf16.mxu1 %v7148_v7  ;;  %6831 = vmatpush3.bf16.msra.mxu1 %v7147_v57  ;;  %v7199_v57 = vld [vmem:[#allocation3 + $0xb0] ss:$36 sps:$4 sm:$0xff]  }
 0x252   :  { %5036 = vmatmul.mubr.bf16.vlgmr.msra.gmra.mxu0 %v7142_v19  ;;  %6832 = vmatprep.subr.bf16.mxu1 %v7154_v1 }
 0x253   :  { %5043 = vmatprep.mubr.bf16.mxu0 %v7152_v3 }
 0x255   :  { %6833 = vmatpush3.bf16.msra.mxu1 %v7154_v1 }
 0x256   :  { %6834 = vmatprep.subr.bf16.mxu1 %v7161_v41 }
 0x258   :  { %4947 = vmatmul.mubr.bf16.gmra.mxu1 %v7153_v34 }
 0x259   :  { %4954 = vmatprep.mubr.bf16.mxu1 %v7155_v59  ;;  %6835 = vmatpush3.bf16.msra.mxu1 %v7161_v41 }
 0x25a   :  { %5044 = vmatmul.mubr.bf16.gmra.mxu0 %v7150_v61  ;;  %6836 = vmatprep.subr.bf16.mxu1 %v7168_v46 }
 0x25b   :  { %5051 = vmatprep.mubr.bf16.mxu0 %v7159_v6 }
 0x25d   :  { %6837 = vmatpush3.bf16.msra.mxu1 %v7168_v46 }
 0x25e   :  { %6838 = vmatprep.subr.bf16.mxu1 %v7175_v20 }
 0x260   :  { %4955 = vmatmul.mubr.bf16.gmra.mxu1 %v7160_v31 }
 0x261   :  { %4962 = vmatprep.mubr.bf16.mxu1 %v7162_v29  ;;  %6839 = vmatpush3.bf16.msra.mxu1 %v7175_v20 }
 0x262   :  { %5052 = vmatmul.mubr.bf16.gmra.mxu0 %v7157_v45  ;;  %6840 = vmatprep.subr.bf16.mxu1 %v7182_v9 }
 0x263   :  { %5059 = vmatprep.mubr.bf16.mxu0 %v7166_v25 }
 0x265   :  { %6841 = vmatpush3.bf16.msra.mxu1 %v7182_v9 }
 0x266   :  { %6842 = vmatprep.subr.bf16.mxu1 %v7189_v12 }
 0x268   :  { %4963 = vmatmul.mubr.bf16.gmra.mxu1 %v7167_v10 }
 0x269   :  { %4970 = vmatprep.mubr.bf16.mxu1 %v7171_v28  ;;  %6843 = vmatpush3.bf16.msra.mxu1 %v7189_v12 }
 0x26a   :  { %5060 = vmatmul.mubr.bf16.gmra.mxu0 %v7164_v15  ;;  %6844 = vmatprep.subr.bf16.mxu1 %v7196_v50 }
 0x26b   :  { %5067 = vmatprep.mubr.bf16.mxu0 %v7174_v24 }
 0x26d   :  { %6845 = vmatpush3.bf16.msra.mxu1 %v7196_v50 }
 0x270   :  { %4971 = vmatmul.mubr.bf16.gmra.mxu1 %v7169_v33 }
 0x271   :  { %4978 = vmatprep.mubr.bf16.mxu1 %v7178_v40 }
 0x272   :  { %5068 = vmatmul.mubr.bf16.gmra.mxu0 %v7172_v55 }
 0x273   :  { %5075 = vmatprep.mubr.bf16.mxu0 %v7181_v47 }
 0x278   :  { %4979 = vmatmul.mubr.bf16.gmra.mxu1 %v7176_v51 }
 0x279   :  { %4986 = vmatprep.mubr.bf16.mxu1 %v7185_v52 }
 0x27a   :  { %5076 = vmatmul.mubr.bf16.gmra.mxu0 %v7179_v44 }
 0x27b   :  { %5083 = vmatprep.mubr.bf16.mxu0 %v7188_v43 }
 0x280   :  { %4987 = vmatmul.mubr.bf16.gmra.mxu1 %v7183_v21 }
 0x281   :  { %4994 = vmatprep.mubr.bf16.mxu1 %v7192_v56 }
 0x282   :  { %5084 = vmatmul.mubr.bf16.gmra.mxu0 %v7186_v30 }
 0x283   :  { %5091 = vmatprep.mubr.bf16.mxu0 %v7195_v38 }
 0x288   :  { %4995 = vmatmul.mubr.bf16.gmra.mxu1 %v7190_v4 }
 0x289   :  { %6846 = vmatprep.mubr.bf16.mxu1 %v7197_v13 }
 0x28a   :  { %5092 = vmatmul.mubr.bf16.gmra.mxu0 %v7193_v63 }
 0x290   :  { %6847 = vmatmul.mubr.bf16.vlgmr.msra.gmra.mxu1 %v7198_v8 }
 0x291   :  { %6850 = vmatprep.mubr.bf16.mxu1 %v7199_v57 }
 0x298   :  { %6851 = vmatmul.mubr.bf16.gmra.mxu1 %v7200_v53 }
 0x299   :  { %6854 = vmatprep.mubr.bf16.mxu1 %v7201_v32 }
 0x2a0   :  { %6855 = vmatmul.mubr.bf16.gmra.mxu1 %v7202_v23 }
 0x2a1   :  { %6858 = vmatprep.mubr.bf16.mxu1 %v7203_v11 }
 0x2a8   :  { %6859 = vmatmul.mubr.bf16.gmra.mxu1 %v7204_v22 }
 0x2b9   :  { %v6542_v0 = vpop.f32.mrf.mxu1 }
 0x2bb   :  { %v6543_v54 = vpop.f32.mrf.mxu1 }
 0x2bc   :  { %v6544_v27 = vadd.f32 %v6543_v54, %v6542_v0 }
 0x2bd   :  { %v6606_v48 = vpop.f32.mrf.mxu0  ;;  %v6545_v62 = vpop.f32.mrf.mxu1 }
 0x2bf   :  { %v6607_v35 = vpop.f32.mrf.mxu0  ;;  %v6546_v60 = vpop.f32.mrf.mxu1 }
 0x2c0   :  { %v6608_v36 = vadd.f32 %v6607_v35, %v6606_v48  ;;  %v6547_v14 = vadd.f32 %v6546_v60, %v6545_v62 }
 0x2c1   :  { %v6609_v58 = vpop.f32.mrf.mxu0 }
 0x2c2   :  { %v8015_v5 = vadd.f32 %v6608_v36, %v6544_v27 }
 0x2c3   :  { %v6610_v39 = vpop.f32.mrf.mxu0 }
 0x2c4   :  { %v6611_v49 = vadd.f32 %v6610_v39, %v6609_v58 }
 0x2c6   :  { %v6548_v42 = vpop.f32.mrf.mxu1  ;;  %v8017_v17 = vadd.f32 %v6611_v49, %v6547_v14 }
 0x2c8   :  { %v6549_v16 = vpop.f32.mrf.mxu1 }
 0x2c9   :  { %v6550_v26 = vadd.f32 %v6549_v16, %v6548_v42 }
 0x2ca   :  { %v6551_v1 = vpop.f32.mrf.mxu1 }
 0x2cc   :  { %v6552_v3 = vpop.f32.mrf.mxu1 }
 0x2cd   :  { %v6553_v34 = vadd.f32 %v6552_v3, %v6551_v1 }
 0x2ce   :  { %v6612_v37 = vpop.f32.mrf.mxu0 }
 0x2d0   :  { %v6613_v18 = vpop.f32.mrf.mxu0 }
 0x2d1   :  { %v6614_v7 = vadd.f32 %v6613_v18, %v6612_v37 }
 0x2d2   :  { %v6615_v19 = vpop.f32.mrf.mxu0 }
 0x2d3   :  { %v8019_v41 = vadd.f32 %v6614_v7, %v6550_v26 }
 0x2d4   :  { %v6616_v46 = vpop.f32.mrf.mxu0 }
 0x2d5   :  { %v6617_v61 = vadd.f32 %v6616_v46, %v6615_v19 }
 0x2d7   :  { %v6554_v59 = vpop.f32.mrf.mxu1  ;;  %v8021_v31 = vadd.f32 %v6617_v61, %v6553_v34 }
 0x2d9   :  { %v6555_v20 = vpop.f32.mrf.mxu1 }
 0x2da   :  { %v6556_v9 = vadd.f32 %v6555_v20, %v6554_v59 }
 0x2db   :  { %v6557_v45 = vpop.f32.mrf.mxu1 }
 0x2dd   :  { %v6618_v6 = vpop.f32.mrf.mxu0  ;;  %v6558_v10 = vpop.f32.mrf.mxu1 }
 0x2de   :  { %v6559_v28 = vadd.f32 %v6558_v10, %v6557_v45 }
 0x2df   :  { %v6619_v29 = vpop.f32.mrf.mxu0 }
 0x2e0   :  { %v6620_v25 = vadd.f32 %v6619_v29, %v6618_v6 }
 0x2e1   :  { %v6621_v12 = vpop.f32.mrf.mxu0 }
 0x2e2   :  { %v8023_v50 = vadd.f32 %v6620_v25, %v6556_v9 }
 0x2e3   :  { %v6622_v15 = vpop.f32.mrf.mxu0 }
 0x2e4   :  { %v6623_v33 = vadd.f32 %v6622_v15, %v6621_v12 }
 0x2e5   :  { %v6560_v24 = vpop.f32.mrf.mxu1 }
 0x2e6   :  { %v8025_v47 = vadd.f32 %v6623_v33, %v6559_v28 }
 0x2e7   :  { %v6561_v55 = vpop.f32.mrf.mxu1 }
 0x2e8   :  { %v6562_v51 = vadd.f32 %v6561_v55, %v6560_v24 }
 0x2e9   :  { %v6624_v40 = vpop.f32.mrf.mxu0  ;;  %v6563_v44 = vpop.f32.mrf.mxu1 }
 0x2eb   :  { %v6625_v52 = vpop.f32.mrf.mxu0  ;;  %v6564_v56 = vpop.f32.mrf.mxu1 }
 0x2ec   :  { %v6626_v43 = vadd.f32 %v6625_v52, %v6624_v40  ;;  %v6565_v38 = vadd.f32 %v6564_v56, %v6563_v44 }
 0x2ed   :  { %v6627_v21 = vpop.f32.mrf.mxu0 }
 0x2ee   :  { %v8027_v30 = vadd.f32 %v6626_v43, %v6562_v51 }
 0x2ef   :  { %v6628_v4 = vpop.f32.mrf.mxu0 }
 0x2f0   :  { %v6566_v13 = vpop.f32.mrf.mxu1  ;;  %v6629_v63 = vadd.f32 %v6628_v4, %v6627_v21 }
 0x2f1   :  { %v6630_v8 = vpop.f32.mrf.mxu0 }
 0x2f2   :  { %v6567_v57 = vpop.f32.mrf.mxu1  ;;  %v8029_v53 = vadd.f32 %v6629_v63, %v6565_v38 }
 0x2f3   :  { %v6568_v32 = vadd.f32 %v6567_v57, %v6566_v13  ;;  %v6631_v23 = vpop.f32.mrf.mxu0 }
 0x2f4   :  { %v6569_v11 = vpop.f32.mrf.mxu1  ;;  %v6632_v22 = vadd.f32 %v6631_v23, %v6630_v8 }
 0x2f5   :  { %v6633_v0 = vpop.f32.mrf.mxu0 }
 0x2f6   :  { %v6570_v48 = vpop.f32.mrf.mxu1  ;;  %v8031_v54 = vadd.f32 %v6632_v22, %v6568_v32 }
 0x2f7   :  { %v6571_v27 = vadd.f32 %v6570_v48, %v6569_v11  ;;  %v6634_v35 = vpop.f32.mrf.mxu0 }
 0x2f8   :  { %v6572_v62 = vpop.f32.mrf.mxu1  ;;  %v6635_v36 = vadd.f32 %v6634_v35, %v6633_v0 }
 0x2f9   :  { %v6636_v58 = vpop.f32.mrf.mxu0 }
 0x2fa   :  { %v6573_v60 = vpop.f32.mrf.mxu1  ;;  %v8033_v14 = vadd.f32 %v6635_v36, %v6571_v27 }
 0x2fb   :  { %v6574_v39 = vadd.f32 %v6573_v60, %v6572_v62  ;;  %v6637_v42 = vpop.f32.mrf.mxu0 }
 0x2fc   :  { %v6575_v49 = vpop.f32.mrf.mxu1  ;;  %v6638_v37 = vadd.f32 %v6637_v42, %v6636_v58 }
 0x2fd   :  { %v6639_v16 = vpop.f32.mrf.mxu0 }
 0x2fe   :  { %v6576_v26 = vpop.f32.mrf.mxu1  ;;  %v8035_v18 = vadd.f32 %v6638_v37, %v6574_v39 }
 0x2ff   :  { %v6577_v1 = vadd.f32 %v6576_v26, %v6575_v49  ;;  %v6640_v7 = vpop.f32.mrf.mxu0 }
 0x300   :  { %v6578_v19 = vpop.f32.mrf.mxu1  ;;  %v6641_v3 = vadd.f32 %v6640_v7, %v6639_v16 }
 0x301   :  { %v6642_v34 = vpop.f32.mrf.mxu0 }
 0x302   :  { %v6579_v46 = vpop.f32.mrf.mxu1  ;;  %v8037_v59 = vadd.f32 %v6641_v3, %v6577_v1 }
 0x303   :  { %v6580_v61 = vadd.f32 %v6579_v46, %v6578_v19  ;;  %v6643_v6 = vpop.f32.mrf.mxu0 }
 0x304   :  { %8314 = vst [vmem:[#allocation21_spill] sm:$0xff] %v8037_v59  ;;  %v6581_v20 = vpop.f32.mrf.mxu1  ;;  %v6644_v9 = vadd.f32 %v6643_v6, %v6642_v34 }
 0x305   :  { %v6645_v29 = vpop.f32.mrf.mxu0 }
 0x306   :  { %v6582_v45 = vpop.f32.mrf.mxu1  ;;  %v8039_v25 = vadd.f32 %v6644_v9, %v6580_v61 }
 0x307   :  { %v6583_v12 = vadd.f32 %v6582_v45, %v6581_v20  ;;  %v6646_v10 = vpop.f32.mrf.mxu0 }
 0x308   :  { %8315 = vst [vmem:[#allocation22_spill] sm:$0xff] %v8039_v25  ;;  %v6584_v28 = vpop.f32.mrf.mxu1  ;;  %v6647_v15 = vadd.f32 %v6646_v10, %v6645_v29 }
 0x309   :  { %v6648_v24 = vpop.f32.mrf.mxu0 }
 0x30a   :  { %v6585_v33 = vpop.f32.mrf.mxu1  ;;  %v8041_v40 = vadd.f32 %v6647_v15, %v6583_v12 }
 0x30b   :  { %v6586_v55 = vadd.f32 %v6585_v33, %v6584_v28  ;;  %v6649_v51 = vpop.f32.mrf.mxu0 }
 0x30c   :  { %8316 = vst [vmem:[#allocation16_spill] sm:$0xff] %v8041_v40  ;;  %v6587_v52 = vpop.f32.mrf.mxu1  ;;  %v6650_v44 = vadd.f32 %v6649_v51, %v6648_v24 }
 0x30d   :  { %v8043_v43 = vpop.f32.mrf.mxu0 }
 0x30e   :  { %8317 = vst [vmem:[#allocation23_spill] sm:$0xff] %v8043_v43  ;;  %v6588_v21 = vpop.f32.mrf.mxu1  ;;  %v8045_v56 = vadd.f32 %v6650_v44, %v6586_v55 }
 0x30f   :  { %v8047_v38 = vadd.f32 %v6588_v21, %v6587_v52  ;;  %v8049_v4 = vpop.f32.mrf.mxu0 }
 0x310   :  { %8318 = vst [vmem:[#allocation24_spill] sm:$0xff] %v8045_v56  ;;  %8320 = vst [vmem:[#allocation25_spill] sm:$0xff] %v8049_v4  ;;  %v6670_v13 = vpop.f32.mrf.mxu1 }
 0x311   :  { %8319 = vst [vmem:[#allocation17_spill] sm:$0xff] %v8047_v38 }
 0x312   :  { %v8051_v63 = vpop.f32.mrf.mxu0  ;;  %v6671_v8 = vpop.f32.mrf.mxu1 }
 0x313   :  { %v6672_v57 = vadd.f32 %v6671_v8, %v6670_v13 }
 0x314   :  { %v6735_v32 = vpop.f32.mrf.mxu0  ;;  %v6673_v23 = vpop.f32.mrf.mxu1 }
 0x315   :  { %v8054_v11 = vadd.f32 %v6672_v57, %v8015_v5 }
 0x316   :  { %v6737_v22 = vpop.f32.mrf.mxu0  ;;  %v6674_v0 = vpop.f32.mrf.mxu1 }
 0x318   :  { %v6738_v48 = vpop.f32.mrf.mxu0  ;;  %v6676_v27 = vpop.f32.mrf.mxu1 }
 0x31a   :  { %v6740_v35 = vpop.f32.mrf.mxu0  ;;  %v6677_v62 = vpop.f32.mrf.mxu1 }
 0x31b   :  { %v6678_v43 = vadd.f32 %v6677_v62, %v6676_v27 }
 0x31c   :  { %v6741_v36 = vpop.f32.mrf.mxu0  ;;  %v6679_v58 = vpop.f32.mrf.mxu1 }
 0x31e   :  { %v8056_v60 = vpop.f32.mrf.mxu0  ;;  %v6680_v39 = vpop.f32.mrf.mxu1 }
 0x320   :  { %v6744_v42 = vpop.f32.mrf.mxu0  ;;  %v6682_v49 = vpop.f32.mrf.mxu1 }
 0x322   :  { %v6746_v37 = vpop.f32.mrf.mxu0  ;;  %v6683_v16 = vpop.f32.mrf.mxu1 }
 0x324   :  { %v6747_v26 = vpop.f32.mrf.mxu0  ;;  %v6685_v1 = vpop.f32.mrf.mxu1 }
 0x326   :  { %v8058_v7 = vpop.f32.mrf.mxu0  ;;  %v6686_v5 = vpop.f32.mrf.mxu1 }
 0x328   :  { %v8060_v19 = vpop.f32.mrf.mxu0  ;;  %v6688_v3 = vpop.f32.mrf.mxu1 }
 0x32a   :  { %v8062_v34 = vpop.f32.mrf.mxu0  ;;  %v6689_v46 = vpop.f32.mrf.mxu1 }
 0x32c   :  { %v8064_v61 = vpop.f32.mrf.mxu0  ;;  %v6691_v6 = vpop.f32.mrf.mxu1 }
 0x32e   :  { %v8066_v20 = vpop.f32.mrf.mxu0  ;;  %v6692_v9 = vpop.f32.mrf.mxu1 }
 0x330   :  { %v8068_v29 = vpop.f32.mrf.mxu0  ;;  %v6694_v45 = vpop.f32.mrf.mxu1 }
 0x332   :  { %v8070_v12 = vpop.f32.mrf.mxu0  ;;  %v6695_v10 = vpop.f32.mrf.mxu1 }
 0x334   :  { %v8072_v28 = vpop.f32.mrf.mxu0  ;;  %v8074_v15 = vpop.f32.mrf.mxu1 }
 0x336   :  { %v8076_v24 = vpop.f32.mrf.mxu0  ;;  %v8078_v33 = vpop.f32.mrf.mxu1 }
 0x337   :  { %8321 = vst [vmem:[#allocation28_spill] sm:$0xff] %v8076_v24  ;;  %v6675_v24 = vadd.f32 %v6674_v0, %v6673_v23  ;;  %v6742_v0 = vadd.f32 %v6741_v36, %v6740_v35 }
 0x338   :  { %v6700_v55 = vpop.f32.mrf.mxu1  ;;  %v8080_v51 = vpop.f32.mrf.mxu0 }
 0x339   :  { %8322 = vst [vmem:[#allocation18_spill] sm:$0xff] %v8080_v51 }
 0x33a   :  { %v6701_v52 = vpop.f32.mrf.mxu1  ;;  %v8084_v21 = vpop.f32.mrf.mxu0 }
 0x33b   :  { %8323 = vst [vmem:[#allocation31_spill] sm:$0xff] %v8084_v21 }
 0x33c   :  { %v8082_v44 = vpop.f32.mrf.mxu1  ;;  %v8090_v57 = vpop.f32.mrf.mxu0 }
 0x33d   :  { %8325 = vst [vmem:[#allocation27_spill] sm:$0xff] %v8090_v57 }
 0x33e   :  { %v8086_v13 = vpop.f32.mrf.mxu1  ;;  %v8096_v40 = vpop.f32.mrf.mxu0 }
 0x33f   :  { %8328 = vst [vmem:[#allocation32_spill] sm:$0xff] %v8096_v40  ;;  %v4944_v40 = vadd.f32 %v6675_v24, %v8017_v17 }
 0x340   :  { %v8088_v8 = vpop.f32.mrf.mxu1  ;;  %v8102_v59 = vpop.f32.mrf.mxu0 }
 0x341   :  { %8324 = vst [vmem:[#allocation26_spill] sm:$0xff] %v8088_v8  ;;  %8331 = vst [vmem:[#allocation14_spill] sm:$0xff] %v8102_v59 }
 0x342   :  { %v8092_v2 = vpop.f32.mrf.mxu1  ;;  %v8108_v8 = vpop.f32.mrf.mxu0 }
 0x343   :  { %8326 = vst [vmem:[#allocation29_spill] sm:$0xff] %v8092_v2  ;;  %v6681_v2 = vadd.f32 %v6680_v39, %v6679_v58  ;;  %v6687_v58 = vadd.f32 %v6686_v5, %v6685_v1  ;;  %v6690_v39 = vadd.f32 %v6689_v46, %v6688_v3  ;;  %v6702_v1 = vadd.f32 %v6701_v52, %v6700_v55 }
 0x344   :  { %v8094_v56 = vpop.f32.mrf.mxu1  ;;  %v8115_v59 = vpop.f32.mrf.mxu0 }
 0x345   :  { %8327 = vst [vmem:[#allocation30_spill] sm:$0xff] %v8094_v56  ;;  %v6684_v56 = vadd.f32 %v6683_v16, %v6682_v49  ;;  %v4952_v27 = vadd.f32 %v6681_v2, %v8021_v31  ;;  %v6693_v49 = vadd.f32 %v6692_v9, %v6691_v6 }
 0x346   :  { %v8098_v38 = vpop.f32.mrf.mxu1 }
 0x347   :  { %8329 = vst [vmem:[#allocation19_spill] sm:$0xff] %v8098_v38  ;;  %v6736_v38 = vadd.f32 %v6735_v32, %v8051_v63  ;;  %v4957_v62 = vadd.f32 %v6684_v56, %v8023_v50  ;;  %v6745_v63 = vadd.f32 %v6744_v42, %v8056_v60  ;;  %v6748_v32 = vadd.f32 %v6747_v26, %v6746_v37 }
 0x348   :  { %v8100_v25 = vpop.f32.mrf.mxu1  ;;  %v4960_v56 = vadd.f32 %v6687_v58, %v8025_v47  ;;  %v6751_v47 = vadd.f32 %v8060_v19, %v8058_v7  ;;  %v6699_v7 = vadd.f32 %v8078_v33, %v8074_v15  ;;  %v6705_v15 = vadd.f32 %v8086_v13, %v8082_v44 }
 0x349   :  { %8330 = vst [vmem:[#allocation20_spill] sm:$0xff] %v8100_v25  ;;  %v4949_v25 = vadd.f32 %v6678_v43, %v8019_v41  ;;  %v8121_v41 = vpop.f32.mrf.mxu0  ;;  %v5049_v2 = vadd.f32 %v6745_v63, %v4952_v27  ;;  %v5054_v50 = vadd.f32 %v6748_v32, %v4957_v62  ;;  %v8334_v62 = vld [vmem:[#allocation31_spill] sm:$0xff] }
 0x34a   :  { %v8104_v51 = vpop.f32.mrf.mxu1  ;;  %v4976_v27 = vadd.f32 %v6699_v7, %v8033_v14  ;;  %v8337_v58 = vld [vmem:[#allocation29_spill] sm:$0xff] }
 0x34b   :  { %8332 = vst [vmem:[#allocation33_spill] sm:$0xff] %v8104_v51  ;;  %v6739_v51 = vadd.f32 %v6738_v48, %v6737_v22  ;;  %v5046_v43 = vadd.f32 %v6742_v0, %v4949_v25  ;;  %v8132_v60 = vpop.f32.mrf.mxu0 }
 0x34c   :  { %v8106_v4 = vpop.f32.mrf.mxu1 }
 0x34d   :  { %v5041_v16 = vadd.f32 %v6739_v51, %v4944_v40  ;;  %v4968_v40 = vadd.f32 %v6693_v49, %v8029_v53  ;;  %v6757_v53 = vadd.f32 %v8068_v29, %v8066_v20  ;;  %v6760_v51 = vadd.f32 %v8072_v28, %v8070_v12  ;;  %v8335_v12 = vld [vmem:[#allocation27_spill] sm:$0xff] }
 0x34e   :  { %v8110_v57 = vpop.f32.mrf.mxu1  ;;  %v6766_v28 = vadd.f32 %v8335_v12, %v8334_v62 }
 0x34f   :  { %8333 = vst [vmem:[#allocation34_spill] sm:$0xff] %v8110_v57  ;;  %v5038_v57 = vadd.f32 %v6736_v38, %v8054_v11  ;;  %v4965_v38 = vadd.f32 %v6690_v39, %v8027_v30  ;;  %v6696_v11 = vadd.f32 %v6695_v10, %v6694_v45  ;;  %v6754_v30 = vadd.f32 %v8064_v61, %v8062_v34  ;;  %v8156_v10 = vpop.f32.mrf.mxu0 }
 0x350   :  { %v6848_v21 = vpop.f32.mrf.mxu1  ;;  %v5057_v61 = vadd.f32 %v6751_v47, %v4960_v56  ;;  %v5065_v55 = vadd.f32 %v6757_v53, %v4968_v40  ;;  %v8344_v53 = vld [vmem:[#allocation14_spill] sm:$0xff]  ;;  %v8348_v7 = vld [vmem:[#allocation20_spill] sm:$0xff] }
 0x351   :  { %v8125_v35 = vadd.f32 %v6848_v21, %v5046_v43  ;;  %v4973_v45 = vadd.f32 %v6696_v11, %v8031_v54  ;;  %v5062_v19 = vadd.f32 %v6754_v30, %v4965_v38  ;;  %v4981_v54 = vadd.f32 %v6702_v1, %v8035_v18  ;;  %v8336_v18 = vld [vmem:[#allocation26_spill] sm:$0xff]  ;;  %v6777_v49 = vpop.f32.mrf.mxu0  ;;  %v8338_v43 = vld [vmem:[#allocation23_spill] sm:$0xff]  ;;  %v8342_v38 = vld [vmem:[#allocation21_spill] sm:$0xff] }
 0x352   :  { %v5134_v23 = vpop.f32.mrf.mxu1  ;;  %v6708_v39 = vadd.f32 %v8337_v58, %v8336_v18  ;;  %v4984_v40 = vadd.f32 %v6705_v15, %v8342_v38  ;;  %v8343_v30 = vld [vmem:[#allocation32_spill] sm:$0xff]  ;;  %v8351_v58 = vld [vmem:[#allocation17_spill] sm:$0xff] }
 0x353   :  { %v8123_v22 = vadd.f32 %v5134_v23, %v5038_v57  ;;  %v5220_v3 = vmul.f32 %v8125_v35, %v8125_v35  ;;  %v5070_v13 = vadd.f32 %v6760_v51, %v4973_v45  ;;  %v5078_v11 = vadd.f32 %v6766_v28, %v4981_v54 }
 0x354   :  { %v6849_v17 = vpop.f32.mrf.mxu1  ;;  %v6769_v1 = vadd.f32 %v8344_v53, %v8343_v30  ;;  %v6772_v54 = vadd.f32 %v8115_v59, %v8108_v8  ;;  %v8353_v59 = vld [vmem:[#allocation24_spill] sm:$0xff] }
 0x355   :  { %v5218_v25 = vmul.f32 %v8123_v22, %v8123_v22  ;;  %v8136_v42 = vadd.f32 %v6849_v17, %v5049_v2  ;;  %v8340_v2 = vld [vmem:[#allocation28_spill] sm:$0xff] }
 0x356   :  { %v5137_v48 = vpop.f32.mrf.mxu1  ;;  %v8350_v15 = vld [vmem:[#allocation34_spill] sm:$0xff] }
 0x357   :  { %v8127_v31 = vadd.f32 %v5137_v48, %v5041_v16  ;;  %v5221_v20 = vmul.f32 %v8136_v42, %v8136_v42  ;;  %v8339_v48 = vld [vmem:[#allocation25_spill] sm:$0xff] }
 0x358   :  { %v6852_v36 = vpop.f32.mrf.mxu1  ;;  %v6653_v14 = vadd.f32 %v8339_v48, %v8338_v43 }
 0x359   :  { %v5197_v37 = vadd.f32 %v8127_v31, %v8123_v22  ;;  %v5219_v26 = vmul.f32 %v8127_v31, %v8127_v31  ;;  %v8166_v33 = vadd.f32 %v6852_v36, %v5062_v19  ;;  %v8349_v19 = vld [vmem:[#allocation33_spill] sm:$0xff] }
 0x35a   :  { %v5150_v5 = vpop.f32.mrf.mxu1 }
 0x35b   :  { %v5198_v46 = vadd.f32 %v5197_v37, %v8125_v35  ;;  %v5234_v6 = vadd.f32 %v5219_v26, %v5218_v25  ;;  %v8151_v9 = vadd.f32 %v5150_v5, %v5054_v50  ;;  %v8341_v50 = vld [vmem:[#allocation18_spill] sm:$0xff]  ;;  %v5224_v25 = vmul.f32 %v8166_v33, %v8166_v33 }
 0x35c   :  { %v6853_v34 = vpop.f32.mrf.mxu1  ;;  %v6763_v56 = vadd.f32 %v8341_v50, %v8340_v2  ;;  %v8345_v5 = vld [vmem:[#allocation22_spill] sm:$0xff]  ;;  %v6775_v2 = vadd.f32 %v8132_v60, %v8121_v41 }
 0x35d   :  { %v5235_v29 = vadd.f32 %v5234_v6, %v5220_v3  ;;  %v5199_v24 = vadd.f32 %v5198_v46, %v8136_v42  ;;  %v5222_v57 = vmul.f32 %v8151_v9, %v8151_v9  ;;  %v8178_v16 = vadd.f32 %v6853_v34, %v5065_v55  ;;  %v8346_v46 = vld [vmem:[#allocation30_spill] sm:$0xff]  ;;  %v8347_v6 = vld [vmem:[#allocation19_spill] sm:$0xff] }
 0x35e   :  { %v5153_v52 = vpop.f32.mrf.mxu1  ;;  %v4989_v3 = vadd.f32 %v6708_v39, %v8345_v5  ;;  %v6711_v45 = vadd.f32 %v8347_v6, %v8346_v46  ;;  %v6714_v34 = vadd.f32 %v8349_v19, %v8348_v7  ;;  %v5073_v51 = vadd.f32 %v6763_v56, %v4976_v27  ;;  %v8352_v39 = vld [vmem:[#allocation16_spill] sm:$0xff] }
 0x35f   :  { %v5200_v21 = vadd.f32 %v5199_v24, %v8151_v9  ;;  %v5236_v23 = vadd.f32 %v5235_v29, %v5221_v20  ;;  %v8171_v0 = vadd.f32 %v5153_v52, %v5057_v61  ;;  %v6779_v20 = vpop.f32.mrf.mxu0  ;;  %v5225_v29 = vmul.f32 %v8178_v16, %v8178_v16 }
 0x360   :  { %v6856_v44 = vpop.f32.mrf.mxu1  ;;  %v6717_v52 = vadd.f32 %v8350_v15, %v8106_v4  ;;  %v4903_v27 = vadd.f32 %v6653_v14, %v8351_v58  ;;  %v4997_v8 = vadd.f32 %v6714_v34, %v8353_v59  ;;  %v5086_v4 = vadd.f32 %v6772_v54, %v4989_v3 }
 0x361   :  { %v5237_v17 = vadd.f32 %v5236_v23, %v5222_v57  ;;  %v5201_v63 = vadd.f32 %v5200_v21, %v8171_v0  ;;  %v5223_v32 = vmul.f32 %v8171_v0, %v8171_v0  ;;  %v8207_v21 = vadd.f32 %v6856_v44, %v5078_v11  ;;  %v6780_v44 = vpop.f32.mrf.mxu0 }
 0x362   :  { %v5166_v36 = vpop.f32.mrf.mxu1  ;;  %v5081_v57 = vadd.f32 %v6769_v1, %v4984_v40  ;;  %v6778_v14 = vadd.f32 %v6777_v49, %v8156_v10  ;;  %v5000_v50 = vadd.f32 %v6717_v52, %v4903_v27 }
 0x363   :  { %v5202_v37 = vadd.f32 %v5201_v63, %v8166_v33  ;;  %v5238_v26 = vadd.f32 %v5237_v17, %v5223_v32  ;;  %v8191_v47 = vadd.f32 %v5166_v36, %v5070_v13  ;;  %v4992_v13 = vadd.f32 %v6711_v45, %v8352_v39 }
 0x364   :  { %v6857_v61 = vpop.f32.mrf.mxu1  ;;  %v5228_v38 = vmul.f32 %v8207_v21, %v8207_v21 }
 0x365   :  { %v5239_v24 = vadd.f32 %v5238_v26, %v5224_v25  ;;  %v5203_v55 = vadd.f32 %v5202_v37, %v8178_v16  ;;  %v5226_v12 = vmul.f32 %v8191_v47, %v8191_v47  ;;  %v8217_v32 = vadd.f32 %v6857_v61, %v5081_v57 }
 0x366   :  { %v5169_v23 = vpop.f32.mrf.mxu1  ;;  %v6781_v25 = vadd.f32 %v6780_v44, %v6779_v20  ;;  %v5094_v37 = vadd.f32 %v6778_v14, %v4997_v8  ;;  %v5089_v60 = vadd.f32 %v6775_v2, %v4992_v13  ;;  %v3687_v14 = vld [vmem:[%s8269_s6] sm:$0x1] }
 0x367   :  { %v5204_v62 = vadd.f32 %v5203_v55, %v8191_v47  ;;  %v5240_v28 = vadd.f32 %v5239_v24, %v5225_v29  ;;  %v8212_v18 = vadd.f32 %v5169_v23, %v5073_v51  ;;  %v5229_v30 = vmul.f32 %v8217_v32, %v8217_v32 }
 0x368   :  { %v6860_v17 = vpop.f32.mrf.mxu1  ;;  %v5097_v49 = vadd.f32 %v6781_v25, %v5000_v50 }
 0x369   :  { %v5241_v63 = vadd.f32 %v5240_v28, %v5226_v12  ;;  %v5205_v43 = vadd.f32 %v5204_v62, %v8212_v18  ;;  %v5227_v48 = vmul.f32 %v8212_v18, %v8212_v18  ;;  %v5191_v10 = vadd.f32 %v6860_v17, %v5094_v37 }
 0x36a   :  { %v5182_v56 = vpop.f32.mrf.mxu1 }
 0x36b   :  { %v5206_v40 = vadd.f32 %v5205_v43, %v8207_v21  ;;  %v5242_v11 = vadd.f32 %v5241_v63, %v5227_v48  ;;  %v8228_v36 = vadd.f32 %v5182_v56, %v5086_v4  ;;  %v5232_v61 = vmul.f32 %v5191_v10, %v5191_v10  ;;  %v3686_v43 = vld [vmem:[%s8268_s5] sm:$0x1]  ;;  %v8354_v56 = vld [vmem:[#allocation15_spill] sm:$0xff]  ;;  %s7304_s5 = smov [#allocation10]  }
 0x36c   :  { %v6861_v26 = vpop.f32.mrf.mxu1  ;;  %s5377_s6 = sshll.u32 %s7304_s5, 4  ;;  %s5378_s6 = int_to_ptr.vmem [resolvable:$true] %s5377_s6 }
 0x36d   :  { %v5243_v53 = vadd.f32 %v5242_v11, %v5228_v38  ;;  %v5207_v41 = vadd.f32 %v5206_v40, %v8217_v32  ;;  %v5230_v3 = vmul.f32 %v8228_v36, %v8228_v36  ;;  %v5194_v7 = vadd.f32 %v6861_v26, %v5097_v49  ;;  %s7269_s23 = scalar_lea.vmem %s5378_s6, 2048  ;;  %p7274_p2 = scmp.lt.s32.totalorder %s5378_s6, %s5378_s6 }
 0x36e   :  { %v5185_v1 = vpop.f32.mrf.mxu1  ;;  %p7270_p1 = scmp.ne.s32.totalorder %s5378_s6, %s7269_s23  ;;  %p7275_p3 = scmp.lt.s32.totalorder %s7269_s23, %s7269_s23 }
 0x36f   :  { %v5208_v5 = vadd.f32 %v5207_v41, %v8228_v36  ;;  %v5244_v46 = vadd.f32 %v5243_v53, %v5229_v30  ;;  %v5186_v6 = vadd.f32 %v5185_v1, %v5089_v60  ;;  %v5233_v24 = vmul.f32 %v5194_v7, %v5194_v7 }
 0x370   :  { %p7276_p4 = por %p7275_p3, %p7274_p2 }
 0x371   :  { %v5245_v45 = vadd.f32 %v5244_v46, %v5230_v3  ;;  %v5209_v19 = vadd.f32 %v5208_v5, %v5186_v6  ;;  %v5231_v34 = vmul.f32 %v5186_v6, %v5186_v6  ;;  %v5321_v3 = vld [vmem:[#allocation4 + $0x68] sm:$0xff] }
 0x372   :  { %p7277_p5 = pnand %p7276_p4, %p7270_p1 }
 0x373   :  { %v5210_v20 = vadd.f32 %v5209_v19, %v5191_v10  ;;  %v5246_v29 = vadd.f32 %v5245_v45, %v5231_v34 }
 0x375   :  { %v5211_v55 = vadd.f32 %v5210_v20, %v5194_v7  ;;  %v5247_v51 = vadd.f32 %v5246_v29, %v5232_v61  ;;  %v5309_v61 = vld [vmem:[#allocation4 + $0x8] sm:$0xff] }
 0x377   :  { %v5212_v54 = vrot.slane %v5211_v55, 4  ;;  %v5248_v15 = vadd.f32 %v5247_v51, %v5233_v24 }
 0x379   :  { %v5213_v52 = vadd.f32 %v5212_v54, %v5211_v55  ;;  %v5249_v57 = vrot.slane %v5248_v15, 4  ;;  %v5312_v55 = vld [vmem:[#allocation4 + $0x20] sm:$0xff] }
 0x37b   :  { %v5214_v23 = vrot.slane %v5213_v52, 2  ;;  %v5250_v62 = vadd.f32 %v5249_v57, %v5248_v15  ;;  %v5315_v15 = vld [vmem:[#allocation4 + $0x38] sm:$0xff] }
 0x37d   :  { %v5215_v12 = vadd.f32 %v5214_v23, %v5213_v52  ;;  %v5251_v28 = vrot.slane %v5250_v62, 2  ;;  %v5316_v52 = vld [vmem:[#allocation4 + $0x40] sm:$0xff] }
 0x37f   :  { %v5216_v58 = vrot.slane %v5215_v12, 1  ;;  %v5252_v27 = vadd.f32 %v5251_v28, %v5250_v62  ;;  %v5317_v28 = vld [vmem:[#allocation4 + $0x48] sm:$0xff] }
 0x381   :  { %v5217_v39 = vadd.f32 %v5216_v58, %v5215_v12  ;;  %v5253_v13 = vrot.slane %v5252_v27, 1  ;;  %v5318_v58 = vld [vmem:[#allocation4 + $0x50] sm:$0xff] }
 0x383   :  { %v5254_v59 = vadd.f32 %v5253_v13, %v5252_v27  ;;  %v5255_v8 = vmul.f32 0.0078125, %v5217_v39  ;;  %v5319_v27 = vld [vmem:[#allocation4 + $0x58] sm:$0xff]  ;;  %v5320_v39 = vld [vmem:[#allocation4 + $0x60] sm:$0xff]  ;;  %v5322_v13 = vld [vmem:[#allocation4 + $0x70] sm:$0xff] }
 0x385   :  { %v5256_v17 = vmul.f32 0.0078125, %v5254_v59  ;;  %v5257_v4 = vmul.f32 %v5255_v8, %v5255_v8  ;;  %v5323_v59 = vld [vmem:[#allocation4 + $0x78] sm:$0xff] }
 0x387   :  { %v5258_v44 = vsub.f32 %v5256_v17, %v5257_v4 }
 0x389   :  { %v5259_v63 = vadd.f32 1e-05, %v5258_v44 }
 0x38b   :  { %7207 = vrsqrt.f32 %v5259_v63 }
 0x398   :  { %v7208_v48 = vpop.eup %7207 }
 0x399   :  { %v5261_v2 = vmul.f32 %v7208_v48, %v3686_v43 }
 0x39b   :  { %v5262_v50 = vmul.f32 %v5261_v2, %v5255_v8  ;;  %v5268_v38 = vrot.slane %v5261_v2, %v8354_v56 }
 0x39d   :  { %v5263_v40 = vsub.f32 %v3687_v14, %v5262_v50  ;;  %v5283_v11 = vmul.f32 %v5268_v38, %v5186_v6  ;;  %v5270_v25 = vmul.f32 %v5268_v38, %v8123_v22  ;;  %v5271_v37 = vmul.f32 %v5268_v38, %v8127_v31 }
 0x39e   :  { %v5272_v26 = vmul.f32 %v5268_v38, %v8125_v35  ;;  %v5273_v30 = vmul.f32 %v5268_v38, %v8136_v42  ;;  %v5274_v53 = vmul.f32 %v5268_v38, %v8151_v9  ;;  %v5275_v41 = vmul.f32 %v5268_v38, %v8171_v0 }
 0x39f   :  { %v5290_v60 = vrot.slane %v5263_v40, %v8354_v56  ;;  %v5276_v49 = vmul.f32 %v5268_v38, %v8166_v33  ;;  %v5277_v1 = vmul.f32 %v5268_v38, %v8178_v16  ;;  %v5278_v5 = vmul.f32 %v5268_v38, %v8191_v47  ;;  %v5308_v16 = vld [vmem:[#allocation4] sm:$0xff]  ;;  %v5310_v47 = vld [vmem:[#allocation4 + $0x10] sm:$0xff] }
 0x3a0   :  { %v5279_v22 = vmul.f32 %v5268_v38, %v8212_v18  ;;  %v5280_v31 = vmul.f32 %v5268_v38, %v8207_v21  ;;  %v5281_v35 = vmul.f32 %v5268_v38, %v8217_v32  ;;  %v5282_v42 = vmul.f32 %v5268_v38, %v8228_v36  ;;  %v5311_v21 = vld [vmem:[#allocation4 + $0x18] sm:$0xff]  ;;  %v5313_v32 = vld [vmem:[#allocation4 + $0x28] sm:$0xff] }
 0x3a1   :  { %v5305_v9 = vadd.f32 %v5290_v60, %v5283_v11  ;;  %v5284_v46 = vmul.f32 %v5268_v38, %v5191_v10  ;;  %v5285_v0 = vmul.f32 %v5268_v38, %v5194_v7  ;;  %v5292_v6 = vadd.f32 %v5290_v60, %v5270_v25  ;;  %v5314_v7 = vld [vmem:[#allocation4 + $0x30] sm:$0xff] }
 0x3a2   :  { %v5293_v45 = vadd.f32 %v5290_v60, %v5271_v37  ;;  %v5294_v19 = vadd.f32 %v5290_v60, %v5272_v26  ;;  %v5295_v33 = vadd.f32 %v5290_v60, %v5273_v30  ;;  %v5296_v34 = vadd.f32 %v5290_v60, %v5274_v53 }
 0x3a3   :  { %v5337_v20 = vadd.f32 %v5321_v3, %v5305_v9  ;;  %v5297_v29 = vadd.f32 %v5290_v60, %v5275_v41  ;;  %v5298_v18 = vadd.f32 %v5290_v60, %v5276_v49  ;;  %v5299_v24 = vadd.f32 %v5290_v60, %v5277_v1 }
 0x3a4   :  { %v5300_v51 = vadd.f32 %v5290_v60, %v5278_v5  ;;  %v5301_v36 = vadd.f32 %v5290_v60, %v5279_v22  ;;  %v5302_v54 = vadd.f32 %v5290_v60, %v5280_v31  ;;  %v5303_v10 = vadd.f32 %v5290_v60, %v5281_v35 }
 0x3a5   :  { %v5353_v57 = vmax.f32 %v5337_v20, 0.0  ;;  %v5304_v23 = vadd.f32 %v5290_v60, %v5282_v42  ;;  %v5306_v62 = vadd.f32 %v5290_v60, %v5284_v46  ;;  %v5307_v12 = vadd.f32 %v5290_v60, %v5285_v0 }
 0x3a6   :  { %v5324_v8 = vadd.f32 %v5308_v16, %v5292_v6  ;;  %v5325_v17 = vadd.f32 %v5309_v61, %v5293_v45  ;;  %v5326_v4 = vadd.f32 %v5310_v47, %v5294_v19  ;;  %v5327_v44 = vadd.f32 %v5311_v21, %v5295_v33 }
 0x3a7   :  { %5369 = vst [vmem:[#allocation10 + $0x68] sm:$0xff] %v5353_v57  ;;  %v5328_v63 = vadd.f32 %v5312_v55, %v5296_v34  ;;  %v5329_v43 = vadd.f32 %v5313_v32, %v5297_v29  ;;  %v5330_v48 = vadd.f32 %v5314_v7, %v5298_v18  ;;  %v5331_v2 = vadd.f32 %v5315_v15, %v5299_v24 }
 0x3a8   :  { %v5332_v14 = vadd.f32 %v5316_v52, %v5300_v51  ;;  %v5333_v50 = vadd.f32 %v5317_v28, %v5301_v36  ;;  %v5334_v56 = vadd.f32 %v5318_v58, %v5302_v54  ;;  %v5335_v38 = vadd.f32 %v5319_v27, %v5303_v10 }
 0x3a9   :  { %v5336_v40 = vadd.f32 %v5320_v39, %v5304_v23  ;;  %v5338_v11 = vadd.f32 %v5322_v13, %v5306_v62  ;;  %v5339_v25 = vadd.f32 %v5323_v59, %v5307_v12  ;;  %v5340_v37 = vmax.f32 %v5324_v8, 0.0 }
 0x3aa   :  { %v5341_v26 = vmax.f32 %v5325_v17, 0.0  ;;  %v5342_v30 = vmax.f32 %v5326_v4, 0.0  ;;  %v5343_v53 = vmax.f32 %v5327_v44, 0.0  ;;  %v5344_v41 = vmax.f32 %v5328_v63, 0.0 }
 0x3ab   :  { %v5345_v60 = vmax.f32 %v5329_v43, 0.0  ;;  %v5346_v49 = vmax.f32 %v5330_v48, 0.0  ;;  %v5347_v1 = vmax.f32 %v5331_v2, 0.0  ;;  %v5348_v5 = vmax.f32 %v5332_v14, 0.0  ;;  %5356 = vst [vmem:[#allocation10] sm:$0xff] %v5340_v37 }
 0x3ac   :  { %v5349_v3 = vmax.f32 %v5333_v50, 0.0  ;;  %v5350_v22 = vmax.f32 %v5334_v56, 0.0  ;;  %v5351_v31 = vmax.f32 %v5335_v38, 0.0  ;;  %v5352_v35 = vmax.f32 %v5336_v40, 0.0  ;;  %5357 = vst [vmem:[#allocation10 + $0x8] sm:$0xff] %v5341_v26  ;;  %5358 = vst [vmem:[#allocation10 + $0x10] sm:$0xff] %v5342_v30 }
 0x3ad   :  { %5359 = vst [vmem:[#allocation10 + $0x18] sm:$0xff] %v5343_v53  ;;  %5360 = vst [vmem:[#allocation10 + $0x20] sm:$0xff] %v5344_v41  ;;  %v5354_v42 = vmax.f32 %v5338_v11, 0.0  ;;  %v5355_v9 = vmax.f32 %v5339_v25, 0.0 }
 0x3ae   :  { %5361 = vst [vmem:[#allocation10 + $0x28] sm:$0xff] %v5345_v60  ;;  %5362 = vst [vmem:[#allocation10 + $0x30] sm:$0xff] %v5346_v49 }
 0x3af   :  { %5363 = vst [vmem:[#allocation10 + $0x38] sm:$0xff] %v5347_v1  ;;  %5364 = vst [vmem:[#allocation10 + $0x40] sm:$0xff] %v5348_v5 }
 0x3b0   :  { %5365 = vst [vmem:[#allocation10 + $0x48] sm:$0xff] %v5349_v3  ;;  %5366 = vst [vmem:[#allocation10 + $0x50] sm:$0xff] %v5350_v22 }
 0x3b1   :  { %5367 = vst [vmem:[#allocation10 + $0x58] sm:$0xff] %v5351_v31  ;;  %5368 = vst [vmem:[#allocation10 + $0x60] sm:$0xff] %v5352_v35 }
 0x3b2   :  { %5370 = vst [vmem:[#allocation10 + $0x70] sm:$0xff] %v5354_v42  ;;  %5371 = vst [vmem:[#allocation10 + $0x78] sm:$0xff] %v5355_v9 }
 0x3b3   :  { %7280 = shalt.err (!%p7277_p5)
}
 0x3b4   :  { %5383 = dma.vmem_to_hbm [thread:$0]  %s5378_s6, 2048, %s8270_s7, [#allocation6], %s7299_s11, %s7299_s11, %s7300_s12  }
 0x3b5   :  { %7293 = dma.done.wait [#allocation6], 2048  }
 0x3b6   :  { %7294 = vsyncadd [#allocation6], 4294965248 }
 0x3b7   :  { %5387 = vsyncpa [#allocation5], 1 }
 0x3b8   :  { %5388 = vsyncpa [#allocation8], 1 }
 0x3b9   :  { %5389 = vsyncpa [#allocation6], 1 }

</bundles_post_ra>
